<compile_context>
chip_gen: v6e
topology: v6e:2x2x1
jax: 0.10.0
libtpu: 0.0.40
codegen_flags: <defaults>
</compile_context>

<pallas_src>
import functools
import warnings

import jax
import jax.numpy as jnp
from jax.experimental import pallas as pl
from jax.experimental.pallas import tpu as pltpu

NEG_SLOPE = 0.01  # PyTorch nn.LeakyReLU default


def _leaky(v):
    return jnp.where(v >= 0, v, NEG_SLOPE * v)


def _adaptive_bounds(size, out):
    # PyTorch adaptive pooling regions: [floor(i*size/out), ceil((i+1)*size/out))
    return tuple(
        (int((i * size) // out), int(((i + 1) * size + out - 1) // out))
        for i in range(out)
    )


def _channel_kernel(x_ref, w_ref, b_ref, o_ref, *, W, h_bounds, w_bounds):
    # x_ref / o_ref : (Nb, Cb, H*W)   lane-dense spatial slab
    # w_ref         : (9, 12, Cb)     depthwise 3x3 taps, channels on lanes
    # b_ref         : (12, Cb)        biases, channels on lanes

    # ---- adaptive 3x3 max pool: one dense contiguous load per H-band, then
    #      a masked -inf lane reduce per (i, j) window over the loaded slab ----
    pooled = []                                                   # 9 x (Nb, Cb) f32
    for (hs, he) in h_bounds:
        bw = (he - hs) * W
        slab = x_ref[:, :, pl.ds(hs * W, bw)].astype(jnp.float32)  # (Nb, Cb, bw)
        col = jax.lax.broadcasted_iota(jnp.int32, (1, 1, bw), 2) % W
        for (ws, we) in w_bounds:
            sel = jnp.where((col >= ws) & (col < we), slab, -jnp.inf)
            pooled.append(jnp.max(sel, axis=-1))                   # (Nb, Cb)

    # ---- 12 depthwise 3x3 convs + gating; channels stay on the lane axis ----
    add = None
    for k in range(12):
        acc = b_ref[pl.ds(k, 1), :].astype(jnp.float32)            # (1, Cb)
        for t in range(9):
            wk = w_ref[t, pl.ds(k, 1), :].astype(jnp.float32)      # (1, Cb)
            acc = acc + pooled[t] * wk                             # (Nb, Cb)
        g = jax.nn.sigmoid(_leaky(acc))
        add = g if add is None else add + g
    add = _leaky(add)                                              # (Nb, Cb)

    # ---- broadcast the gate over the spatial slab (single small relayout) ----
    o_ref[...] = _leaky(add[:, :, None] * x_ref[...]).astype(o_ref.dtype)


def _pick_blocks(N, C, HW, itemsize, target_bytes, *, min_grid_blocks=2):
    """Pick (nb, cb) so one x block stays near `target_bytes`.

    The channel axis sits on the *lane* dim of the weight/bias blocks and on
    the sublane dim of the x block, so legal channel tiles are full C or a
    multiple-of-128 divisor of C (128 satisfies every dtype's sublane packing).
    """
    c_legal = [C] + [d for d in range(128, C, 128) if C % d == 0]
    c_fit = [d for d in c_legal if d * HW * itemsize <= target_bytes]
    cb = max(c_fit) if c_fit else min(c_legal)

    n_divs = [d for d in range(1, N + 1) if N % d == 0]
    n_fit = [d for d in n_divs if d * cb * HW * itemsize <= target_bytes]
    nb = max(n_fit) if n_fit else 1

    # v7x shards the "parallel" grid axes over 2 TensorCores: make sure there
    # are at least `min_grid_blocks` blocks so no core sits idle.  The extra
    # grid step costs ~0.35us on single-core chips (noise).
    if (N // nb) * (C // cb) < min_grid_blocks:
        if N > 1:
            nb = max(d for d in n_divs if d < N)
        else:
            c_smaller = [d for d in c_legal if d < C]
            if c_smaller:
                cb = max(c_smaller)
    return nb, cb


def channel_forward(x, w, b, *, block_target_bytes=None):
    """x: (N, C, H, W); w: (12, C, 3, 3); b: (12, C). Returns (N, C, H, W)."""
    N, C, H, W = x.shape
    HW = H * W
    h_bounds = _adaptive_bounds(H, 3)
    w_bounds = _adaptive_bounds(W, 3)

    try:
        vmem_cap = int(pltpu.get_tpu_info().vmem_capacity_bytes)
    except Exception:  # interpret mode / AOT on CPU: assume the tightest chip
        vmem_cap = 64 << 20
    if block_target_bytes is None:
        # v5e/v6e: 128 MiB VMEM -> go bigger; v7x: 64 MiB per TensorCore.
        block_target_bytes = (12 << 20) if vmem_cap >= (100 << 20) else (8 << 20)

    # Lane-dense view: the spatial plane maps onto the 128-wide lane axis.
    # NOTE: if H*W % 128 != 0 the x/out blocks get lane padding and the final
    # writes become masked stores; prefer shapes with H*W a multiple of 128.
    x_flat = x.reshape(N, C, HW)
    # (k, c, i, j) -> (i*3+j, k, c): channels lane-dense, no 12->128 padding.
    w_flat = jnp.transpose(w, (2, 3, 0, 1)).reshape(9, 12, C)
    b_flat = b                                                    # (12, C)

    nb, cb = _pick_blocks(N, C, HW, x.dtype.itemsize, block_target_bytes)
    grid = (N // nb, C // cb)

    # Derive the VMEM limit from the actual (padded, double-buffered) blocks.
    def pad(v, m):
        return -(-v // m) * m

    sub = {1: 32, 2: 16, 4: 8}
    x_bytes = nb * pad(cb, sub.get(x.dtype.itemsize, 8)) * pad(HW, 128) * x.dtype.itemsize
    w_bytes = 9 * pad(12, sub.get(w_flat.dtype.itemsize, 8)) * pad(cb, 128) * w_flat.dtype.itemsize
    b_bytes = pad(12, sub.get(b_flat.dtype.itemsize, 8)) * pad(cb, 128) * b_flat.dtype.itemsize
    vmem_need = 2 * (2 * x_bytes + w_bytes + b_bytes)             # x in/out + w + b, double-buffered
    vmem_limit = int(min(vmem_cap, max(vmem_need + (4 << 20), 16 << 20)))
    if x_bytes > 2 * block_target_bytes:
        warnings.warn(
            "Channel Pallas kernel: smallest legal block "
            f"({x_bytes} B) exceeds the per-block target ({block_target_bytes} B); "
            "tiling may be suboptimal for this shape.")

    kernel = functools.partial(
        _channel_kernel, W=W, h_bounds=h_bounds, w_bounds=w_bounds)

    out_flat = pl.pallas_call(
        kernel,
        out_shape=jax.ShapeDtypeStruct((N, C, HW), x.dtype),
        grid=grid,
        in_specs=[
            # TODO(synk): on v7x, if xprof shows exposed DMA at block
            # boundaries, bump this input to pipeline_mode=pl.Buffered(3).
            pl.BlockSpec((nb, cb, HW), lambda n, c: (n, c, 0)),
            pl.BlockSpec((9, 12, cb), lambda n, c: (0, 0, c)),
            pl.BlockSpec((12, cb), lambda n, c: (0, c)),
        ],
        out_specs=pl.BlockSpec((nb, cb, HW), lambda n, c: (n, c, 0)),
        compiler_params=pltpu.CompilerParams(
            dimension_semantics=("parallel", "parallel"),
            vmem_limit_bytes=vmem_limit,
        ),
    )(x_flat, w_flat, b_flat)
    return out_flat.reshape(N, C, H, W)


def _reference(x, w, b):
    # Pure-JAX reference of the PyTorch forward (silent sanity check).
    N, C, H, W = x.shape
    hb = _adaptive_bounds(H, 3)
    wb = _adaptive_bounds(W, 3)
    pooled = jnp.stack(
        [
            jnp.stack(
                [jnp.max(x[:, :, hs:he, ws:we], axis=(2, 3)) for (ws, we) in wb],
                axis=-1,
            )
            for (hs, he) in hb
        ],
        axis=-2,
    )                                                   # (N, C, 3, 3)
    conv = jnp.einsum("ncij,kcij->nkc", pooled, w) + b[None]   # (N, 12, C)
    gated = jax.nn.sigmoid(_leaky(conv))
    add = _leaky(jnp.sum(gated, axis=1))                # (N, C)
    return _leaky(add[:, :, None, None] * x)


if __name__ == "__main__":
    N, C, H, W = 2, 4, 16, 16
    key = jax.random.PRNGKey(0)
    kx, kw, kb = jax.random.split(key, 3)

    x = jax.random.normal(kx, (N, C, H, W), dtype=jnp.float32)
    # 12 depthwise Conv2d(C, C, k=3, groups=C): per-conv weight (C, 1, 3, 3)
    # packed as (12, C, 3, 3); biases packed as (12, C).
    w = 0.1 * jax.random.normal(kw, (12, C, 3, 3), dtype=jnp.float32)
    b = 0.1 * jax.random.normal(kb, (12, C), dtype=jnp.float32)

    out = channel_forward(x, w, b)
    out = jax.block_until_ready(out)

    ref = _reference(x, w, b)
    assert out.shape == (N, C, H, W)
    assert jnp.allclose(out, ref, atol=1e-4, rtol=1e-4)

    print("KERNEL_OK")
</pallas_src>

<mosaic_0001>
module attributes {stable_mosaic.version = 11 : i64} {
  func.func @_channel_kernel(%arg0: i32, %arg1: i32, %arg2: memref<1x4x256xf32, #tpu.memory_space<vmem>>, %arg3: memref<9x12x4xf32, #tpu.memory_space<vmem>>, %arg4: memref<12x4xf32, #tpu.memory_space<vmem>>, %arg5: memref<1x4x256xf32, #tpu.memory_space<vmem>>) attributes {dimension_semantics = [#tpu.dimension_semantics<parallel>, #tpu.dimension_semantics<parallel>], iteration_bounds = array<i64: 2, 1>, scalar_prefetch = 0 : i64, scratch_operands = 0 : i64, tpu.core_type = #tpu.core_type<tc>, window_params = [{transform_indices = @transform_0, window_bounds = array<i64: 1, 4, 256>}, {transform_indices = @transform_1, window_bounds = array<i64: 9, 12, 4>}, {transform_indices = @transform_2, window_bounds = array<i64: 12, 4>}, {transform_indices = @transform_3, window_bounds = array<i64: 1, 4, 256>}]} {
    %c0 = arith.constant 0 : index
    %c0_0 = arith.constant 0 : index
    %c0_1 = arith.constant 0 : index
    %0 = vector.load %arg2[%c0, %c0_0, %c0_1] : memref<1x4x256xf32, #tpu.memory_space<vmem>>, vector<1x4x96xf32>
    %1 = tpu.iota {dimensions = array<i32: 2>} : vector<1x1x96xi32>
    %c16_i32 = arith.constant 16 : i32
    %c0_i32 = arith.constant 0 : i32
    %2 = arith.cmpi eq, %c16_i32, %c0_i32 : i32
    %c1_i32 = arith.constant 1 : i32
    %3 = arith.select %2, %c1_i32, %c16_i32 : i32
    %4 = vector.broadcast %3 : i32 to vector<1x1x96xi32>
    %5 = arith.remsi %1, %4 : vector<1x1x96xi32>
    %c0_i32_2 = arith.constant 0 : i32
    %6 = vector.broadcast %c0_i32_2 : i32 to vector<1x1x96xi32>
    %7 = arith.cmpi ne, %5, %6 : vector<1x1x96xi32>
    %c0_i32_3 = arith.constant 0 : i32
    %8 = vector.broadcast %c0_i32_3 : i32 to vector<1x1x96xi32>
    %9 = arith.cmpi slt, %5, %8 : vector<1x1x96xi32>
    %c0_i32_4 = arith.constant 0 : i32
    %10 = arith.cmpi slt, %3, %c0_i32_4 : i32
    %11 = vector.broadcast %10 : i1 to vector<1x1x96xi1>
    %12 = vector.broadcast %11 : vector<1x1x96xi1> to vector<1x1x96xi1>
    %13 = arith.xori %9, %12 : vector<1x1x96xi1>
    %14 = arith.andi %13, %7 : vector<1x1x96xi1>
    %15 = vector.broadcast %3 : i32 to vector<1x1x96xi32>
    %16 = arith.addi %5, %15 : vector<1x1x96xi32>
    %17 = arith.select %14, %16, %5 : vector<1x1x96xi1>, vector<1x1x96xi32>
    %c0_i32_5 = arith.constant 0 : i32
    %18 = vector.broadcast %c0_i32_5 : i32 to vector<1x1x96xi32>
    %19 = arith.cmpi sge, %17, %18 : vector<1x1x96xi32>
    %c6_i32 = arith.constant 6 : i32
    %20 = vector.broadcast %c6_i32 : i32 to vector<1x1x96xi32>
    %21 = arith.cmpi slt, %17, %20 : vector<1x1x96xi32>
    %22 = arith.andi %19, %21 : vector<1x1x96xi1>
    %cst = arith.constant 0xFF800000 : f32
    %23 = vector.shape_cast %22 : vector<1x1x96xi1> to vector<1x1x96xi1>
    %24 = vector.broadcast %23 : vector<1x1x96xi1> to vector<1x4x96xi1>
    %25 = vector.broadcast %cst : f32 to vector<1x4x96xf32>
    %26 = arith.select %24, %0, %25 : vector<1x4x96xi1>, vector<1x4x96xf32>
    %cst_6 = arith.constant dense<0xFF800000> : vector<1x4xf32>
    %27 = vector.multi_reduction <maximumf>, %26, %cst_6 [2] : vector<1x4x96xf32> to vector<1x4xf32>
    %c5_i32 = arith.constant 5 : i32
    %28 = vector.broadcast %c5_i32 : i32 to vector<1x1x96xi32>
    %29 = arith.cmpi sge, %17, %28 : vector<1x1x96xi32>
    %c11_i32 = arith.constant 11 : i32
    %30 = vector.broadcast %c11_i32 : i32 to vector<1x1x96xi32>
    %31 = arith.cmpi slt, %17, %30 : vector<1x1x96xi32>
    %32 = arith.andi %29, %31 : vector<1x1x96xi1>
    %cst_7 = arith.constant 0xFF800000 : f32
    %33 = vector.shape_cast %32 : vector<1x1x96xi1> to vector<1x1x96xi1>
    %34 = vector.broadcast %33 : vector<1x1x96xi1> to vector<1x4x96xi1>
    %35 = vector.broadcast %cst_7 : f32 to vector<1x4x96xf32>
    %36 = arith.select %34, %0, %35 : vector<1x4x96xi1>, vector<1x4x96xf32>
    %cst_8 = arith.constant dense<0xFF800000> : vector<1x4xf32>
    %37 = vector.multi_reduction <maximumf>, %36, %cst_8 [2] : vector<1x4x96xf32> to vector<1x4xf32>
    %c10_i32 = arith.constant 10 : i32
    %38 = vector.broadcast %c10_i32 : i32 to vector<1x1x96xi32>
    %39 = arith.cmpi sge, %17, %38 : vector<1x1x96xi32>
    %c16_i32_9 = arith.constant 16 : i32
    %40 = vector.broadcast %c16_i32_9 : i32 to vector<1x1x96xi32>
    %41 = arith.cmpi slt, %17, %40 : vector<1x1x96xi32>
    %42 = arith.andi %39, %41 : vector<1x1x96xi1>
    %cst_10 = arith.constant 0xFF800000 : f32
    %43 = vector.shape_cast %42 : vector<1x1x96xi1> to vector<1x1x96xi1>
    %44 = vector.broadcast %43 : vector<1x1x96xi1> to vector<1x4x96xi1>
    %45 = vector.broadcast %cst_10 : f32 to vector<1x4x96xf32>
    %46 = arith.select %44, %0, %45 : vector<1x4x96xi1>, vector<1x4x96xf32>
    %cst_11 = arith.constant dense<0xFF800000> : vector<1x4xf32>
    %47 = vector.multi_reduction <maximumf>, %46, %cst_11 [2] : vector<1x4x96xf32> to vector<1x4xf32>
    %c0_12 = arith.constant 0 : index
    %c0_13 = arith.constant 0 : index
    %c80 = arith.constant 80 : index
    %48 = vector.load %arg2[%c0_12, %c0_13, %c80] : memref<1x4x256xf32, #tpu.memory_space<vmem>>, vector<1x4x96xf32>
    %49 = tpu.iota {dimensions = array<i32: 2>} : vector<1x1x96xi32>
    %c16_i32_14 = arith.constant 16 : i32
    %c0_i32_15 = arith.constant 0 : i32
    %50 = arith.cmpi eq, %c16_i32_14, %c0_i32_15 : i32
    %c1_i32_16 = arith.constant 1 : i32
    %51 = arith.select %50, %c1_i32_16, %c16_i32_14 : i32
    %52 = vector.broadcast %51 : i32 to vector<1x1x96xi32>
    %53 = arith.remsi %49, %52 : vector<1x1x96xi32>
    %c0_i32_17 = arith.constant 0 : i32
    %54 = vector.broadcast %c0_i32_17 : i32 to vector<1x1x96xi32>
    %55 = arith.cmpi ne, %53, %54 : vector<1x1x96xi32>
    %c0_i32_18 = arith.constant 0 : i32
    %56 = vector.broadcast %c0_i32_18 : i32 to vector<1x1x96xi32>
    %57 = arith.cmpi slt, %53, %56 : vector<1x1x96xi32>
    %c0_i32_19 = arith.constant 0 : i32
    %58 = arith.cmpi slt, %51, %c0_i32_19 : i32
    %59 = vector.broadcast %58 : i1 to vector<1x1x96xi1>
    %60 = vector.broadcast %59 : vector<1x1x96xi1> to vector<1x1x96xi1>
    %61 = arith.xori %57, %60 : vector<1x1x96xi1>
    %62 = arith.andi %61, %55 : vector<1x1x96xi1>
    %63 = vector.broadcast %51 : i32 to vector<1x1x96xi32>
    %64 = arith.addi %53, %63 : vector<1x1x96xi32>
    %65 = arith.select %62, %64, %53 : vector<1x1x96xi1>, vector<1x1x96xi32>
    %c0_i32_20 = arith.constant 0 : i32
    %66 = vector.broadcast %c0_i32_20 : i32 to vector<1x1x96xi32>
    %67 = arith.cmpi sge, %65, %66 : vector<1x1x96xi32>
    %c6_i32_21 = arith.constant 6 : i32
    %68 = vector.broadcast %c6_i32_21 : i32 to vector<1x1x96xi32>
    %69 = arith.cmpi slt, %65, %68 : vector<1x1x96xi32>
    %70 = arith.andi %67, %69 : vector<1x1x96xi1>
    %cst_22 = arith.constant 0xFF800000 : f32
    %71 = vector.shape_cast %70 : vector<1x1x96xi1> to vector<1x1x96xi1>
    %72 = vector.broadcast %71 : vector<1x1x96xi1> to vector<1x4x96xi1>
    %73 = vector.broadcast %cst_22 : f32 to vector<1x4x96xf32>
    %74 = arith.select %72, %48, %73 : vector<1x4x96xi1>, vector<1x4x96xf32>
    %cst_23 = arith.constant dense<0xFF800000> : vector<1x4xf32>
    %75 = vector.multi_reduction <maximumf>, %74, %cst_23 [2] : vector<1x4x96xf32> to vector<1x4xf32>
    %c5_i32_24 = arith.constant 5 : i32
    %76 = vector.broadcast %c5_i32_24 : i32 to vector<1x1x96xi32>
    %77 = arith.cmpi sge, %65, %76 : vector<1x1x96xi32>
    %c11_i32_25 = arith.constant 11 : i32
    %78 = vector.broadcast %c11_i32_25 : i32 to vector<1x1x96xi32>
    %79 = arith.cmpi slt, %65, %78 : vector<1x1x96xi32>
    %80 = arith.andi %77, %79 : vector<1x1x96xi1>
    %cst_26 = arith.constant 0xFF800000 : f32
    %81 = vector.shape_cast %80 : vector<1x1x96xi1> to vector<1x1x96xi1>
    %82 = vector.broadcast %81 : vector<1x1x96xi1> to vector<1x4x96xi1>
    %83 = vector.broadcast %cst_26 : f32 to vector<1x4x96xf32>
    %84 = arith.select %82, %48, %83 : vector<1x4x96xi1>, vector<1x4x96xf32>
    %cst_27 = arith.constant dense<0xFF800000> : vector<1x4xf32>
    %85 = vector.multi_reduction <maximumf>, %84, %cst_27 [2] : vector<1x4x96xf32> to vector<1x4xf32>
    %c10_i32_28 = arith.constant 10 : i32
    %86 = vector.broadcast %c10_i32_28 : i32 to vector<1x1x96xi32>
    %87 = arith.cmpi sge, %65, %86 : vector<1x1x96xi32>
    %c16_i32_29 = arith.constant 16 : i32
    %88 = vector.broadcast %c16_i32_29 : i32 to vector<1x1x96xi32>
    %89 = arith.cmpi slt, %65, %88 : vector<1x1x96xi32>
    %90 = arith.andi %87, %89 : vector<1x1x96xi1>
    %cst_30 = arith.constant 0xFF800000 : f32
    %91 = vector.shape_cast %90 : vector<1x1x96xi1> to vector<1x1x96xi1>
    %92 = vector.broadcast %91 : vector<1x1x96xi1> to vector<1x4x96xi1>
    %93 = vector.broadcast %cst_30 : f32 to vector<1x4x96xf32>
    %94 = arith.select %92, %48, %93 : vector<1x4x96xi1>, vector<1x4x96xf32>
    %cst_31 = arith.constant dense<0xFF800000> : vector<1x4xf32>
    %95 = vector.multi_reduction <maximumf>, %94, %cst_31 [2] : vector<1x4x96xf32> to vector<1x4xf32>
    %c0_32 = arith.constant 0 : index
    %c0_33 = arith.constant 0 : index
    %c160 = arith.constant 160 : index
    %96 = vector.load %arg2[%c0_32, %c0_33, %c160] : memref<1x4x256xf32, #tpu.memory_space<vmem>>, vector<1x4x96xf32>
    %97 = tpu.iota {dimensions = array<i32: 2>} : vector<1x1x96xi32>
    %c16_i32_34 = arith.constant 16 : i32
    %c0_i32_35 = arith.constant 0 : i32
    %98 = arith.cmpi eq, %c16_i32_34, %c0_i32_35 : i32
    %c1_i32_36 = arith.constant 1 : i32
    %99 = arith.select %98, %c1_i32_36, %c16_i32_34 : i32
    %100 = vector.broadcast %99 : i32 to vector<1x1x96xi32>
    %101 = arith.remsi %97, %100 : vector<1x1x96xi32>
    %c0_i32_37 = arith.constant 0 : i32
    %102 = vector.broadcast %c0_i32_37 : i32 to vector<1x1x96xi32>
    %103 = arith.cmpi ne, %101, %102 : vector<1x1x96xi32>
    %c0_i32_38 = arith.constant 0 : i32
    %104 = vector.broadcast %c0_i32_38 : i32 to vector<1x1x96xi32>
    %105 = arith.cmpi slt, %101, %104 : vector<1x1x96xi32>
    %c0_i32_39 = arith.constant 0 : i32
    %106 = arith.cmpi slt, %99, %c0_i32_39 : i32
    %107 = vector.broadcast %106 : i1 to vector<1x1x96xi1>
    %108 = vector.broadcast %107 : vector<1x1x96xi1> to vector<1x1x96xi1>
    %109 = arith.xori %105, %108 : vector<1x1x96xi1>
    %110 = arith.andi %109, %103 : vector<1x1x96xi1>
    %111 = vector.broadcast %99 : i32 to vector<1x1x96xi32>
    %112 = arith.addi %101, %111 : vector<1x1x96xi32>
    %113 = arith.select %110, %112, %101 : vector<1x1x96xi1>, vector<1x1x96xi32>
    %c0_i32_40 = arith.constant 0 : i32
    %114 = vector.broadcast %c0_i32_40 : i32 to vector<1x1x96xi32>
    %115 = arith.cmpi sge, %113, %114 : vector<1x1x96xi32>
    %c6_i32_41 = arith.constant 6 : i32
    %116 = vector.broadcast %c6_i32_41 : i32 to vector<1x1x96xi32>
    %117 = arith.cmpi slt, %113, %116 : vector<1x1x96xi32>
    %118 = arith.andi %115, %117 : vector<1x1x96xi1>
    %cst_42 = arith.constant 0xFF800000 : f32
    %119 = vector.shape_cast %118 : vector<1x1x96xi1> to vector<1x1x96xi1>
    %120 = vector.broadcast %119 : vector<1x1x96xi1> to vector<1x4x96xi1>
    %121 = vector.broadcast %cst_42 : f32 to vector<1x4x96xf32>
    %122 = arith.select %120, %96, %121 : vector<1x4x96xi1>, vector<1x4x96xf32>
    %cst_43 = arith.constant dense<0xFF800000> : vector<1x4xf32>
    %123 = vector.multi_reduction <maximumf>, %122, %cst_43 [2] : vector<1x4x96xf32> to vector<1x4xf32>
    %c5_i32_44 = arith.constant 5 : i32
    %124 = vector.broadcast %c5_i32_44 : i32 to vector<1x1x96xi32>
    %125 = arith.cmpi sge, %113, %124 : vector<1x1x96xi32>
    %c11_i32_45 = arith.constant 11 : i32
    %126 = vector.broadcast %c11_i32_45 : i32 to vector<1x1x96xi32>
    %127 = arith.cmpi slt, %113, %126 : vector<1x1x96xi32>
    %128 = arith.andi %125, %127 : vector<1x1x96xi1>
    %cst_46 = arith.constant 0xFF800000 : f32
    %129 = vector.shape_cast %128 : vector<1x1x96xi1> to vector<1x1x96xi1>
    %130 = vector.broadcast %129 : vector<1x1x96xi1> to vector<1x4x96xi1>
    %131 = vector.broadcast %cst_46 : f32 to vector<1x4x96xf32>
    %132 = arith.select %130, %96, %131 : vector<1x4x96xi1>, vector<1x4x96xf32>
    %cst_47 = arith.constant dense<0xFF800000> : vector<1x4xf32>
    %133 = vector.multi_reduction <maximumf>, %132, %cst_47 [2] : vector<1x4x96xf32> to vector<1x4xf32>
    %c10_i32_48 = arith.constant 10 : i32
    %134 = vector.broadcast %c10_i32_48 : i32 to vector<1x1x96xi32>
    %135 = arith.cmpi sge, %113, %134 : vector<1x1x96xi32>
    %c16_i32_49 = arith.constant 16 : i32
    %136 = vector.broadcast %c16_i32_49 : i32 to vector<1x1x96xi32>
    %137 = arith.cmpi slt, %113, %136 : vector<1x1x96xi32>
    %138 = arith.andi %135, %137 : vector<1x1x96xi1>
    %cst_50 = arith.constant 0xFF800000 : f32
    %139 = vector.shape_cast %138 : vector<1x1x96xi1> to vector<1x1x96xi1>
    %140 = vector.broadcast %139 : vector<1x1x96xi1> to vector<1x4x96xi1>
    %141 = vector.broadcast %cst_50 : f32 to vector<1x4x96xf32>
    %142 = arith.select %140, %96, %141 : vector<1x4x96xi1>, vector<1x4x96xf32>
    %cst_51 = arith.constant dense<0xFF800000> : vector<1x4xf32>
    %143 = vector.multi_reduction <maximumf>, %142, %cst_51 [2] : vector<1x4x96xf32> to vector<1x4xf32>
    %c0_52 = arith.constant 0 : index
    %c0_53 = arith.constant 0 : index
    %144 = vector.load %arg4[%c0_52, %c0_53] : memref<12x4xf32, #tpu.memory_space<vmem>>, vector<1x4xf32>
    %c0_54 = arith.constant 0 : index
    %c0_55 = arith.constant 0 : index
    %c0_56 = arith.constant 0 : index
    %145 = vector.load %arg3[%c0_54, %c0_55, %c0_56] : memref<9x12x4xf32, #tpu.memory_space<vmem>>, vector<1x1x4xf32>
    %146 = vector.shape_cast %145 : vector<1x1x4xf32> to vector<1x4xf32>
    %147 = arith.mulf %27, %146 : vector<1x4xf32>
    %148 = arith.addf %144, %147 : vector<1x4xf32>
    %c1 = arith.constant 1 : index
    %c0_57 = arith.constant 0 : index
    %c0_58 = arith.constant 0 : index
    %149 = vector.load %arg3[%c1, %c0_57, %c0_58] : memref<9x12x4xf32, #tpu.memory_space<vmem>>, vector<1x1x4xf32>
    %150 = vector.shape_cast %149 : vector<1x1x4xf32> to vector<1x4xf32>
    %151 = arith.mulf %37, %150 : vector<1x4xf32>
    %152 = arith.addf %148, %151 : vector<1x4xf32>
    %c2 = arith.constant 2 : index
    %c0_59 = arith.constant 0 : index
    %c0_60 = arith.constant 0 : index
    %153 = vector.load %arg3[%c2, %c0_59, %c0_60] : memref<9x12x4xf32, #tpu.memory_space<vmem>>, vector<1x1x4xf32>
    %154 = vector.shape_cast %153 : vector<1x1x4xf32> to vector<1x4xf32>
    %155 = arith.mulf %47, %154 : vector<1x4xf32>
    %156 = arith.addf %152, %155 : vector<1x4xf32>
    %c3 = arith.constant 3 : index
    %c0_61 = arith.constant 0 : index
    %c0_62 = arith.constant 0 : index
    %157 = vector.load %arg3[%c3, %c0_61, %c0_62] : memref<9x12x4xf32, #tpu.memory_space<vmem>>, vector<1x1x4xf32>
    %158 = vector.shape_cast %157 : vector<1x1x4xf32> to vector<1x4xf32>
    %159 = arith.mulf %75, %158 : vector<1x4xf32>
    %160 = arith.addf %156, %159 : vector<1x4xf32>
    %c4 = arith.constant 4 : index
    %c0_63 = arith.constant 0 : index
    %c0_64 = arith.constant 0 : index
    %161 = vector.load %arg3[%c4, %c0_63, %c0_64] : memref<9x12x4xf32, #tpu.memory_space<vmem>>, vector<1x1x4xf32>
    %162 = vector.shape_cast %161 : vector<1x1x4xf32> to vector<1x4xf32>
    %163 = arith.mulf %85, %162 : vector<1x4xf32>
    %164 = arith.addf %160, %163 : vector<1x4xf32>
    %c5 = arith.constant 5 : index
    %c0_65 = arith.constant 0 : index
    %c0_66 = arith.constant 0 : index
    %165 = vector.load %arg3[%c5, %c0_65, %c0_66] : memref<9x12x4xf32, #tpu.memory_space<vmem>>, vector<1x1x4xf32>
    %166 = vector.shape_cast %165 : vector<1x1x4xf32> to vector<1x4xf32>
    %167 = arith.mulf %95, %166 : vector<1x4xf32>
    %168 = arith.addf %164, %167 : vector<1x4xf32>
    %c6 = arith.constant 6 : index
    %c0_67 = arith.constant 0 : index
    %c0_68 = arith.constant 0 : index
    %169 = vector.load %arg3[%c6, %c0_67, %c0_68] : memref<9x12x4xf32, #tpu.memory_space<vmem>>, vector<1x1x4xf32>
    %170 = vector.shape_cast %169 : vector<1x1x4xf32> to vector<1x4xf32>
    %171 = arith.mulf %123, %170 : vector<1x4xf32>
    %172 = arith.addf %168, %171 : vector<1x4xf32>
    %c7 = arith.constant 7 : index
    %c0_69 = arith.constant 0 : index
    %c0_70 = arith.constant 0 : index
    %173 = vector.load %arg3[%c7, %c0_69, %c0_70] : memref<9x12x4xf32, #tpu.memory_space<vmem>>, vector<1x1x4xf32>
    %174 = vector.shape_cast %173 : vector<1x1x4xf32> to vector<1x4xf32>
    %175 = arith.mulf %133, %174 : vector<1x4xf32>
    %176 = arith.addf %172, %175 : vector<1x4xf32>
    %c8 = arith.constant 8 : index
    %c0_71 = arith.constant 0 : index
    %c0_72 = arith.constant 0 : index
    %177 = vector.load %arg3[%c8, %c0_71, %c0_72] : memref<9x12x4xf32, #tpu.memory_space<vmem>>, vector<1x1x4xf32>
    %178 = vector.shape_cast %177 : vector<1x1x4xf32> to vector<1x4xf32>
    %179 = arith.mulf %143, %178 : vector<1x4xf32>
    %180 = arith.addf %176, %179 : vector<1x4xf32>
    %cst_73 = arith.constant 0.000000e+00 : f32
    %181 = vector.broadcast %cst_73 : f32 to vector<1x4xf32>
    %182 = arith.cmpf oge, %180, %181 : vector<1x4xf32>
    %cst_74 = arith.constant 0.00999999977 : f32
    %183 = vector.broadcast %cst_74 : f32 to vector<1x4xf32>
    %184 = arith.mulf %183, %180 : vector<1x4xf32>
    %185 = arith.select %182, %180, %184 : vector<1x4xi1>, vector<1x4xf32>
    %186 = arith.negf %185 : vector<1x4xf32>
    %187 = math.exp %186 : vector<1x4xf32>
    %cst_75 = arith.constant 1.000000e+00 : f32
    %188 = vector.broadcast %cst_75 : f32 to vector<1x4xf32>
    %189 = arith.addf %188, %187 : vector<1x4xf32>
    %190 = arith.divf %188, %189 : vector<1x4xf32>
    %c1_76 = arith.constant 1 : index
    %c0_77 = arith.constant 0 : index
    %191 = vector.load %arg4[%c1_76, %c0_77] : memref<12x4xf32, #tpu.memory_space<vmem>>, vector<1x4xf32>
    %c0_78 = arith.constant 0 : index
    %c1_79 = arith.constant 1 : index
    %c0_80 = arith.constant 0 : index
    %192 = vector.load %arg3[%c0_78, %c1_79, %c0_80] : memref<9x12x4xf32, #tpu.memory_space<vmem>>, vector<1x1x4xf32>
    %193 = vector.shape_cast %192 : vector<1x1x4xf32> to vector<1x4xf32>
    %194 = arith.mulf %27, %193 : vector<1x4xf32>
    %195 = arith.addf %191, %194 : vector<1x4xf32>
    %c1_81 = arith.constant 1 : index
    %c1_82 = arith.constant 1 : index
    %c0_83 = arith.constant 0 : index
    %196 = vector.load %arg3[%c1_81, %c1_82, %c0_83] : memref<9x12x4xf32, #tpu.memory_space<vmem>>, vector<1x1x4xf32>
    %197 = vector.shape_cast %196 : vector<1x1x4xf32> to vector<1x4xf32>
    %198 = arith.mulf %37, %197 : vector<1x4xf32>
    %199 = arith.addf %195, %198 : vector<1x4xf32>
    %c2_84 = arith.constant 2 : index
    %c1_85 = arith.constant 1 : index
    %c0_86 = arith.constant 0 : index
    %200 = vector.load %arg3[%c2_84, %c1_85, %c0_86] : memref<9x12x4xf32, #tpu.memory_space<vmem>>, vector<1x1x4xf32>
    %201 = vector.shape_cast %200 : vector<1x1x4xf32> to vector<1x4xf32>
    %202 = arith.mulf %47, %201 : vector<1x4xf32>
    %203 = arith.addf %199, %202 : vector<1x4xf32>
    %c3_87 = arith.constant 3 : index
    %c1_88 = arith.constant 1 : index
    %c0_89 = arith.constant 0 : index
    %204 = vector.load %arg3[%c3_87, %c1_88, %c0_89] : memref<9x12x4xf32, #tpu.memory_space<vmem>>, vector<1x1x4xf32>
    %205 = vector.shape_cast %204 : vector<1x1x4xf32> to vector<1x4xf32>
    %206 = arith.mulf %75, %205 : vector<1x4xf32>
    %207 = arith.addf %203, %206 : vector<1x4xf32>
    %c4_90 = arith.constant 4 : index
    %c1_91 = arith.constant 1 : index
    %c0_92 = arith.constant 0 : index
    %208 = vector.load %arg3[%c4_90, %c1_91, %c0_92] : memref<9x12x4xf32, #tpu.memory_space<vmem>>, vector<1x1x4xf32>
    %209 = vector.shape_cast %208 : vector<1x1x4xf32> to vector<1x4xf32>
    %210 = arith.mulf %85, %209 : vector<1x4xf32>
    %211 = arith.addf %207, %210 : vector<1x4xf32>
    %c5_93 = arith.constant 5 : index
    %c1_94 = arith.constant 1 : index
    %c0_95 = arith.constant 0 : index
    %212 = vector.load %arg3[%c5_93, %c1_94, %c0_95] : memref<9x12x4xf32, #tpu.memory_space<vmem>>, vector<1x1x4xf32>
    %213 = vector.shape_cast %212 : vector<1x1x4xf32> to vector<1x4xf32>
    %214 = arith.mulf %95, %213 : vector<1x4xf32>
    %215 = arith.addf %211, %214 : vector<1x4xf32>
    %c6_96 = arith.constant 6 : index
    %c1_97 = arith.constant 1 : index
    %c0_98 = arith.constant 0 : index
    %216 = vector.load %arg3[%c6_96, %c1_97, %c0_98] : memref<9x12x4xf32, #tpu.memory_space<vmem>>, vector<1x1x4xf32>
    %217 = vector.shape_cast %216 : vector<1x1x4xf32> to vector<1x4xf32>
    %218 = arith.mulf %123, %217 : vector<1x4xf32>
    %219 = arith.addf %215, %218 : vector<1x4xf32>
    %c7_99 = arith.constant 7 : index
    %c1_100 = arith.constant 1 : index
    %c0_101 = arith.constant 0 : index
    %220 = vector.load %arg3[%c7_99, %c1_100, %c0_101] : memref<9x12x4xf32, #tpu.memory_space<vmem>>, vector<1x1x4xf32>
    %221 = vector.shape_cast %220 : vector<1x1x4xf32> to vector<1x4xf32>
    %222 = arith.mulf %133, %221 : vector<1x4xf32>
    %223 = arith.addf %219, %222 : vector<1x4xf32>
    %c8_102 = arith.constant 8 : index
    %c1_103 = arith.constant 1 : index
    %c0_104 = arith.constant 0 : index
    %224 = vector.load %arg3[%c8_102, %c1_103, %c0_104] : memref<9x12x4xf32, #tpu.memory_space<vmem>>, vector<1x1x4xf32>
    %225 = vector.shape_cast %224 : vector<1x1x4xf32> to vector<1x4xf32>
    %226 = arith.mulf %143, %225 : vector<1x4xf32>
    %227 = arith.addf %223, %226 : vector<1x4xf32>
    %cst_105 = arith.constant 0.000000e+00 : f32
    %228 = vector.broadcast %cst_105 : f32 to vector<1x4xf32>
    %229 = arith.cmpf oge, %227, %228 : vector<1x4xf32>
    %cst_106 = arith.constant 0.00999999977 : f32
    %230 = vector.broadcast %cst_106 : f32 to vector<1x4xf32>
    %231 = arith.mulf %230, %227 : vector<1x4xf32>
    %232 = arith.select %229, %227, %231 : vector<1x4xi1>, vector<1x4xf32>
    %233 = arith.negf %232 : vector<1x4xf32>
    %234 = math.exp %233 : vector<1x4xf32>
    %cst_107 = arith.constant 1.000000e+00 : f32
    %235 = vector.broadcast %cst_107 : f32 to vector<1x4xf32>
    %236 = arith.addf %235, %234 : vector<1x4xf32>
    %237 = arith.divf %235, %236 : vector<1x4xf32>
    %238 = arith.addf %190, %237 : vector<1x4xf32>
    %c2_108 = arith.constant 2 : index
    %c0_109 = arith.constant 0 : index
    %239 = vector.load %arg4[%c2_108, %c0_109] : memref<12x4xf32, #tpu.memory_space<vmem>>, vector<1x4xf32>
    %c0_110 = arith.constant 0 : index
    %c2_111 = arith.constant 2 : index
    %c0_112 = arith.constant 0 : index
    %240 = vector.load %arg3[%c0_110, %c2_111, %c0_112] : memref<9x12x4xf32, #tpu.memory_space<vmem>>, vector<1x1x4xf32>
    %241 = vector.shape_cast %240 : vector<1x1x4xf32> to vector<1x4xf32>
    %242 = arith.mulf %27, %241 : vector<1x4xf32>
    %243 = arith.addf %239, %242 : vector<1x4xf32>
    %c1_113 = arith.constant 1 : index
    %c2_114 = arith.constant 2 : index
    %c0_115 = arith.constant 0 : index
    %244 = vector.load %arg3[%c1_113, %c2_114, %c0_115] : memref<9x12x4xf32, #tpu.memory_space<vmem>>, vector<1x1x4xf32>
    %245 = vector.shape_cast %244 : vector<1x1x4xf32> to vector<1x4xf32>
    %246 = arith.mulf %37, %245 : vector<1x4xf32>
    %247 = arith.addf %243, %246 : vector<1x4xf32>
    %c2_116 = arith.constant 2 : index
    %c2_117 = arith.constant 2 : index
    %c0_118 = arith.constant 0 : index
    %248 = vector.load %arg3[%c2_116, %c2_117, %c0_118] : memref<9x12x4xf32, #tpu.memory_space<vmem>>, vector<1x1x4xf32>
    %249 = vector.shape_cast %248 : vector<1x1x4xf32> to vector<1x4xf32>
    %250 = arith.mulf %47, %249 : vector<1x4xf32>
    %251 = arith.addf %247, %250 : vector<1x4xf32>
    %c3_119 = arith.constant 3 : index
    %c2_120 = arith.constant 2 : index
    %c0_121 = arith.constant 0 : index
    %252 = vector.load %arg3[%c3_119, %c2_120, %c0_121] : memref<9x12x4xf32, #tpu.memory_space<vmem>>, vector<1x1x4xf32>
    %253 = vector.shape_cast %252 : vector<1x1x4xf32> to vector<1x4xf32>
    %254 = arith.mulf %75, %253 : vector<1x4xf32>
    %255 = arith.addf %251, %254 : vector<1x4xf32>
    %c4_122 = arith.constant 4 : index
    %c2_123 = arith.constant 2 : index
    %c0_124 = arith.constant 0 : index
    %256 = vector.load %arg3[%c4_122, %c2_123, %c0_124] : memref<9x12x4xf32, #tpu.memory_space<vmem>>, vector<1x1x4xf32>
    %257 = vector.shape_cast %256 : vector<1x1x4xf32> to vector<1x4xf32>
    %258 = arith.mulf %85, %257 : vector<1x4xf32>
    %259 = arith.addf %255, %258 : vector<1x4xf32>
    %c5_125 = arith.constant 5 : index
    %c2_126 = arith.constant 2 : index
    %c0_127 = arith.constant 0 : index
    %260 = vector.load %arg3[%c5_125, %c2_126, %c0_127] : memref<9x12x4xf32, #tpu.memory_space<vmem>>, vector<1x1x4xf32>
    %261 = vector.shape_cast %260 : vector<1x1x4xf32> to vector<1x4xf32>
    %262 = arith.mulf %95, %261 : vector<1x4xf32>
    %263 = arith.addf %259, %262 : vector<1x4xf32>
    %c6_128 = arith.constant 6 : index
    %c2_129 = arith.constant 2 : index
    %c0_130 = arith.constant 0 : index
    %264 = vector.load %arg3[%c6_128, %c2_129, %c0_130] : memref<9x12x4xf32, #tpu.memory_space<vmem>>, vector<1x1x4xf32>
    %265 = vector.shape_cast %264 : vector<1x1x4xf32> to vector<1x4xf32>
    %266 = arith.mulf %123, %265 : vector<1x4xf32>
    %267 = arith.addf %263, %266 : vector<1x4xf32>
    %c7_131 = arith.constant 7 : index
    %c2_132 = arith.constant 2 : index
    %c0_133 = arith.constant 0 : index
    %268 = vector.load %arg3[%c7_131, %c2_132, %c0_133] : memref<9x12x4xf32, #tpu.memory_space<vmem>>, vector<1x1x4xf32>
    %269 = vector.shape_cast %268 : vector<1x1x4xf32> to vector<1x4xf32>
    %270 = arith.mulf %133, %269 : vector<1x4xf32>
    %271 = arith.addf %267, %270 : vector<1x4xf32>
    %c8_134 = arith.constant 8 : index
    %c2_135 = arith.constant 2 : index
    %c0_136 = arith.constant 0 : index
    %272 = vector.load %arg3[%c8_134, %c2_135, %c0_136] : memref<9x12x4xf32, #tpu.memory_space<vmem>>, vector<1x1x4xf32>
    %273 = vector.shape_cast %272 : vector<1x1x4xf32> to vector<1x4xf32>
    %274 = arith.mulf %143, %273 : vector<1x4xf32>
    %275 = arith.addf %271, %274 : vector<1x4xf32>
    %cst_137 = arith.constant 0.000000e+00 : f32
    %276 = vector.broadcast %cst_137 : f32 to vector<1x4xf32>
    %277 = arith.cmpf oge, %275, %276 : vector<1x4xf32>
    %cst_138 = arith.constant 0.00999999977 : f32
    %278 = vector.broadcast %cst_138 : f32 to vector<1x4xf32>
    %279 = arith.mulf %278, %275 : vector<1x4xf32>
    %280 = arith.select %277, %275, %279 : vector<1x4xi1>, vector<1x4xf32>
    %281 = arith.negf %280 : vector<1x4xf32>
    %282 = math.exp %281 : vector<1x4xf32>
    %cst_139 = arith.constant 1.000000e+00 : f32
    %283 = vector.broadcast %cst_139 : f32 to vector<1x4xf32>
    %284 = arith.addf %283, %282 : vector<1x4xf32>
    %285 = arith.divf %283, %284 : vector<1x4xf32>
    %286 = arith.addf %238, %285 : vector<1x4xf32>
    %c3_140 = arith.constant 3 : index
    %c0_141 = arith.constant 0 : index
    %287 = vector.load %arg4[%c3_140, %c0_141] : memref<12x4xf32, #tpu.memory_space<vmem>>, vector<1x4xf32>
    %c0_142 = arith.constant 0 : index
    %c3_143 = arith.constant 3 : index
    %c0_144 = arith.constant 0 : index
    %288 = vector.load %arg3[%c0_142, %c3_143, %c0_144] : memref<9x12x4xf32, #tpu.memory_space<vmem>>, vector<1x1x4xf32>
    %289 = vector.shape_cast %288 : vector<1x1x4xf32> to vector<1x4xf32>
    %290 = arith.mulf %27, %289 : vector<1x4xf32>
    %291 = arith.addf %287, %290 : vector<1x4xf32>
    %c1_145 = arith.constant 1 : index
    %c3_146 = arith.constant 3 : index
    %c0_147 = arith.constant 0 : index
    %292 = vector.load %arg3[%c1_145, %c3_146, %c0_147] : memref<9x12x4xf32, #tpu.memory_space<vmem>>, vector<1x1x4xf32>
    %293 = vector.shape_cast %292 : vector<1x1x4xf32> to vector<1x4xf32>
    %294 = arith.mulf %37, %293 : vector<1x4xf32>
    %295 = arith.addf %291, %294 : vector<1x4xf32>
    %c2_148 = arith.constant 2 : index
    %c3_149 = arith.constant 3 : index
    %c0_150 = arith.constant 0 : index
    %296 = vector.load %arg3[%c2_148, %c3_149, %c0_150] : memref<9x12x4xf32, #tpu.memory_space<vmem>>, vector<1x1x4xf32>
    %297 = vector.shape_cast %296 : vector<1x1x4xf32> to vector<1x4xf32>
    %298 = arith.mulf %47, %297 : vector<1x4xf32>
    %299 = arith.addf %295, %298 : vector<1x4xf32>
    %c3_151 = arith.constant 3 : index
    %c3_152 = arith.constant 3 : index
    %c0_153 = arith.constant 0 : index
    %300 = vector.load %arg3[%c3_151, %c3_152, %c0_153] : memref<9x12x4xf32, #tpu.memory_space<vmem>>, vector<1x1x4xf32>
    %301 = vector.shape_cast %300 : vector<1x1x4xf32> to vector<1x4xf32>
    %302 = arith.mulf %75, %301 : vector<1x4xf32>
    %303 = arith.addf %299, %302 : vector<1x4xf32>
    %c4_154 = arith.constant 4 : index
    %c3_155 = arith.constant 3 : index
    %c0_156 = arith.constant 0 : index
    %304 = vector.load %arg3[%c4_154, %c3_155, %c0_156] : memref<9x12x4xf32, #tpu.memory_space<vmem>>, vector<1x1x4xf32>
    %305 = vector.shape_cast %304 : vector<1x1x4xf32> to vector<1x4xf32>
    %306 = arith.mulf %85, %305 : vector<1x4xf32>
    %307 = arith.addf %303, %306 : vector<1x4xf32>
    %c5_157 = arith.constant 5 : index
    %c3_158 = arith.constant 3 : index
    %c0_159 = arith.constant 0 : index
    %308 = vector.load %arg3[%c5_157, %c3_158, %c0_159] : memref<9x12x4xf32, #tpu.memory_space<vmem>>, vector<1x1x4xf32>
    %309 = vector.shape_cast %308 : vector<1x1x4xf32> to vector<1x4xf32>
    %310 = arith.mulf %95, %309 : vector<1x4xf32>
    %311 = arith.addf %307, %310 : vector<1x4xf32>
    %c6_160 = arith.constant 6 : index
    %c3_161 = arith.constant 3 : index
    %c0_162 = arith.constant 0 : index
    %312 = vector.load %arg3[%c6_160, %c3_161, %c0_162] : memref<9x12x4xf32, #tpu.memory_space<vmem>>, vector<1x1x4xf32>
    %313 = vector.shape_cast %312 : vector<1x1x4xf32> to vector<1x4xf32>
    %314 = arith.mulf %123, %313 : vector<1x4xf32>
    %315 = arith.addf %311, %314 : vector<1x4xf32>
    %c7_163 = arith.constant 7 : index
    %c3_164 = arith.constant 3 : index
    %c0_165 = arith.constant 0 : index
    %316 = vector.load %arg3[%c7_163, %c3_164, %c0_165] : memref<9x12x4xf32, #tpu.memory_space<vmem>>, vector<1x1x4xf32>
    %317 = vector.shape_cast %316 : vector<1x1x4xf32> to vector<1x4xf32>
    %318 = arith.mulf %133, %317 : vector<1x4xf32>
    %319 = arith.addf %315, %318 : vector<1x4xf32>
    %c8_166 = arith.constant 8 : index
    %c3_167 = arith.constant 3 : index
    %c0_168 = arith.constant 0 : index
    %320 = vector.load %arg3[%c8_166, %c3_167, %c0_168] : memref<9x12x4xf32, #tpu.memory_space<vmem>>, vector<1x1x4xf32>
    %321 = vector.shape_cast %320 : vector<1x1x4xf32> to vector<1x4xf32>
    %322 = arith.mulf %143, %321 : vector<1x4xf32>
    %323 = arith.addf %319, %322 : vector<1x4xf32>
    %cst_169 = arith.constant 0.000000e+00 : f32
    %324 = vector.broadcast %cst_169 : f32 to vector<1x4xf32>
    %325 = arith.cmpf oge, %323, %324 : vector<1x4xf32>
    %cst_170 = arith.constant 0.00999999977 : f32
    %326 = vector.broadcast %cst_170 : f32 to vector<1x4xf32>
    %327 = arith.mulf %326, %323 : vector<1x4xf32>
    %328 = arith.select %325, %323, %327 : vector<1x4xi1>, vector<1x4xf32>
    %329 = arith.negf %328 : vector<1x4xf32>
    %330 = math.exp %329 : vector<1x4xf32>
    %cst_171 = arith.constant 1.000000e+00 : f32
    %331 = vector.broadcast %cst_171 : f32 to vector<1x4xf32>
    %332 = arith.addf %331, %330 : vector<1x4xf32>
    %333 = arith.divf %331, %332 : vector<1x4xf32>
    %334 = arith.addf %286, %333 : vector<1x4xf32>
    %c4_172 = arith.constant 4 : index
    %c0_173 = arith.constant 0 : index
    %335 = vector.load %arg4[%c4_172, %c0_173] : memref<12x4xf32, #tpu.memory_space<vmem>>, vector<1x4xf32>
    %c0_174 = arith.constant 0 : index
    %c4_175 = arith.constant 4 : index
    %c0_176 = arith.constant 0 : index
    %336 = vector.load %arg3[%c0_174, %c4_175, %c0_176] : memref<9x12x4xf32, #tpu.memory_space<vmem>>, vector<1x1x4xf32>
    %337 = vector.shape_cast %336 : vector<1x1x4xf32> to vector<1x4xf32>
    %338 = arith.mulf %27, %337 : vector<1x4xf32>
    %339 = arith.addf %335, %338 : vector<1x4xf32>
    %c1_177 = arith.constant 1 : index
    %c4_178 = arith.constant 4 : index
    %c0_179 = arith.constant 0 : index
    %340 = vector.load %arg3[%c1_177, %c4_178, %c0_179] : memref<9x12x4xf32, #tpu.memory_space<vmem>>, vector<1x1x4xf32>
    %341 = vector.shape_cast %340 : vector<1x1x4xf32> to vector<1x4xf32>
    %342 = arith.mulf %37, %341 : vector<1x4xf32>
    %343 = arith.addf %339, %342 : vector<1x4xf32>
    %c2_180 = arith.constant 2 : index
    %c4_181 = arith.constant 4 : index
    %c0_182 = arith.constant 0 : index
    %344 = vector.load %arg3[%c2_180, %c4_181, %c0_182] : memref<9x12x4xf32, #tpu.memory_space<vmem>>, vector<1x1x4xf32>
    %345 = vector.shape_cast %344 : vector<1x1x4xf32> to vector<1x4xf32>
    %346 = arith.mulf %47, %345 : vector<1x4xf32>
    %347 = arith.addf %343, %346 : vector<1x4xf32>
    %c3_183 = arith.constant 3 : index
    %c4_184 = arith.constant 4 : index
    %c0_185 = arith.constant 0 : index
    %348 = vector.load %arg3[%c3_183, %c4_184, %c0_185] : memref<9x12x4xf32, #tpu.memory_space<vmem>>, vector<1x1x4xf32>
    %349 = vector.shape_cast %348 : vector<1x1x4xf32> to vector<1x4xf32>
    %350 = arith.mulf %75, %349 : vector<1x4xf32>
    %351 = arith.addf %347, %350 : vector<1x4xf32>
    %c4_186 = arith.constant 4 : index
    %c4_187 = arith.constant 4 : index
    %c0_188 = arith.constant 0 : index
    %352 = vector.load %arg3[%c4_186, %c4_187, %c0_188] : memref<9x12x4xf32, #tpu.memory_space<vmem>>, vector<1x1x4xf32>
    %353 = vector.shape_cast %352 : vector<1x1x4xf32> to vector<1x4xf32>
    %354 = arith.mulf %85, %353 : vector<1x4xf32>
    %355 = arith.addf %351, %354 : vector<1x4xf32>
    %c5_189 = arith.constant 5 : index
    %c4_190 = arith.constant 4 : index
    %c0_191 = arith.constant 0 : index
    %356 = vector.load %arg3[%c5_189, %c4_190, %c0_191] : memref<9x12x4xf32, #tpu.memory_space<vmem>>, vector<1x1x4xf32>
    %357 = vector.shape_cast %356 : vector<1x1x4xf32> to vector<1x4xf32>
    %358 = arith.mulf %95, %357 : vector<1x4xf32>
    %359 = arith.addf %355, %358 : vector<1x4xf32>
    %c6_192 = arith.constant 6 : index
    %c4_193 = arith.constant 4 : index
    %c0_194 = arith.constant 0 : index
    %360 = vector.load %arg3[%c6_192, %c4_193, %c0_194] : memref<9x12x4xf32, #tpu.memory_space<vmem>>, vector<1x1x4xf32>
    %361 = vector.shape_cast %360 : vector<1x1x4xf32> to vector<1x4xf32>
    %362 = arith.mulf %123, %361 : vector<1x4xf32>
    %363 = arith.addf %359, %362 : vector<1x4xf32>
    %c7_195 = arith.constant 7 : index
    %c4_196 = arith.constant 4 : index
    %c0_197 = arith.constant 0 : index
    %364 = vector.load %arg3[%c7_195, %c4_196, %c0_197] : memref<9x12x4xf32, #tpu.memory_space<vmem>>, vector<1x1x4xf32>
    %365 = vector.shape_cast %364 : vector<1x1x4xf32> to vector<1x4xf32>
    %366 = arith.mulf %133, %365 : vector<1x4xf32>
    %367 = arith.addf %363, %366 : vector<1x4xf32>
    %c8_198 = arith.constant 8 : index
    %c4_199 = arith.constant 4 : index
    %c0_200 = arith.constant 0 : index
    %368 = vector.load %arg3[%c8_198, %c4_199, %c0_200] : memref<9x12x4xf32, #tpu.memory_space<vmem>>, vector<1x1x4xf32>
    %369 = vector.shape_cast %368 : vector<1x1x4xf32> to vector<1x4xf32>
    %370 = arith.mulf %143, %369 : vector<1x4xf32>
    %371 = arith.addf %367, %370 : vector<1x4xf32>
    %cst_201 = arith.constant 0.000000e+00 : f32
    %372 = vector.broadcast %cst_201 : f32 to vector<1x4xf32>
    %373 = arith.cmpf oge, %371, %372 : vector<1x4xf32>
    %cst_202 = arith.constant 0.00999999977 : f32
    %374 = vector.broadcast %cst_202 : f32 to vector<1x4xf32>
    %375 = arith.mulf %374, %371 : vector<1x4xf32>
    %376 = arith.select %373, %371, %375 : vector<1x4xi1>, vector<1x4xf32>
    %377 = arith.negf %376 : vector<1x4xf32>
    %378 = math.exp %377 : vector<1x4xf32>
    %cst_203 = arith.constant 1.000000e+00 : f32
    %379 = vector.broadcast %cst_203 : f32 to vector<1x4xf32>
    %380 = arith.addf %379, %378 : vector<1x4xf32>
    %381 = arith.divf %379, %380 : vector<1x4xf32>
    %382 = arith.addf %334, %381 : vector<1x4xf32>
    %c5_204 = arith.constant 5 : index
    %c0_205 = arith.constant 0 : index
    %383 = vector.load %arg4[%c5_204, %c0_205] : memref<12x4xf32, #tpu.memory_space<vmem>>, vector<1x4xf32>
    %c0_206 = arith.constant 0 : index
    %c5_207 = arith.constant 5 : index
    %c0_208 = arith.constant 0 : index
    %384 = vector.load %arg3[%c0_206, %c5_207, %c0_208] : memref<9x12x4xf32, #tpu.memory_space<vmem>>, vector<1x1x4xf32>
    %385 = vector.shape_cast %384 : vector<1x1x4xf32> to vector<1x4xf32>
    %386 = arith.mulf %27, %385 : vector<1x4xf32>
    %387 = arith.addf %383, %386 : vector<1x4xf32>
    %c1_209 = arith.constant 1 : index
    %c5_210 = arith.constant 5 : index
    %c0_211 = arith.constant 0 : index
    %388 = vector.load %arg3[%c1_209, %c5_210, %c0_211] : memref<9x12x4xf32, #tpu.memory_space<vmem>>, vector<1x1x4xf32>
    %389 = vector.shape_cast %388 : vector<1x1x4xf32> to vector<1x4xf32>
    %390 = arith.mulf %37, %389 : vector<1x4xf32>
    %391 = arith.addf %387, %390 : vector<1x4xf32>
    %c2_212 = arith.constant 2 : index
    %c5_213 = arith.constant 5 : index
    %c0_214 = arith.constant 0 : index
    %392 = vector.load %arg3[%c2_212, %c5_213, %c0_214] : memref<9x12x4xf32, #tpu.memory_space<vmem>>, vector<1x1x4xf32>
    %393 = vector.shape_cast %392 : vector<1x1x4xf32> to vector<1x4xf32>
    %394 = arith.mulf %47, %393 : vector<1x4xf32>
    %395 = arith.addf %391, %394 : vector<1x4xf32>
    %c3_215 = arith.constant 3 : index
    %c5_216 = arith.constant 5 : index
    %c0_217 = arith.constant 0 : index
    %396 = vector.load %arg3[%c3_215, %c5_216, %c0_217] : memref<9x12x4xf32, #tpu.memory_space<vmem>>, vector<1x1x4xf32>
    %397 = vector.shape_cast %396 : vector<1x1x4xf32> to vector<1x4xf32>
    %398 = arith.mulf %75, %397 : vector<1x4xf32>
    %399 = arith.addf %395, %398 : vector<1x4xf32>
    %c4_218 = arith.constant 4 : index
    %c5_219 = arith.constant 5 : index
    %c0_220 = arith.constant 0 : index
    %400 = vector.load %arg3[%c4_218, %c5_219, %c0_220] : memref<9x12x4xf32, #tpu.memory_space<vmem>>, vector<1x1x4xf32>
    %401 = vector.shape_cast %400 : vector<1x1x4xf32> to vector<1x4xf32>
    %402 = arith.mulf %85, %401 : vector<1x4xf32>
    %403 = arith.addf %399, %402 : vector<1x4xf32>
    %c5_221 = arith.constant 5 : index
    %c5_222 = arith.constant 5 : index
    %c0_223 = arith.constant 0 : index
    %404 = vector.load %arg3[%c5_221, %c5_222, %c0_223] : memref<9x12x4xf32, #tpu.memory_space<vmem>>, vector<1x1x4xf32>
    %405 = vector.shape_cast %404 : vector<1x1x4xf32> to vector<1x4xf32>
    %406 = arith.mulf %95, %405 : vector<1x4xf32>
    %407 = arith.addf %403, %406 : vector<1x4xf32>
    %c6_224 = arith.constant 6 : index
    %c5_225 = arith.constant 5 : index
    %c0_226 = arith.constant 0 : index
    %408 = vector.load %arg3[%c6_224, %c5_225, %c0_226] : memref<9x12x4xf32, #tpu.memory_space<vmem>>, vector<1x1x4xf32>
    %409 = vector.shape_cast %408 : vector<1x1x4xf32> to vector<1x4xf32>
    %410 = arith.mulf %123, %409 : vector<1x4xf32>
    %411 = arith.addf %407, %410 : vector<1x4xf32>
    %c7_227 = arith.constant 7 : index
    %c5_228 = arith.constant 5 : index
    %c0_229 = arith.constant 0 : index
    %412 = vector.load %arg3[%c7_227, %c5_228, %c0_229] : memref<9x12x4xf32, #tpu.memory_space<vmem>>, vector<1x1x4xf32>
    %413 = vector.shape_cast %412 : vector<1x1x4xf32> to vector<1x4xf32>
    %414 = arith.mulf %133, %413 : vector<1x4xf32>
    %415 = arith.addf %411, %414 : vector<1x4xf32>
    %c8_230 = arith.constant 8 : index
    %c5_231 = arith.constant 5 : index
    %c0_232 = arith.constant 0 : index
    %416 = vector.load %arg3[%c8_230, %c5_231, %c0_232] : memref<9x12x4xf32, #tpu.memory_space<vmem>>, vector<1x1x4xf32>
    %417 = vector.shape_cast %416 : vector<1x1x4xf32> to vector<1x4xf32>
    %418 = arith.mulf %143, %417 : vector<1x4xf32>
    %419 = arith.addf %415, %418 : vector<1x4xf32>
    %cst_233 = arith.constant 0.000000e+00 : f32
    %420 = vector.broadcast %cst_233 : f32 to vector<1x4xf32>
    %421 = arith.cmpf oge, %419, %420 : vector<1x4xf32>
    %cst_234 = arith.constant 0.00999999977 : f32
    %422 = vector.broadcast %cst_234 : f32 to vector<1x4xf32>
    %423 = arith.mulf %422, %419 : vector<1x4xf32>
    %424 = arith.select %421, %419, %423 : vector<1x4xi1>, vector<1x4xf32>
    %425 = arith.negf %424 : vector<1x4xf32>
    %426 = math.exp %425 : vector<1x4xf32>
    %cst_235 = arith.constant 1.000000e+00 : f32
    %427 = vector.broadcast %cst_235 : f32 to vector<1x4xf32>
    %428 = arith.addf %427, %426 : vector<1x4xf32>
    %429 = arith.divf %427, %428 : vector<1x4xf32>
    %430 = arith.addf %382, %429 : vector<1x4xf32>
    %c6_236 = arith.constant 6 : index
    %c0_237 = arith.constant 0 : index
    %431 = vector.load %arg4[%c6_236, %c0_237] : memref<12x4xf32, #tpu.memory_space<vmem>>, vector<1x4xf32>
    %c0_238 = arith.constant 0 : index
    %c6_239 = arith.constant 6 : index
    %c0_240 = arith.constant 0 : index
    %432 = vector.load %arg3[%c0_238, %c6_239, %c0_240] : memref<9x12x4xf32, #tpu.memory_space<vmem>>, vector<1x1x4xf32>
    %433 = vector.shape_cast %432 : vector<1x1x4xf32> to vector<1x4xf32>
    %434 = arith.mulf %27, %433 : vector<1x4xf32>
    %435 = arith.addf %431, %434 : vector<1x4xf32>
    %c1_241 = arith.constant 1 : index
    %c6_242 = arith.constant 6 : index
    %c0_243 = arith.constant 0 : index
    %436 = vector.load %arg3[%c1_241, %c6_242, %c0_243] : memref<9x12x4xf32, #tpu.memory_space<vmem>>, vector<1x1x4xf32>
    %437 = vector.shape_cast %436 : vector<1x1x4xf32> to vector<1x4xf32>
    %438 = arith.mulf %37, %437 : vector<1x4xf32>
    %439 = arith.addf %435, %438 : vector<1x4xf32>
    %c2_244 = arith.constant 2 : index
    %c6_245 = arith.constant 6 : index
    %c0_246 = arith.constant 0 : index
    %440 = vector.load %arg3[%c2_244, %c6_245, %c0_246] : memref<9x12x4xf32, #tpu.memory_space<vmem>>, vector<1x1x4xf32>
    %441 = vector.shape_cast %440 : vector<1x1x4xf32> to vector<1x4xf32>
    %442 = arith.mulf %47, %441 : vector<1x4xf32>
    %443 = arith.addf %439, %442 : vector<1x4xf32>
    %c3_247 = arith.constant 3 : index
    %c6_248 = arith.constant 6 : index
    %c0_249 = arith.constant 0 : index
    %444 = vector.load %arg3[%c3_247, %c6_248, %c0_249] : memref<9x12x4xf32, #tpu.memory_space<vmem>>, vector<1x1x4xf32>
    %445 = vector.shape_cast %444 : vector<1x1x4xf32> to vector<1x4xf32>
    %446 = arith.mulf %75, %445 : vector<1x4xf32>
    %447 = arith.addf %443, %446 : vector<1x4xf32>
    %c4_250 = arith.constant 4 : index
    %c6_251 = arith.constant 6 : index
    %c0_252 = arith.constant 0 : index
    %448 = vector.load %arg3[%c4_250, %c6_251, %c0_252] : memref<9x12x4xf32, #tpu.memory_space<vmem>>, vector<1x1x4xf32>
    %449 = vector.shape_cast %448 : vector<1x1x4xf32> to vector<1x4xf32>
    %450 = arith.mulf %85, %449 : vector<1x4xf32>
    %451 = arith.addf %447, %450 : vector<1x4xf32>
    %c5_253 = arith.constant 5 : index
    %c6_254 = arith.constant 6 : index
    %c0_255 = arith.constant 0 : index
    %452 = vector.load %arg3[%c5_253, %c6_254, %c0_255] : memref<9x12x4xf32, #tpu.memory_space<vmem>>, vector<1x1x4xf32>
    %453 = vector.shape_cast %452 : vector<1x1x4xf32> to vector<1x4xf32>
    %454 = arith.mulf %95, %453 : vector<1x4xf32>
    %455 = arith.addf %451, %454 : vector<1x4xf32>
    %c6_256 = arith.constant 6 : index
    %c6_257 = arith.constant 6 : index
    %c0_258 = arith.constant 0 : index
    %456 = vector.load %arg3[%c6_256, %c6_257, %c0_258] : memref<9x12x4xf32, #tpu.memory_space<vmem>>, vector<1x1x4xf32>
    %457 = vector.shape_cast %456 : vector<1x1x4xf32> to vector<1x4xf32>
    %458 = arith.mulf %123, %457 : vector<1x4xf32>
    %459 = arith.addf %455, %458 : vector<1x4xf32>
    %c7_259 = arith.constant 7 : index
    %c6_260 = arith.constant 6 : index
    %c0_261 = arith.constant 0 : index
    %460 = vector.load %arg3[%c7_259, %c6_260, %c0_261] : memref<9x12x4xf32, #tpu.memory_space<vmem>>, vector<1x1x4xf32>
    %461 = vector.shape_cast %460 : vector<1x1x4xf32> to vector<1x4xf32>
    %462 = arith.mulf %133, %461 : vector<1x4xf32>
    %463 = arith.addf %459, %462 : vector<1x4xf32>
    %c8_262 = arith.constant 8 : index
    %c6_263 = arith.constant 6 : index
    %c0_264 = arith.constant 0 : index
    %464 = vector.load %arg3[%c8_262, %c6_263, %c0_264] : memref<9x12x4xf32, #tpu.memory_space<vmem>>, vector<1x1x4xf32>
    %465 = vector.shape_cast %464 : vector<1x1x4xf32> to vector<1x4xf32>
    %466 = arith.mulf %143, %465 : vector<1x4xf32>
    %467 = arith.addf %463, %466 : vector<1x4xf32>
    %cst_265 = arith.constant 0.000000e+00 : f32
    %468 = vector.broadcast %cst_265 : f32 to vector<1x4xf32>
    %469 = arith.cmpf oge, %467, %468 : vector<1x4xf32>
    %cst_266 = arith.constant 0.00999999977 : f32
    %470 = vector.broadcast %cst_266 : f32 to vector<1x4xf32>
    %471 = arith.mulf %470, %467 : vector<1x4xf32>
    %472 = arith.select %469, %467, %471 : vector<1x4xi1>, vector<1x4xf32>
    %473 = arith.negf %472 : vector<1x4xf32>
    %474 = math.exp %473 : vector<1x4xf32>
    %cst_267 = arith.constant 1.000000e+00 : f32
    %475 = vector.broadcast %cst_267 : f32 to vector<1x4xf32>
    %476 = arith.addf %475, %474 : vector<1x4xf32>
    %477 = arith.divf %475, %476 : vector<1x4xf32>
    %478 = arith.addf %430, %477 : vector<1x4xf32>
    %c7_268 = arith.constant 7 : index
    %c0_269 = arith.constant 0 : index
    %479 = vector.load %arg4[%c7_268, %c0_269] : memref<12x4xf32, #tpu.memory_space<vmem>>, vector<1x4xf32>
    %c0_270 = arith.constant 0 : index
    %c7_271 = arith.constant 7 : index
    %c0_272 = arith.constant 0 : index
    %480 = vector.load %arg3[%c0_270, %c7_271, %c0_272] : memref<9x12x4xf32, #tpu.memory_space<vmem>>, vector<1x1x4xf32>
    %481 = vector.shape_cast %480 : vector<1x1x4xf32> to vector<1x4xf32>
    %482 = arith.mulf %27, %481 : vector<1x4xf32>
    %483 = arith.addf %479, %482 : vector<1x4xf32>
    %c1_273 = arith.constant 1 : index
    %c7_274 = arith.constant 7 : index
    %c0_275 = arith.constant 0 : index
    %484 = vector.load %arg3[%c1_273, %c7_274, %c0_275] : memref<9x12x4xf32, #tpu.memory_space<vmem>>, vector<1x1x4xf32>
    %485 = vector.shape_cast %484 : vector<1x1x4xf32> to vector<1x4xf32>
    %486 = arith.mulf %37, %485 : vector<1x4xf32>
    %487 = arith.addf %483, %486 : vector<1x4xf32>
    %c2_276 = arith.constant 2 : index
    %c7_277 = arith.constant 7 : index
    %c0_278 = arith.constant 0 : index
    %488 = vector.load %arg3[%c2_276, %c7_277, %c0_278] : memref<9x12x4xf32, #tpu.memory_space<vmem>>, vector<1x1x4xf32>
    %489 = vector.shape_cast %488 : vector<1x1x4xf32> to vector<1x4xf32>
    %490 = arith.mulf %47, %489 : vector<1x4xf32>
    %491 = arith.addf %487, %490 : vector<1x4xf32>
    %c3_279 = arith.constant 3 : index
    %c7_280 = arith.constant 7 : index
    %c0_281 = arith.constant 0 : index
    %492 = vector.load %arg3[%c3_279, %c7_280, %c0_281] : memref<9x12x4xf32, #tpu.memory_space<vmem>>, vector<1x1x4xf32>
    %493 = vector.shape_cast %492 : vector<1x1x4xf32> to vector<1x4xf32>
    %494 = arith.mulf %75, %493 : vector<1x4xf32>
    %495 = arith.addf %491, %494 : vector<1x4xf32>
    %c4_282 = arith.constant 4 : index
    %c7_283 = arith.constant 7 : index
    %c0_284 = arith.constant 0 : index
    %496 = vector.load %arg3[%c4_282, %c7_283, %c0_284] : memref<9x12x4xf32, #tpu.memory_space<vmem>>, vector<1x1x4xf32>
    %497 = vector.shape_cast %496 : vector<1x1x4xf32> to vector<1x4xf32>
    %498 = arith.mulf %85, %497 : vector<1x4xf32>
    %499 = arith.addf %495, %498 : vector<1x4xf32>
    %c5_285 = arith.constant 5 : index
    %c7_286 = arith.constant 7 : index
    %c0_287 = arith.constant 0 : index
    %500 = vector.load %arg3[%c5_285, %c7_286, %c0_287] : memref<9x12x4xf32, #tpu.memory_space<vmem>>, vector<1x1x4xf32>
    %501 = vector.shape_cast %500 : vector<1x1x4xf32> to vector<1x4xf32>
    %502 = arith.mulf %95, %501 : vector<1x4xf32>
    %503 = arith.addf %499, %502 : vector<1x4xf32>
    %c6_288 = arith.constant 6 : index
    %c7_289 = arith.constant 7 : index
    %c0_290 = arith.constant 0 : index
    %504 = vector.load %arg3[%c6_288, %c7_289, %c0_290] : memref<9x12x4xf32, #tpu.memory_space<vmem>>, vector<1x1x4xf32>
    %505 = vector.shape_cast %504 : vector<1x1x4xf32> to vector<1x4xf32>
    %506 = arith.mulf %123, %505 : vector<1x4xf32>
    %507 = arith.addf %503, %506 : vector<1x4xf32>
    %c7_291 = arith.constant 7 : index
    %c7_292 = arith.constant 7 : index
    %c0_293 = arith.constant 0 : index
    %508 = vector.load %arg3[%c7_291, %c7_292, %c0_293] : memref<9x12x4xf32, #tpu.memory_space<vmem>>, vector<1x1x4xf32>
    %509 = vector.shape_cast %508 : vector<1x1x4xf32> to vector<1x4xf32>
    %510 = arith.mulf %133, %509 : vector<1x4xf32>
    %511 = arith.addf %507, %510 : vector<1x4xf32>
    %c8_294 = arith.constant 8 : index
    %c7_295 = arith.constant 7 : index
    %c0_296 = arith.constant 0 : index
    %512 = vector.load %arg3[%c8_294, %c7_295, %c0_296] : memref<9x12x4xf32, #tpu.memory_space<vmem>>, vector<1x1x4xf32>
    %513 = vector.shape_cast %512 : vector<1x1x4xf32> to vector<1x4xf32>
    %514 = arith.mulf %143, %513 : vector<1x4xf32>
    %515 = arith.addf %511, %514 : vector<1x4xf32>
    %cst_297 = arith.constant 0.000000e+00 : f32
    %516 = vector.broadcast %cst_297 : f32 to vector<1x4xf32>
    %517 = arith.cmpf oge, %515, %516 : vector<1x4xf32>
    %cst_298 = arith.constant 0.00999999977 : f32
    %518 = vector.broadcast %cst_298 : f32 to vector<1x4xf32>
    %519 = arith.mulf %518, %515 : vector<1x4xf32>
    %520 = arith.select %517, %515, %519 : vector<1x4xi1>, vector<1x4xf32>
    %521 = arith.negf %520 : vector<1x4xf32>
    %522 = math.exp %521 : vector<1x4xf32>
    %cst_299 = arith.constant 1.000000e+00 : f32
    %523 = vector.broadcast %cst_299 : f32 to vector<1x4xf32>
    %524 = arith.addf %523, %522 : vector<1x4xf32>
    %525 = arith.divf %523, %524 : vector<1x4xf32>
    %526 = arith.addf %478, %525 : vector<1x4xf32>
    %c8_300 = arith.constant 8 : index
    %c0_301 = arith.constant 0 : index
    %527 = vector.load %arg4[%c8_300, %c0_301] : memref<12x4xf32, #tpu.memory_space<vmem>>, vector<1x4xf32>
    %c0_302 = arith.constant 0 : index
    %c8_303 = arith.constant 8 : index
    %c0_304 = arith.constant 0 : index
    %528 = vector.load %arg3[%c0_302, %c8_303, %c0_304] : memref<9x12x4xf32, #tpu.memory_space<vmem>>, vector<1x1x4xf32>
    %529 = vector.shape_cast %528 : vector<1x1x4xf32> to vector<1x4xf32>
    %530 = arith.mulf %27, %529 : vector<1x4xf32>
    %531 = arith.addf %527, %530 : vector<1x4xf32>
    %c1_305 = arith.constant 1 : index
    %c8_306 = arith.constant 8 : index
    %c0_307 = arith.constant 0 : index
    %532 = vector.load %arg3[%c1_305, %c8_306, %c0_307] : memref<9x12x4xf32, #tpu.memory_space<vmem>>, vector<1x1x4xf32>
    %533 = vector.shape_cast %532 : vector<1x1x4xf32> to vector<1x4xf32>
    %534 = arith.mulf %37, %533 : vector<1x4xf32>
    %535 = arith.addf %531, %534 : vector<1x4xf32>
    %c2_308 = arith.constant 2 : index
    %c8_309 = arith.constant 8 : index
    %c0_310 = arith.constant 0 : index
    %536 = vector.load %arg3[%c2_308, %c8_309, %c0_310] : memref<9x12x4xf32, #tpu.memory_space<vmem>>, vector<1x1x4xf32>
    %537 = vector.shape_cast %536 : vector<1x1x4xf32> to vector<1x4xf32>
    %538 = arith.mulf %47, %537 : vector<1x4xf32>
    %539 = arith.addf %535, %538 : vector<1x4xf32>
    %c3_311 = arith.constant 3 : index
    %c8_312 = arith.constant 8 : index
    %c0_313 = arith.constant 0 : index
    %540 = vector.load %arg3[%c3_311, %c8_312, %c0_313] : memref<9x12x4xf32, #tpu.memory_space<vmem>>, vector<1x1x4xf32>
    %541 = vector.shape_cast %540 : vector<1x1x4xf32> to vector<1x4xf32>
    %542 = arith.mulf %75, %541 : vector<1x4xf32>
    %543 = arith.addf %539, %542 : vector<1x4xf32>
    %c4_314 = arith.constant 4 : index
    %c8_315 = arith.constant 8 : index
    %c0_316 = arith.constant 0 : index
    %544 = vector.load %arg3[%c4_314, %c8_315, %c0_316] : memref<9x12x4xf32, #tpu.memory_space<vmem>>, vector<1x1x4xf32>
    %545 = vector.shape_cast %544 : vector<1x1x4xf32> to vector<1x4xf32>
    %546 = arith.mulf %85, %545 : vector<1x4xf32>
    %547 = arith.addf %543, %546 : vector<1x4xf32>
    %c5_317 = arith.constant 5 : index
    %c8_318 = arith.constant 8 : index
    %c0_319 = arith.constant 0 : index
    %548 = vector.load %arg3[%c5_317, %c8_318, %c0_319] : memref<9x12x4xf32, #tpu.memory_space<vmem>>, vector<1x1x4xf32>
    %549 = vector.shape_cast %548 : vector<1x1x4xf32> to vector<1x4xf32>
    %550 = arith.mulf %95, %549 : vector<1x4xf32>
    %551 = arith.addf %547, %550 : vector<1x4xf32>
    %c6_320 = arith.constant 6 : index
    %c8_321 = arith.constant 8 : index
    %c0_322 = arith.constant 0 : index
    %552 = vector.load %arg3[%c6_320, %c8_321, %c0_322] : memref<9x12x4xf32, #tpu.memory_space<vmem>>, vector<1x1x4xf32>
    %553 = vector.shape_cast %552 : vector<1x1x4xf32> to vector<1x4xf32>
    %554 = arith.mulf %123, %553 : vector<1x4xf32>
    %555 = arith.addf %551, %554 : vector<1x4xf32>
    %c7_323 = arith.constant 7 : index
    %c8_324 = arith.constant 8 : index
    %c0_325 = arith.constant 0 : index
    %556 = vector.load %arg3[%c7_323, %c8_324, %c0_325] : memref<9x12x4xf32, #tpu.memory_space<vmem>>, vector<1x1x4xf32>
    %557 = vector.shape_cast %556 : vector<1x1x4xf32> to vector<1x4xf32>
    %558 = arith.mulf %133, %557 : vector<1x4xf32>
    %559 = arith.addf %555, %558 : vector<1x4xf32>
    %c8_326 = arith.constant 8 : index
    %c8_327 = arith.constant 8 : index
    %c0_328 = arith.constant 0 : index
    %560 = vector.load %arg3[%c8_326, %c8_327, %c0_328] : memref<9x12x4xf32, #tpu.memory_space<vmem>>, vector<1x1x4xf32>
    %561 = vector.shape_cast %560 : vector<1x1x4xf32> to vector<1x4xf32>
    %562 = arith.mulf %143, %561 : vector<1x4xf32>
    %563 = arith.addf %559, %562 : vector<1x4xf32>
    %cst_329 = arith.constant 0.000000e+00 : f32
    %564 = vector.broadcast %cst_329 : f32 to vector<1x4xf32>
    %565 = arith.cmpf oge, %563, %564 : vector<1x4xf32>
    %cst_330 = arith.constant 0.00999999977 : f32
    %566 = vector.broadcast %cst_330 : f32 to vector<1x4xf32>
    %567 = arith.mulf %566, %563 : vector<1x4xf32>
    %568 = arith.select %565, %563, %567 : vector<1x4xi1>, vector<1x4xf32>
    %569 = arith.negf %568 : vector<1x4xf32>
    %570 = math.exp %569 : vector<1x4xf32>
    %cst_331 = arith.constant 1.000000e+00 : f32
    %571 = vector.broadcast %cst_331 : f32 to vector<1x4xf32>
    %572 = arith.addf %571, %570 : vector<1x4xf32>
    %573 = arith.divf %571, %572 : vector<1x4xf32>
    %574 = arith.addf %526, %573 : vector<1x4xf32>
    %c9 = arith.constant 9 : index
    %c0_332 = arith.constant 0 : index
    %575 = vector.load %arg4[%c9, %c0_332] : memref<12x4xf32, #tpu.memory_space<vmem>>, vector<1x4xf32>
    %c0_333 = arith.constant 0 : index
    %c9_334 = arith.constant 9 : index
    %c0_335 = arith.constant 0 : index
    %576 = vector.load %arg3[%c0_333, %c9_334, %c0_335] : memref<9x12x4xf32, #tpu.memory_space<vmem>>, vector<1x1x4xf32>
    %577 = vector.shape_cast %576 : vector<1x1x4xf32> to vector<1x4xf32>
    %578 = arith.mulf %27, %577 : vector<1x4xf32>
    %579 = arith.addf %575, %578 : vector<1x4xf32>
    %c1_336 = arith.constant 1 : index
    %c9_337 = arith.constant 9 : index
    %c0_338 = arith.constant 0 : index
    %580 = vector.load %arg3[%c1_336, %c9_337, %c0_338] : memref<9x12x4xf32, #tpu.memory_space<vmem>>, vector<1x1x4xf32>
    %581 = vector.shape_cast %580 : vector<1x1x4xf32> to vector<1x4xf32>
    %582 = arith.mulf %37, %581 : vector<1x4xf32>
    %583 = arith.addf %579, %582 : vector<1x4xf32>
    %c2_339 = arith.constant 2 : index
    %c9_340 = arith.constant 9 : index
    %c0_341 = arith.constant 0 : index
    %584 = vector.load %arg3[%c2_339, %c9_340, %c0_341] : memref<9x12x4xf32, #tpu.memory_space<vmem>>, vector<1x1x4xf32>
    %585 = vector.shape_cast %584 : vector<1x1x4xf32> to vector<1x4xf32>
    %586 = arith.mulf %47, %585 : vector<1x4xf32>
    %587 = arith.addf %583, %586 : vector<1x4xf32>
    %c3_342 = arith.constant 3 : index
    %c9_343 = arith.constant 9 : index
    %c0_344 = arith.constant 0 : index
    %588 = vector.load %arg3[%c3_342, %c9_343, %c0_344] : memref<9x12x4xf32, #tpu.memory_space<vmem>>, vector<1x1x4xf32>
    %589 = vector.shape_cast %588 : vector<1x1x4xf32> to vector<1x4xf32>
    %590 = arith.mulf %75, %589 : vector<1x4xf32>
    %591 = arith.addf %587, %590 : vector<1x4xf32>
    %c4_345 = arith.constant 4 : index
    %c9_346 = arith.constant 9 : index
    %c0_347 = arith.constant 0 : index
    %592 = vector.load %arg3[%c4_345, %c9_346, %c0_347] : memref<9x12x4xf32, #tpu.memory_space<vmem>>, vector<1x1x4xf32>
    %593 = vector.shape_cast %592 : vector<1x1x4xf32> to vector<1x4xf32>
    %594 = arith.mulf %85, %593 : vector<1x4xf32>
    %595 = arith.addf %591, %594 : vector<1x4xf32>
    %c5_348 = arith.constant 5 : index
    %c9_349 = arith.constant 9 : index
    %c0_350 = arith.constant 0 : index
    %596 = vector.load %arg3[%c5_348, %c9_349, %c0_350] : memref<9x12x4xf32, #tpu.memory_space<vmem>>, vector<1x1x4xf32>
    %597 = vector.shape_cast %596 : vector<1x1x4xf32> to vector<1x4xf32>
    %598 = arith.mulf %95, %597 : vector<1x4xf32>
    %599 = arith.addf %595, %598 : vector<1x4xf32>
    %c6_351 = arith.constant 6 : index
    %c9_352 = arith.constant 9 : index
    %c0_353 = arith.constant 0 : index
    %600 = vector.load %arg3[%c6_351, %c9_352, %c0_353] : memref<9x12x4xf32, #tpu.memory_space<vmem>>, vector<1x1x4xf32>
    %601 = vector.shape_cast %600 : vector<1x1x4xf32> to vector<1x4xf32>
    %602 = arith.mulf %123, %601 : vector<1x4xf32>
    %603 = arith.addf %599, %602 : vector<1x4xf32>
    %c7_354 = arith.constant 7 : index
    %c9_355 = arith.constant 9 : index
    %c0_356 = arith.constant 0 : index
    %604 = vector.load %arg3[%c7_354, %c9_355, %c0_356] : memref<9x12x4xf32, #tpu.memory_space<vmem>>, vector<1x1x4xf32>
    %605 = vector.shape_cast %604 : vector<1x1x4xf32> to vector<1x4xf32>
    %606 = arith.mulf %133, %605 : vector<1x4xf32>
    %607 = arith.addf %603, %606 : vector<1x4xf32>
    %c8_357 = arith.constant 8 : index
    %c9_358 = arith.constant 9 : index
    %c0_359 = arith.constant 0 : index
    %608 = vector.load %arg3[%c8_357, %c9_358, %c0_359] : memref<9x12x4xf32, #tpu.memory_space<vmem>>, vector<1x1x4xf32>
    %609 = vector.shape_cast %608 : vector<1x1x4xf32> to vector<1x4xf32>
    %610 = arith.mulf %143, %609 : vector<1x4xf32>
    %611 = arith.addf %607, %610 : vector<1x4xf32>
    %cst_360 = arith.constant 0.000000e+00 : f32
    %612 = vector.broadcast %cst_360 : f32 to vector<1x4xf32>
    %613 = arith.cmpf oge, %611, %612 : vector<1x4xf32>
    %cst_361 = arith.constant 0.00999999977 : f32
    %614 = vector.broadcast %cst_361 : f32 to vector<1x4xf32>
    %615 = arith.mulf %614, %611 : vector<1x4xf32>
    %616 = arith.select %613, %611, %615 : vector<1x4xi1>, vector<1x4xf32>
    %617 = arith.negf %616 : vector<1x4xf32>
    %618 = math.exp %617 : vector<1x4xf32>
    %cst_362 = arith.constant 1.000000e+00 : f32
    %619 = vector.broadcast %cst_362 : f32 to vector<1x4xf32>
    %620 = arith.addf %619, %618 : vector<1x4xf32>
    %621 = arith.divf %619, %620 : vector<1x4xf32>
    %622 = arith.addf %574, %621 : vector<1x4xf32>
    %c10 = arith.constant 10 : index
    %c0_363 = arith.constant 0 : index
    %623 = vector.load %arg4[%c10, %c0_363] : memref<12x4xf32, #tpu.memory_space<vmem>>, vector<1x4xf32>
    %c0_364 = arith.constant 0 : index
    %c10_365 = arith.constant 10 : index
    %c0_366 = arith.constant 0 : index
    %624 = vector.load %arg3[%c0_364, %c10_365, %c0_366] : memref<9x12x4xf32, #tpu.memory_space<vmem>>, vector<1x1x4xf32>
    %625 = vector.shape_cast %624 : vector<1x1x4xf32> to vector<1x4xf32>
    %626 = arith.mulf %27, %625 : vector<1x4xf32>
    %627 = arith.addf %623, %626 : vector<1x4xf32>
    %c1_367 = arith.constant 1 : index
    %c10_368 = arith.constant 10 : index
    %c0_369 = arith.constant 0 : index
    %628 = vector.load %arg3[%c1_367, %c10_368, %c0_369] : memref<9x12x4xf32, #tpu.memory_space<vmem>>, vector<1x1x4xf32>
    %629 = vector.shape_cast %628 : vector<1x1x4xf32> to vector<1x4xf32>
    %630 = arith.mulf %37, %629 : vector<1x4xf32>
    %631 = arith.addf %627, %630 : vector<1x4xf32>
    %c2_370 = arith.constant 2 : index
    %c10_371 = arith.constant 10 : index
    %c0_372 = arith.constant 0 : index
    %632 = vector.load %arg3[%c2_370, %c10_371, %c0_372] : memref<9x12x4xf32, #tpu.memory_space<vmem>>, vector<1x1x4xf32>
    %633 = vector.shape_cast %632 : vector<1x1x4xf32> to vector<1x4xf32>
    %634 = arith.mulf %47, %633 : vector<1x4xf32>
    %635 = arith.addf %631, %634 : vector<1x4xf32>
    %c3_373 = arith.constant 3 : index
    %c10_374 = arith.constant 10 : index
    %c0_375 = arith.constant 0 : index
    %636 = vector.load %arg3[%c3_373, %c10_374, %c0_375] : memref<9x12x4xf32, #tpu.memory_space<vmem>>, vector<1x1x4xf32>
    %637 = vector.shape_cast %636 : vector<1x1x4xf32> to vector<1x4xf32>
    %638 = arith.mulf %75, %637 : vector<1x4xf32>
    %639 = arith.addf %635, %638 : vector<1x4xf32>
    %c4_376 = arith.constant 4 : index
    %c10_377 = arith.constant 10 : index
    %c0_378 = arith.constant 0 : index
    %640 = vector.load %arg3[%c4_376, %c10_377, %c0_378] : memref<9x12x4xf32, #tpu.memory_space<vmem>>, vector<1x1x4xf32>
    %641 = vector.shape_cast %640 : vector<1x1x4xf32> to vector<1x4xf32>
    %642 = arith.mulf %85, %641 : vector<1x4xf32>
    %643 = arith.addf %639, %642 : vector<1x4xf32>
    %c5_379 = arith.constant 5 : index
    %c10_380 = arith.constant 10 : index
    %c0_381 = arith.constant 0 : index
    %644 = vector.load %arg3[%c5_379, %c10_380, %c0_381] : memref<9x12x4xf32, #tpu.memory_space<vmem>>, vector<1x1x4xf32>
    %645 = vector.shape_cast %644 : vector<1x1x4xf32> to vector<1x4xf32>
    %646 = arith.mulf %95, %645 : vector<1x4xf32>
    %647 = arith.addf %643, %646 : vector<1x4xf32>
    %c6_382 = arith.constant 6 : index
    %c10_383 = arith.constant 10 : index
    %c0_384 = arith.constant 0 : index
    %648 = vector.load %arg3[%c6_382, %c10_383, %c0_384] : memref<9x12x4xf32, #tpu.memory_space<vmem>>, vector<1x1x4xf32>
    %649 = vector.shape_cast %648 : vector<1x1x4xf32> to vector<1x4xf32>
    %650 = arith.mulf %123, %649 : vector<1x4xf32>
    %651 = arith.addf %647, %650 : vector<1x4xf32>
    %c7_385 = arith.constant 7 : index
    %c10_386 = arith.constant 10 : index
    %c0_387 = arith.constant 0 : index
    %652 = vector.load %arg3[%c7_385, %c10_386, %c0_387] : memref<9x12x4xf32, #tpu.memory_space<vmem>>, vector<1x1x4xf32>
    %653 = vector.shape_cast %652 : vector<1x1x4xf32> to vector<1x4xf32>
    %654 = arith.mulf %133, %653 : vector<1x4xf32>
    %655 = arith.addf %651, %654 : vector<1x4xf32>
    %c8_388 = arith.constant 8 : index
    %c10_389 = arith.constant 10 : index
    %c0_390 = arith.constant 0 : index
    %656 = vector.load %arg3[%c8_388, %c10_389, %c0_390] : memref<9x12x4xf32, #tpu.memory_space<vmem>>, vector<1x1x4xf32>
    %657 = vector.shape_cast %656 : vector<1x1x4xf32> to vector<1x4xf32>
    %658 = arith.mulf %143, %657 : vector<1x4xf32>
    %659 = arith.addf %655, %658 : vector<1x4xf32>
    %cst_391 = arith.constant 0.000000e+00 : f32
    %660 = vector.broadcast %cst_391 : f32 to vector<1x4xf32>
    %661 = arith.cmpf oge, %659, %660 : vector<1x4xf32>
    %cst_392 = arith.constant 0.00999999977 : f32
    %662 = vector.broadcast %cst_392 : f32 to vector<1x4xf32>
    %663 = arith.mulf %662, %659 : vector<1x4xf32>
    %664 = arith.select %661, %659, %663 : vector<1x4xi1>, vector<1x4xf32>
    %665 = arith.negf %664 : vector<1x4xf32>
    %666 = math.exp %665 : vector<1x4xf32>
    %cst_393 = arith.constant 1.000000e+00 : f32
    %667 = vector.broadcast %cst_393 : f32 to vector<1x4xf32>
    %668 = arith.addf %667, %666 : vector<1x4xf32>
    %669 = arith.divf %667, %668 : vector<1x4xf32>
    %670 = arith.addf %622, %669 : vector<1x4xf32>
    %c11 = arith.constant 11 : index
    %c0_394 = arith.constant 0 : index
    %671 = vector.load %arg4[%c11, %c0_394] : memref<12x4xf32, #tpu.memory_space<vmem>>, vector<1x4xf32>
    %c0_395 = arith.constant 0 : index
    %c11_396 = arith.constant 11 : index
    %c0_397 = arith.constant 0 : index
    %672 = vector.load %arg3[%c0_395, %c11_396, %c0_397] : memref<9x12x4xf32, #tpu.memory_space<vmem>>, vector<1x1x4xf32>
    %673 = vector.shape_cast %672 : vector<1x1x4xf32> to vector<1x4xf32>
    %674 = arith.mulf %27, %673 : vector<1x4xf32>
    %675 = arith.addf %671, %674 : vector<1x4xf32>
    %c1_398 = arith.constant 1 : index
    %c11_399 = arith.constant 11 : index
    %c0_400 = arith.constant 0 : index
    %676 = vector.load %arg3[%c1_398, %c11_399, %c0_400] : memref<9x12x4xf32, #tpu.memory_space<vmem>>, vector<1x1x4xf32>
    %677 = vector.shape_cast %676 : vector<1x1x4xf32> to vector<1x4xf32>
    %678 = arith.mulf %37, %677 : vector<1x4xf32>
    %679 = arith.addf %675, %678 : vector<1x4xf32>
    %c2_401 = arith.constant 2 : index
    %c11_402 = arith.constant 11 : index
    %c0_403 = arith.constant 0 : index
    %680 = vector.load %arg3[%c2_401, %c11_402, %c0_403] : memref<9x12x4xf32, #tpu.memory_space<vmem>>, vector<1x1x4xf32>
    %681 = vector.shape_cast %680 : vector<1x1x4xf32> to vector<1x4xf32>
    %682 = arith.mulf %47, %681 : vector<1x4xf32>
    %683 = arith.addf %679, %682 : vector<1x4xf32>
    %c3_404 = arith.constant 3 : index
    %c11_405 = arith.constant 11 : index
    %c0_406 = arith.constant 0 : index
    %684 = vector.load %arg3[%c3_404, %c11_405, %c0_406] : memref<9x12x4xf32, #tpu.memory_space<vmem>>, vector<1x1x4xf32>
    %685 = vector.shape_cast %684 : vector<1x1x4xf32> to vector<1x4xf32>
    %686 = arith.mulf %75, %685 : vector<1x4xf32>
    %687 = arith.addf %683, %686 : vector<1x4xf32>
    %c4_407 = arith.constant 4 : index
    %c11_408 = arith.constant 11 : index
    %c0_409 = arith.constant 0 : index
    %688 = vector.load %arg3[%c4_407, %c11_408, %c0_409] : memref<9x12x4xf32, #tpu.memory_space<vmem>>, vector<1x1x4xf32>
    %689 = vector.shape_cast %688 : vector<1x1x4xf32> to vector<1x4xf32>
    %690 = arith.mulf %85, %689 : vector<1x4xf32>
    %691 = arith.addf %687, %690 : vector<1x4xf32>
    %c5_410 = arith.constant 5 : index
    %c11_411 = arith.constant 11 : index
    %c0_412 = arith.constant 0 : index
    %692 = vector.load %arg3[%c5_410, %c11_411, %c0_412] : memref<9x12x4xf32, #tpu.memory_space<vmem>>, vector<1x1x4xf32>
    %693 = vector.shape_cast %692 : vector<1x1x4xf32> to vector<1x4xf32>
    %694 = arith.mulf %95, %693 : vector<1x4xf32>
    %695 = arith.addf %691, %694 : vector<1x4xf32>
    %c6_413 = arith.constant 6 : index
    %c11_414 = arith.constant 11 : index
    %c0_415 = arith.constant 0 : index
    %696 = vector.load %arg3[%c6_413, %c11_414, %c0_415] : memref<9x12x4xf32, #tpu.memory_space<vmem>>, vector<1x1x4xf32>
    %697 = vector.shape_cast %696 : vector<1x1x4xf32> to vector<1x4xf32>
    %698 = arith.mulf %123, %697 : vector<1x4xf32>
    %699 = arith.addf %695, %698 : vector<1x4xf32>
    %c7_416 = arith.constant 7 : index
    %c11_417 = arith.constant 11 : index
    %c0_418 = arith.constant 0 : index
    %700 = vector.load %arg3[%c7_416, %c11_417, %c0_418] : memref<9x12x4xf32, #tpu.memory_space<vmem>>, vector<1x1x4xf32>
    %701 = vector.shape_cast %700 : vector<1x1x4xf32> to vector<1x4xf32>
    %702 = arith.mulf %133, %701 : vector<1x4xf32>
    %703 = arith.addf %699, %702 : vector<1x4xf32>
    %c8_419 = arith.constant 8 : index
    %c11_420 = arith.constant 11 : index
    %c0_421 = arith.constant 0 : index
    %704 = vector.load %arg3[%c8_419, %c11_420, %c0_421] : memref<9x12x4xf32, #tpu.memory_space<vmem>>, vector<1x1x4xf32>
    %705 = vector.shape_cast %704 : vector<1x1x4xf32> to vector<1x4xf32>
    %706 = arith.mulf %143, %705 : vector<1x4xf32>
    %707 = arith.addf %703, %706 : vector<1x4xf32>
    %cst_422 = arith.constant 0.000000e+00 : f32
    %708 = vector.broadcast %cst_422 : f32 to vector<1x4xf32>
    %709 = arith.cmpf oge, %707, %708 : vector<1x4xf32>
    %cst_423 = arith.constant 0.00999999977 : f32
    %710 = vector.broadcast %cst_423 : f32 to vector<1x4xf32>
    %711 = arith.mulf %710, %707 : vector<1x4xf32>
    %712 = arith.select %709, %707, %711 : vector<1x4xi1>, vector<1x4xf32>
    %713 = arith.negf %712 : vector<1x4xf32>
    %714 = math.exp %713 : vector<1x4xf32>
    %cst_424 = arith.constant 1.000000e+00 : f32
    %715 = vector.broadcast %cst_424 : f32 to vector<1x4xf32>
    %716 = arith.addf %715, %714 : vector<1x4xf32>
    %717 = arith.divf %715, %716 : vector<1x4xf32>
    %718 = arith.addf %670, %717 : vector<1x4xf32>
    %cst_425 = arith.constant 0.000000e+00 : f32
    %719 = vector.broadcast %cst_425 : f32 to vector<1x4xf32>
    %720 = arith.cmpf oge, %718, %719 : vector<1x4xf32>
    %cst_426 = arith.constant 0.00999999977 : f32
    %721 = vector.broadcast %cst_426 : f32 to vector<1x4xf32>
    %722 = arith.mulf %721, %718 : vector<1x4xf32>
    %723 = arith.select %720, %718, %722 : vector<1x4xi1>, vector<1x4xf32>
    %724 = vector.shape_cast %723 : vector<1x4xf32> to vector<1x4x1xf32>
    %c0_427 = arith.constant 0 : index
    %c0_428 = arith.constant 0 : index
    %c0_429 = arith.constant 0 : index
    %725 = vector.load %arg2[%c0_427, %c0_428, %c0_429] : memref<1x4x256xf32, #tpu.memory_space<vmem>>, vector<1x4x256xf32>
    %726 = vector.broadcast %724 : vector<1x4x1xf32> to vector<1x4x256xf32>
    %727 = arith.mulf %726, %725 : vector<1x4x256xf32>
    %cst_430 = arith.constant 0.000000e+00 : f32
    %728 = vector.broadcast %cst_430 : f32 to vector<1x4x256xf32>
    %729 = arith.cmpf oge, %727, %728 : vector<1x4x256xf32>
    %cst_431 = arith.constant 0.00999999977 : f32
    %730 = vector.broadcast %cst_431 : f32 to vector<1x4x256xf32>
    %731 = arith.mulf %730, %727 : vector<1x4x256xf32>
    %732 = arith.select %729, %727, %731 : vector<1x4x256xi1>, vector<1x4x256xf32>
    %c0_432 = arith.constant 0 : index
    %c0_433 = arith.constant 0 : index
    %c0_434 = arith.constant 0 : index
    %733 = vector.load %arg5[%c0_432, %c0_433, %c0_434] : memref<1x4x256xf32, #tpu.memory_space<vmem>>, vector<1x4x256xf32>
    tpu.vector_store %arg5[%c0_432, %c0_433, %c0_434], %732 {strides = array<i32>} : memref<1x4x256xf32, #tpu.memory_space<vmem>>, vector<1x4x256xf32>,
    return
  }
  func.func @transform_0(%arg0: i32, %arg1: i32) -> (i32, i32, i32) {
    %c0_i32 = arith.constant 0 : i32
    %c0_i32_0 = arith.constant 0 : i32
    return %arg0, %arg1, %c0_i32 : i32, i32, i32
  }
  func.func @transform_1(%arg0: i32, %arg1: i32) -> (i32, i32, i32) {
    %c0_i32 = arith.constant 0 : i32
    %c0_i32_0 = arith.constant 0 : i32
    %c0_i32_1 = arith.constant 0 : i32
    return %c0_i32, %c0_i32_0, %arg1 : i32, i32, i32
  }
  func.func @transform_2(%arg0: i32, %arg1: i32) -> (i32, i32) {
    %c0_i32 = arith.constant 0 : i32
    %c0_i32_0 = arith.constant 0 : i32
    return %c0_i32, %arg1 : i32, i32
  }
  func.func @transform_3(%arg0: i32, %arg1: i32) -> (i32, i32, i32) {
    %c0_i32 = arith.constant 0 : i32
    %c0_i32_0 = arith.constant 0 : i32
    return %arg0, %arg1, %c0_i32 : i32, i32, i32
  }
}

</mosaic_0001>

<bundles_post_ra>
// kernel: tpu_custom_call.1
= control target key start
LH: loop header
LB: loop body
LE: loop exit
PB: predicated region body
PF: predicated region fallthrough
CT: control target
= control target key end

     0   :  { %8 = vsyncpa [#allocation3], 0  ;;  %s4485_s0 = inlined_call_operand.vmem [shape: f32[2,4,256], index: 0, kind: input, shape index: {}]   ;;  %s4486_s1 = inlined_call_operand.vmem [shape: f32[9,12,4], index: 1, kind: input, shape index: {}]   ;;  %s4487_s2 = inlined_call_operand.vmem [shape: f32[12,4], index: 2, kind: input, shape index: {}]   ;;  %s4488_s3 = inlined_call_operand.hbm [shape: f32[2,4,256], index: 3, kind: output, shape index: {}]  }
   0x1   :  { %10 = vsyncpa [#allocation3 + $0x1], 0  ;;  %s3318_s12 = smov 0   ;;  %s3320_s13 = smov 0  }
   0x2   :  { %s3322_s14 = smov 0   ;;  %s3324_s15 = smov 0  }
   0x3   :  { %s3326_s16 = smov 0   ;;  %s3328_s17 = smov 0  }
   0x4 LB: > { %s2873_s18 = sadd.s32 4294967295, %s3292_s17   ;;  %s2874_s19 = sadd.s32 4294967294, %s3292_s17   ;;  %s3292_s17 = sphi %s3328_s17, %s16_s17   ;;  %s3288_s16 = sphi %s3326_s16, %s4542_s16   ;;  %s3284_s15 = sphi %s3324_s15, %s4541_s15   ;;  %s3280_s14 = sphi %s3322_s14, %s4540_s14   ;;  %s3276_s13 = sphi %s3320_s13, %s4539_s13   ;;  %s3272_s12 = sphi %s3318_s12, %s4538_s12  }
   0x5   : > { %s28_s20 = sadd.s32 1, %s3288_s16  ;;  %s117_s21 = sadd.s32 1, %s3280_s14 }
   0x6   : > { %p30_p0 = scmp.ge.s32.totalorder %s28_s20, 2  ;;  %p127_p1 = scmp.ne.s32.totalorder %s3280_s14, %s3276_s13 }
   0x7   : > { %p128_p2 = scmp.eq.s32.totalorder %s2873_s18, 1  ;;  %p133_p3 = scmp.ne.s32.totalorder %s3276_s13, %s3272_s12 }
   0x8   : > { %s4544_s20 = smov (%p30_p0, %s28_s20), 0  ;;  %p134_p5 = scmp.eq.s32.totalorder %s2874_s19, 1 }
   0x9   : > { %p3358_p4 = por %p128_p2, %p127_p1  ;;  %s112_s23 = ssub.s32 %s3288_s16, %s4544_s20 }
   0xa   : > { %p2879_p6 = scmp.ge.s32.totalorder %s3292_s17, 1  ;;  %p115_p7 = scmp.eq.s32.totalorder %s112_s23, 0 }
   0xb   : > { %p3365_p8 = por %p134_p5, %p133_p3  ;;  %p178_p9 = scmp.lt.s32.totalorder %s3292_s17, 3 }
   0xc   : > { %s3371_s25 = scalar_select %p115_p7, %s3280_s14, %s117_s21  }
   0xd   : > { %p179_p10 = pnand %p2879_p6, %p178_p9 }
   0xf   : > { %182 = sbr.rel (%p179_p10) target bundleno = 1212 (0x4bc), region = 32 }
  0x14   : > { %p214_p11 = scmp.lt.s32.totalorder %s3284_s15, 1  ;;  %v4489_v0 = vlaneseq  ;;  %vm252_vm0 = vcmask 781312   ;;  %s3294_s4 = smov 48   ;;  %v2883_v12 = vld [vmem:[%s4486_s1] ss:$0 sm:$0xff]  ;;  %v3296_v21 = vmov 0  }
  0x15   : > { %v2885_v14 = vld [vmem:[%s4486_s1 + $0x10] ss:$0 sm:$0xff]  ;;  %v2887_v15 = vld [vmem:[%s4486_s1 + $0x20] ss:$0 sm:$0xff]  ;;  %s3295_s11 = smov 96   ;;  %3164 = vset.pattern.permute.xlu0 %v3296_v21  ;;  %3165 = vset.pattern.permute.xlu1 %v3296_v21  ;;  %vm281_vm6 = vcmask 392192  }
  0x16   : > { %s215_s26 = scalar_select %p214_p11, %s3284_s15, 1  ;;  %v3376_v1 = vand.u32 127, %v4489_v0  ;;  %v2889_v17 = vld [vmem:[%s4486_s1 + $0x30] ss:$0 sm:$0xff]  ;;  %v2891_v18 = vld [vmem:[%s4486_s1 + $0x40] ss:$0 sm:$0xff] }
  0x17   : > { %v2893_v19 = vld [vmem:[%s4486_s1 + $0x50] ss:$0 sm:$0xff]  ;;  %v2895_v20 = vld [vmem:[%s4486_s1 + $0x60] ss:$0 sm:$0xff]  ;;  %v2901_v24 = vld [vmem:[%s4486_s1 + $0x1] ss:$0 sm:$0xff] }
  0x18   : > { %s3104_s27 = sshll.u32 %s215_s26, 3  ;;  %v3379_v2 = vand.u32 15, %v3376_v1  ;;  %v2897_v22 = vld [vmem:[%s4486_s1 + $0x70] ss:$0 sm:$0xff]  ;;  %v2899_v23 = vld [vmem:[%s4486_s1 + $0x80] ss:$0 sm:$0xff] }
  0x19   : > { %s3384_s30 = scalar_lea.vmem %s4485_s0, %s3104_s27  ;;  %v2903_v25 = vld [vmem:[%s4486_s1 + $0x11] ss:$0 sm:$0xff]  ;;  %v2905_v58 = vld [vmem:[%s4486_s1 + $0x21] ss:$0 sm:$0xff]  ;;  %v2925_v6 = vld [vmem:[%s4486_s1 + $0x32] ss:$0 sm:$0xff] }
  0x1a   : > { %v231_v3 = vld [vmem:[%s3384_s30] sm:$0xf]  ;;  %vm265_vm1 = vcmp.ge.s32.totalorder %v3379_v2, 10  ;;  %vm247_vm2 = vcmp.lt.s32.totalorder %v3379_v2, 6  ;;  %vm256_vm3 = vcmp.ge.s32.totalorder %v3379_v2, 5  ;;  %vm257_vm4 = vcmp.lt.s32.totalorder %v3379_v2, 11 }
  0x1b   : > { %v270_v4 = vsel %vm265_vm1, %v231_v3, -inf  ;;  %v251_v5 = vsel %vm247_vm2, %v231_v3, -inf  ;;  %vm3395_vm5 = vmand %vm256_vm3, %vm257_vm4  ;;  %v274_v11 = vld [vmem:[%s3384_s30] sm:$0xff]  ;;  %v2907_v59 = vld [vmem:[%s4486_s1 + $0x31] ss:$0 sm:$0xff]  ;;  %s211_s6 = sand.u32 1, %s3276_s13  }
  0x1c   : > { %v271_v7 = vsel %vm252_vm0, %v270_v4, -inf  ;;  %v253_v8 = vsel %vm252_vm0, %v251_v5, -inf  ;;  %v261_v9 = vsel %vm3395_vm5, %v231_v3, -inf  ;;  %v276_v13 = vcombine.high %v274_v11, %v274_v11  ;;  %v296_v16 = vld [vmem:[%s3384_s30 + $0x4] sm:$0xf]  ;;  %s2880_s7 = sshll.u32 %s211_s6, 3 }
  0x1d   : > { %272 = vmax.xlane.f32.xlu1 %v271_v7  ;;  %254 = vmax.xlane.f32.xlu0 %v253_v8  ;;  %v262_v10 = vsel %vm252_vm0, %v261_v9, -inf  ;;  %v2909_v60 = vld [vmem:[%s4486_s1 + $0x41] ss:$0 sm:$0xff]  ;;  %v2911_v61 = vld [vmem:[%s4486_s1 + $0x51] ss:$0 sm:$0xff]  ;;  %s3105_s8 = sshll.u32 %s3284_s15, 7 }
  0x1e   : > { %v2913_v62 = vld [vmem:[%s4486_s1 + $0x61] ss:$0 sm:$0xff]  ;;  %v2915_v63 = vld [vmem:[%s4486_s1 + $0x71] ss:$0 sm:$0xff]  ;;  %v2919_v3 = vld [vmem:[%s4486_s1 + $0x2] ss:$0 sm:$0xff] }
  0x1f   : > { %v2917_v2 = vld [vmem:[%s4486_s1 + $0x81] ss:$0 sm:$0xff]  ;;  %v2921_v4 = vld [vmem:[%s4486_s1 + $0x12] ss:$0 sm:$0xff]  ;;  %v2923_v5 = vld [vmem:[%s4486_s1 + $0x22] ss:$0 sm:$0xff] }
  0x20   : > { %v2927_v7 = vld [vmem:[%s4486_s1 + $0x42] ss:$0 sm:$0xff]  ;;  %v2929_v8 = vld [vmem:[%s4486_s1 + $0x52] ss:$0 sm:$0xff]  ;;  %v2955_v21 = vld [vmem:[%s4486_s1 + $0x4] ss:$0 sm:$0xff] }
  0x21   : > { %263 = vmax.xlane.f32.xlu0 %v262_v10  ;;  %v2931_v9 = vld [vmem:[%s4486_s1 + $0x62] ss:$0 sm:$0xff]  ;;  %v2933_v10 = vld [vmem:[%s4486_s1 + $0x72] ss:$0 sm:$0xff]  ;;  %s213_s9 = scalar_lea.vmem [#allocation2], %s2880_s7  ;;  %s2748_s19 = scalar_lea.sflag [#allocation3], %s211_s6 }
  0x22   : > { %s2764_s10 = sshll.u32 %s213_s9, 4  ;;  %s3297_s15 = smov [#allocation2]   ;;  %s2765_s10 = int_to_ptr.vmem [resolvable:$true] %s2764_s10 }
  0x23   : > { %s3216_s21 = scalar_lea.vmem %s2765_s10, 128  ;;  %s3220_s23 = sshll.u32 %s3297_s15, 4  ;;  %s3221_s23 = int_to_ptr.vmem [resolvable:$false] %s3220_s23 }
  0x24   : > { %p3217_p12 = scmp.ne.s32.totalorder %s2765_s10, %s3216_s21  ;;  %s3222_s26 = scalar_lea.vmem %s3221_s23, 256 }
  0x25   : > { %p3223_p1 = scmp.lt.s32.totalorder %s2765_s10, %s3221_s23  ;;  %p3224_p2 = scmp.lt.s32.totalorder %s3222_s26, %s3216_s21 }
  0x26   : > { %p3218_p13 = pnand %p3217_p12, %p3358_p4 }
  0x27   : > { %p3225_p3 = por %p3224_p2, %p3223_p1 }
  0x28   : > { %p3219_p0 = pneg %p3218_p13 }
  0x2a   : > { %p3226_p5 = pnand %p3225_p3, %p3219_p0 }
  0x2e   : > { %277 = vrot.lane.b32.xlu1 %v274_v11, %s3294_s4  ;;  %v2935_v11 = vld [vmem:[%s4486_s1 + $0x82] ss:$0 sm:$0xff] }
  0x32   : > { %321 = vbcast.lane.b32.xlu1 %v2883_v12, 256  ;;  %v2937_v12 = vld [vmem:[%s4486_s1 + $0x3] ss:$0 sm:$0xff] }
  0x36   : > { %343 = vbcast.lane.b32.xlu1 %v2885_v14, 256  ;;  %v2941_v14 = vld [vmem:[%s4486_s1 + $0x23] ss:$0 sm:$0xff] }
  0x37   : > { %279 = vrot.lane.b32.xlu0 %v276_v13, %s3294_s4  ;;  %v2939_v13 = vld [vmem:[%s4486_s1 + $0x13] ss:$0 sm:$0xff] }
  0x3a   : > { %365 = vbcast.lane.b32.xlu1 %v2887_v15, 256  ;;  %v2943_v15 = vld [vmem:[%s4486_s1 + $0x33] ss:$0 sm:$0xff] }
  0x3b   : > { %298 = vrot.lane.b32.xlu0 %v296_v16, %s3295_s11  ;;  %v2945_v16 = vld [vmem:[%s4486_s1 + $0x43] ss:$0 sm:$0xff] }
  0x3e   : > { %387 = vbcast.lane.b32.xlu1 %v2889_v17, 256  ;;  %v2947_v17 = vld [vmem:[%s4486_s1 + $0x53] ss:$0 sm:$0xff] }
  0x42   : > { %409 = vbcast.lane.b32.xlu1 %v2891_v18, 256  ;;  %v2949_v18 = vld [vmem:[%s4486_s1 + $0x63] ss:$0 sm:$0xff] }
  0x46   : > { %431 = vbcast.lane.b32.xlu1 %v2893_v19, 256  ;;  %v2951_v19 = vld [vmem:[%s4486_s1 + $0x73] ss:$0 sm:$0xff] }
  0x4a   : > { %453 = vbcast.lane.b32.xlu1 %v2895_v20, 256  ;;  %v2953_v20 = vld [vmem:[%s4486_s1 + $0x83] ss:$0 sm:$0xff] }
  0x4e   : > { %475 = vbcast.lane.b32.xlu1 %v2897_v22, 256 }
  0x52   : > { %497 = vbcast.lane.b32.xlu1 %v2899_v23, 256  ;;  %v2957_v23 = vld [vmem:[%s4486_s1 + $0x14] ss:$0 sm:$0xff] }
  0x56   : > { %528 = vbcast.lane.b32.xlu1 %v2901_v24, 256 }
  0x5a   : > { %549 = vbcast.lane.b32.xlu1 %v2903_v25, 256  ;;  %v2959_v25 = vld [vmem:[%s4486_s1 + $0x24] ss:$0 sm:$0xff] }
  0xa6   : > { %v3439_v26 = vpop.xlane.xlu1 %272  ;;  %v3441_v27 = vpop.xlane.xlu0 %254 }
  0xaa   : > { %v278_v28 = vpop.permute.xlu1 %277  ;;  %v3443_v29 = vpop.xlane.xlu0 %263 }
  0xae   : > { %v322_v30 = vpop.permute.xlu1 %321  ;;  %v280_v31 = vpop.permute.xlu0 %279 }
  0xaf   : > { %v282_v32 = vsel %vm281_vm6, %v278_v28, %v280_v31  ;;  %v324_v51 = vmul.f32 %v322_v30, %v3441_v27  ;;  %v2961_v30 = vld [vmem:[%s4486_s1 + $0x34] ss:$0 sm:$0xff] }
  0xb0   : > { %v288_v33 = vsel %vm3395_vm5, %v282_v32, -inf  ;;  %v284_v45 = vsel %vm247_vm2, %v282_v32, -inf  ;;  %v292_v48 = vsel %vm265_vm1, %v282_v32, -inf  ;;  %v2963_v32 = vld [vmem:[%s4486_s1 + $0x44] ss:$0 sm:$0xff] }
  0xb1   : > { %v289_v34 = vsel %vm252_vm0, %v288_v33, -inf  ;;  %v285_v47 = vsel %vm252_vm0, %v284_v45, -inf  ;;  %v293_v50 = vsel %vm252_vm0, %v292_v48, -inf  ;;  %v2973_v45 = vld [vmem:[%s4486_s1 + $0x5] ss:$0 sm:$0xff] }
  0xb2   : > { %v3448_v35 = vpop.permute.xlu1 %343  ;;  %290 = vmax.xlane.f32.xlu0 %v289_v34  ;;  %v299_v36 = vpop.permute.xlu0 %298  ;;  %v2965_v34 = vld [vmem:[%s4486_s1 + $0x54] ss:$0 sm:$0xff]  ;;  %v2975_v48 = vld [vmem:[%s4486_s1 + $0x15] ss:$0 sm:$0xff] }
  0xb3   : > { %v301_v37 = vsel %vm247_vm2, %v299_v36, -inf  ;;  %v305_v39 = vsel %vm3395_vm5, %v299_v36, -inf  ;;  %v309_v42 = vsel %vm265_vm1, %v299_v36, -inf }
  0xb4   : > { %v302_v38 = vsel %vm252_vm0, %v301_v37, -inf  ;;  %v306_v41 = vsel %vm252_vm0, %v305_v39, -inf  ;;  %v310_v44 = vsel %vm252_vm0, %v309_v42, -inf  ;;  %v2967_v37 = vld [vmem:[%s4486_s1 + $0x64] ss:$0 sm:$0xff] }
  0xb5   : > { %303 = vmax.xlane.f32.xlu1 %v302_v38  ;;  %v2971_v42 = vld [vmem:[%s4486_s1 + $0x84] ss:$0 sm:$0xff] }
  0xb6   : > { %v366_v40 = vpop.permute.xlu1 %365 }
  0xb7   : > { %v368_v53 = vmul.f32 %v366_v40, %v3439_v26  ;;  %v2969_v40 = vld [vmem:[%s4486_s1 + $0x74] ss:$0 sm:$0xff] }
  0xb9   : > { %307 = vmax.xlane.f32.xlu1 %v306_v41 }
  0xba   : > { %v3458_v43 = vpop.permute.xlu1 %387 }
  0xbd   : > { %311 = vmax.xlane.f32.xlu1 %v310_v44 }
  0xbe   : > { %v3463_v46 = vpop.permute.xlu1 %409 }
  0xc1   : > { %286 = vmax.xlane.f32.xlu1 %v285_v47 }
  0xc2   : > { %v3468_v49 = vpop.permute.xlu1 %431 }
  0xc5   : > { %294 = vmax.xlane.f32.xlu1 %v293_v50 }
  0xc6   : > { %v3472_v52 = vpop.permute.xlu1 %453 }
  0xc8   : > { %327 = vperm.xlu0 %3164, %v324_v51   ;;  %v2977_v51 = vld [vmem:[%s4486_s1 + $0x25] ss:$0 sm:$0xff] }
  0xca   : > { %v3475_v54 = vpop.permute.xlu1 %475 }
  0xcc   : > { %371 = vperm.xlu0 %3164, %v368_v53  }
  0xce   : > { %v3477_v55 = vpop.permute.xlu1 %497 }
  0xd2   : > { %v529_v56 = vpop.permute.xlu1 %528 }
  0xd3   : > { %v531_v57 = vmul.f32 %v529_v56, %v3441_v27  ;;  %v2979_v56 = vld [vmem:[%s4486_s1 + $0x35] ss:$0 sm:$0xff] }
  0xd5   : > { %534 = vperm.xlu0 %3164, %v531_v57  }
  0xd6   : > { %570 = vbcast.lane.b32.xlu1 %v2905_v58, 256  ;;  %v3558_v22 = vpop.permute.xlu1 %549  ;;  %v2981_v58 = vld [vmem:[%s4486_s1 + $0x45] ss:$0 sm:$0xff] }
  0xda   : > { %591 = vbcast.lane.b32.xlu1 %v2907_v59, 256 }
  0xde   : > { %612 = vbcast.lane.b32.xlu1 %v2909_v60, 256 }
  0xe2   : > { %633 = vbcast.lane.b32.xlu1 %v2911_v61, 256  ;;  %v2983_v61 = vld [vmem:[%s4486_s1 + $0x55] ss:$0 sm:$0xff] }
  0xe6   : > { %654 = vbcast.lane.b32.xlu1 %v2913_v62, 256 }
  0xea   : > { %675 = vbcast.lane.b32.xlu1 %v2915_v63, 256  ;;  %v2985_v63 = vld [vmem:[%s4486_s1 + $0x65] ss:$0 sm:$0xff] }
  0xee   : > { %696 = vbcast.lane.b32.xlu1 %v2917_v2, 256 }
  0xf2   : > { %728 = vbcast.lane.b32.xlu1 %v2919_v3, 256 }
  0xf6   : > { %749 = vbcast.lane.b32.xlu1 %v2921_v4, 256  ;;  %v2987_v4 = vld [vmem:[%s4486_s1 + $0x75] ss:$0 sm:$0xff] }
  0xfa   : > { %770 = vbcast.lane.b32.xlu1 %v2923_v5, 256 }
  0xfe   : > { %791 = vbcast.lane.b32.xlu1 %v2925_v6, 256  ;;  %v2989_v6 = vld [vmem:[%s4486_s1 + $0x85] ss:$0 sm:$0xff] }
 0x102   : > { %812 = vbcast.lane.b32.xlu1 %v2927_v7, 256 }
 0x106   : > { %833 = vbcast.lane.b32.xlu1 %v2929_v8, 256  ;;  %v2991_v8 = vld [vmem:[%s4486_s1 + $0x6] ss:$0 sm:$0xff] }
 0x10a   : > { %854 = vbcast.lane.b32.xlu1 %v2931_v9, 256 }
 0x10e   : > { %875 = vbcast.lane.b32.xlu1 %v2933_v10, 256  ;;  %v2993_v10 = vld [vmem:[%s4486_s1 + $0x16] ss:$0 sm:$0xff] }
 0x112   : > { %896 = vbcast.lane.b32.xlu1 %v2935_v11, 256 }
 0x116   : > { %928 = vbcast.lane.b32.xlu1 %v2937_v12, 256  ;;  %v2995_v12 = vld [vmem:[%s4486_s1 + $0x26] ss:$0 sm:$0xff] }
 0x11a   : > { %949 = vbcast.lane.b32.xlu1 %v2939_v13, 256 }
 0x11e   : > { %970 = vbcast.lane.b32.xlu1 %v2941_v14, 256  ;;  %v2997_v14 = vld [vmem:[%s4486_s1 + $0x36] ss:$0 sm:$0xff] }
 0x122   : > { %991 = vbcast.lane.b32.xlu1 %v2943_v15, 256 }
 0x126   : > { %1012 = vbcast.lane.b32.xlu1 %v2945_v16, 256  ;;  %v2999_v16 = vld [vmem:[%s4486_s1 + $0x46] ss:$0 sm:$0xff] }
 0x12a   : > { %1033 = vbcast.lane.b32.xlu1 %v2947_v17, 256 }
 0x12e   : > { %1054 = vbcast.lane.b32.xlu1 %v2949_v18, 256 }
 0x132   : > { %1075 = vbcast.lane.b32.xlu1 %v2951_v19, 256  ;;  %v3001_v19 = vld [vmem:[%s4486_s1 + $0x56] ss:$0 sm:$0xff] }
 0x136   : > { %1096 = vbcast.lane.b32.xlu1 %v2953_v20, 256 }
 0x13a   : > { %1128 = vbcast.lane.b32.xlu1 %v2955_v21, 256  ;;  %v3003_v21 = vld [vmem:[%s4486_s1 + $0x66] ss:$0 sm:$0xff] }
 0x13e   : > { %v3563_v24 = vpop.xlane.xlu1 %303  ;;  %1149 = vbcast.lane.b32.xlu1 %v2957_v23, 256 }
 0x142   : > { %v3568_v28 = vpop.xlane.xlu1 %307  ;;  %1170 = vbcast.lane.b32.xlu1 %v2959_v25, 256 }
 0x146   : > { %v3573_v31 = vpop.xlane.xlu1 %311  ;;  %1191 = vbcast.lane.b32.xlu1 %v2961_v30, 256  ;;  %v3005_v30 = vld [vmem:[%s4486_s1 + $0x76] ss:$0 sm:$0xff] }
 0x14a   : > { %v3578_v33 = vpop.xlane.xlu1 %286  ;;  %1212 = vbcast.lane.b32.xlu1 %v2963_v32, 256 }
 0x14e   : > { %v3583_v36 = vpop.xlane.xlu1 %294  ;;  %1233 = vbcast.lane.b32.xlu1 %v2965_v34, 256  ;;  %v3007_v34 = vld [vmem:[%s4486_s1 + $0x86] ss:$0 sm:$0xff] }
 0x152   : > { %v571_v38 = vpop.permute.xlu1 %570  ;;  %1254 = vbcast.lane.b32.xlu1 %v2967_v37, 256 }
 0x153   : > { %v573_v39 = vmul.f32 %v571_v38, %v3439_v26  ;;  %v3009_v38 = vld [vmem:[%s4486_s1 + $0x7] ss:$0 sm:$0xff] }
 0x155   : > { %576 = vperm.xlu0 %3164, %v573_v39  }
 0x156   : > { %v3592_v41 = vpop.permute.xlu1 %591  ;;  %1275 = vbcast.lane.b32.xlu1 %v2969_v40, 256  ;;  %v3011_v40 = vld [vmem:[%s4486_s1 + $0x17] ss:$0 sm:$0xff] }
 0x15a   : > { %v3597_v44 = vpop.permute.xlu1 %612  ;;  %1296 = vbcast.lane.b32.xlu1 %v2971_v42, 256 }
 0x15e   : > { %v3602_v47 = vpop.permute.xlu1 %633  ;;  %1328 = vbcast.lane.b32.xlu1 %v2973_v45, 256  ;;  %v3013_v45 = vld [vmem:[%s4486_s1 + $0x27] ss:$0 sm:$0xff] }
 0x162   : > { %v3607_v50 = vpop.permute.xlu1 %654  ;;  %1349 = vbcast.lane.b32.xlu1 %v2975_v48, 256 }
 0x166   : > { %v3612_v53 = vpop.permute.xlu1 %675  ;;  %1370 = vbcast.lane.b32.xlu1 %v2977_v51, 256  ;;  %v3027_v51 = vld [vmem:[%s4486_s1 + $0x8] ss:$0 sm:$0xff] }
 0x16a   : > { %v3617_v57 = vpop.permute.xlu1 %696  ;;  %1391 = vbcast.lane.b32.xlu1 %v2979_v56, 256 }
 0x16e   : > { %v729_v59 = vpop.permute.xlu1 %728  ;;  %1412 = vbcast.lane.b32.xlu1 %v2981_v58, 256  ;;  %v3045_v58 = vld [vmem:[%s4486_s1 + $0x9] ss:$0 sm:$0xff] }
 0x16f   : > { %v731_v60 = vmul.f32 %v729_v59, %v3441_v27 }
 0x171   : > { %734 = vperm.xlu0 %3164, %v731_v60  }
 0x172   : > { %v3626_v62 = vpop.permute.xlu1 %749  ;;  %1433 = vbcast.lane.b32.xlu1 %v2983_v61, 256  ;;  %v3031_v61 = vld [vmem:[%s4486_s1 + $0x28] ss:$0 sm:$0xff] }
 0x176   : > { %v771_v2 = vpop.permute.xlu1 %770  ;;  %1454 = vbcast.lane.b32.xlu1 %v2985_v63, 256 }
 0x177   : > { %v773_v3 = vmul.f32 %v771_v2, %v3439_v26  ;;  %v3063_v2 = vld [vmem:[%s4486_s1 + $0xa] ss:$0 sm:$0xff] }
 0x179   : > { %776 = vperm.xlu0 %3164, %v773_v3  }
 0x17a   : > { %v3635_v5 = vpop.permute.xlu1 %791  ;;  %1475 = vbcast.lane.b32.xlu1 %v2987_v4, 256 }
 0x17e   : > { %v3640_v7 = vpop.permute.xlu1 %812  ;;  %1496 = vbcast.lane.b32.xlu1 %v2989_v6, 256  ;;  %v3033_v6 = vld [vmem:[%s4486_s1 + $0x38] ss:$0 sm:$0xff] }
 0x182   : > { %v3645_v9 = vpop.permute.xlu1 %833  ;;  %1528 = vbcast.lane.b32.xlu1 %v2991_v8, 256 }
 0x186   : > { %v3650_v11 = vpop.permute.xlu1 %854  ;;  %1549 = vbcast.lane.b32.xlu1 %v2993_v10, 256  ;;  %v3065_v10 = vld [vmem:[%s4486_s1 + $0x1a] ss:$0 sm:$0xff] }
 0x18a   : > { %v3655_v13 = vpop.permute.xlu1 %875  ;;  %1570 = vbcast.lane.b32.xlu1 %v2995_v12, 256 }
 0x18e   : > { %v3660_v15 = vpop.permute.xlu1 %896  ;;  %1591 = vbcast.lane.b32.xlu1 %v2997_v14, 256  ;;  %v3019_v14 = vld [vmem:[%s4486_s1 + $0x57] ss:$0 sm:$0xff] }
 0x192   : > { %v929_v17 = vpop.permute.xlu1 %928  ;;  %1612 = vbcast.lane.b32.xlu1 %v2999_v16, 256 }
 0x193   : > { %v931_v18 = vmul.f32 %v929_v17, %v3441_v27  ;;  %v3051_v17 = vld [vmem:[%s4486_s1 + $0x39] ss:$0 sm:$0xff] }
 0x195   : > { %934 = vperm.xlu0 %3164, %v931_v18  }
 0x196   : > { %v3669_v20 = vpop.permute.xlu1 %949  ;;  %1633 = vbcast.lane.b32.xlu1 %v3001_v19, 256  ;;  %v3083_v19 = vld [vmem:[%s4486_s1 + $0x1b] ss:$0 sm:$0xff] }
 0x19a   : > { %v971_v23 = vpop.permute.xlu1 %970  ;;  %1654 = vbcast.lane.b32.xlu1 %v3003_v21, 256 }
 0x19b   : > { %v973_v25 = vmul.f32 %v971_v23, %v3439_v26  ;;  %v3037_v23 = vld [vmem:[%s4486_s1 + $0x58] ss:$0 sm:$0xff] }
 0x19d   : > { %976 = vperm.xlu0 %3164, %v973_v25  }
 0x19e   : > { %v3678_v32 = vpop.permute.xlu1 %991  ;;  %1675 = vbcast.lane.b32.xlu1 %v3005_v30, 256  ;;  %v3069_v30 = vld [vmem:[%s4486_s1 + $0x3a] ss:$0 sm:$0xff] }
 0x1a2   : > { %v3683_v37 = vpop.permute.xlu1 %1012  ;;  %1696 = vbcast.lane.b32.xlu1 %v3007_v34, 256 }
 0x1a6   : > { %v3688_v39 = vpop.permute.xlu1 %1033  ;;  %1728 = vbcast.lane.b32.xlu1 %v3009_v38, 256 }
 0x1aa   : > { %v3693_v42 = vpop.permute.xlu1 %1054  ;;  %1749 = vbcast.lane.b32.xlu1 %v3011_v40, 256  ;;  %v3023_v40 = vld [vmem:[%s4486_s1 + $0x77] ss:$0 sm:$0xff] }
 0x1ae   : > { %v3698_v48 = vpop.permute.xlu1 %1075  ;;  %1770 = vbcast.lane.b32.xlu1 %v3013_v45, 256 }
 0x1b2   : > { %v3703_v56 = vpop.permute.xlu1 %1096  ;;  %1928 = vbcast.lane.b32.xlu1 %v3027_v51, 256  ;;  %v346_v51 = vmul.f32 %v3448_v35, %v3443_v29  ;;  %v752_v35 = vmul.f32 %v3626_v62, %v3443_v29 }
 0x1b6   : > { %v1129_v59 = vpop.permute.xlu1 %1128  ;;  %2128 = vbcast.lane.b32.xlu1 %v3045_v58, 256  ;;  %v3055_v58 = vld [vmem:[%s4486_s1 + $0x59] ss:$0 sm:$0xff] }
 0x1b7   : > { %v1131_v60 = vmul.f32 %v1129_v59, %v3441_v27 }
 0x1b9   : > { %1134 = vperm.xlu0 %3164, %v1131_v60   ;;  %v552_v60 = vmul.f32 %v3558_v22, %v3443_v29  ;;  %v952_v22 = vmul.f32 %v3669_v20, %v3443_v29  ;;  %v456_v20 = vmul.f32 %v3472_v52, %v3563_v24  ;;  %v500_v52 = vmul.f32 %v3477_v55, %v3573_v31 }
 0x1ba   : > { %v1150_v63 = vpop.permute.xlu1 %1149  ;;  %1970 = vbcast.lane.b32.xlu1 %v3031_v61, 256  ;;  %v3087_v61 = vld [vmem:[%s4486_s1 + $0x3b] ss:$0 sm:$0xff]  ;;  %v678_v55 = vmul.f32 %v3612_v53, %v3568_v28 }
 0x1bb   : > { %v1152_v62 = vmul.f32 %v1150_v63, %v3443_v29  ;;  %v478_v63 = vmul.f32 %v3475_v54, %v3568_v28  ;;  %v657_v54 = vmul.f32 %v3607_v50, %v3563_v24  ;;  %v857_v50 = vmul.f32 %v3650_v11, %v3563_v24 }
 0x1be   : > { %v1171_v3 = vpop.permute.xlu1 %1170  ;;  %2328 = vbcast.lane.b32.xlu1 %v3063_v2, 256 }
 0x1bf   : > { %v1173_v4 = vmul.f32 %v1171_v3, %v3439_v26  ;;  %v3041_v3 = vld [vmem:[%s4486_s1 + $0x78] ss:$0 sm:$0xff] }
 0x1c1   : > { %1176 = vperm.xlu0 %3164, %v1173_v4  }
 0x1c2   : > { %v3719_v8 = vpop.permute.xlu1 %1191  ;;  %1991 = vbcast.lane.b32.xlu1 %v3033_v6, 256  ;;  %v3073_v6 = vld [vmem:[%s4486_s1 + $0x5a] ss:$0 sm:$0xff] }
 0x1c6   : > { %v3724_v12 = vpop.permute.xlu1 %1212  ;;  %2349 = vbcast.lane.b32.xlu1 %v3065_v10, 256 }
 0x1ca   : > { %v3729_v16 = vpop.permute.xlu1 %1233  ;;  %1833 = vbcast.lane.b32.xlu1 %v3019_v14, 256  ;;  %v3043_v14 = vld [vmem:[%s4486_s1 + $0x88] ss:$0 sm:$0xff] }
 0x1ce   : > { %v3734_v18 = vpop.permute.xlu1 %1254  ;;  %2191 = vbcast.lane.b32.xlu1 %v3051_v17, 256 }
 0x1d2   : > { %v3739_v21 = vpop.permute.xlu1 %1275  ;;  %2549 = vbcast.lane.b32.xlu1 %v3083_v19, 256  ;;  %v3075_v19 = vld [vmem:[%s4486_s1 + $0x6a] ss:$0 sm:$0xff] }
 0x1d6   : > { %v3744_v25 = vpop.permute.xlu1 %1296  ;;  %2033 = vbcast.lane.b32.xlu1 %v3037_v23, 256 }
 0x1da   : > { %v1329_v34 = vpop.permute.xlu1 %1328  ;;  %2391 = vbcast.lane.b32.xlu1 %v3069_v30, 256  ;;  %v3061_v30 = vld [vmem:[%s4486_s1 + $0x89] ss:$0 sm:$0xff] }
 0x1db   : > { %v1331_v38 = vmul.f32 %v1329_v34, %v3441_v27 }
 0x1dd   : > { %1334 = vperm.xlu0 %3164, %v1331_v38   ;;  %v3093_v38 = vld [vmem:[%s4486_s1 + $0x6b] ss:$0 sm:$0xff] }
 0x1de   : > { %v3753_v45 = vpop.permute.xlu1 %1349  ;;  %1875 = vbcast.lane.b32.xlu1 %v3023_v40, 256 }
 0x1e1   : > { %349 = vperm.xlu0 %3164, %v346_v51   ;;  %v3095_v51 = vld [vmem:[%s4486_s1 + $0x7b] ss:$0 sm:$0xff] }
 0x1e2   : > { %v3760_v59 = vpop.permute.xlu1 %1370  ;;  %2233 = vbcast.lane.b32.xlu1 %v3055_v58, 256 }
 0x1e5   : > { %555 = vperm.xlu0 %3164, %v552_v60  }
 0x1e6   : > { %v3767_v2 = vpop.permute.xlu1 %1391  ;;  %2591 = vbcast.lane.b32.xlu1 %v3087_v61, 256  ;;  %v699_v61 = vmul.f32 %v3617_v57, %v3573_v31 }
 0x1e9   : > { %755 = vperm.xlu0 %3164, %v752_v35  }
 0x1ea   : > { %v3774_v4 = vpop.permute.xlu1 %1412  ;;  %2075 = vbcast.lane.b32.xlu1 %v3041_v3, 256 }
 0x1ed   : > { %955 = vperm.xlu0 %3164, %v952_v22   ;;  %v878_v22 = vmul.f32 %v3655_v13, %v3568_v28 }
 0x1ee   : > { %v3781_v10 = vpop.permute.xlu1 %1433  ;;  %2433 = vbcast.lane.b32.xlu1 %v3073_v6, 256  ;;  %v899_v6 = vmul.f32 %v3660_v15, %v3573_v31 }
 0x1f1   : > { %1155 = vperm.xlu0 %3164, %v1152_v62   ;;  %v1057_v62 = vmul.f32 %v3693_v42, %v3563_v24 }
 0x1f2   : > { %v3787_v17 = vpop.permute.xlu1 %1454  ;;  %2096 = vbcast.lane.b32.xlu1 %v3043_v14, 256  ;;  %v1078_v14 = vmul.f32 %v3698_v48, %v3568_v28  ;;  %v3855_v48 = vpop.xlane.xlu0 %290 }
 0x1f5   : > { %459 = vperm.xlu0 %3164, %v456_v20   ;;  %v1099_v20 = vmul.f32 %v3703_v56, %v3573_v31  ;;  %v1299_v56 = vmul.f32 %v3744_v25, %v3573_v31 }
 0x1f6   : > { %v3794_v23 = vpop.permute.xlu1 %1475  ;;  %2454 = vbcast.lane.b32.xlu1 %v3075_v19, 256  ;;  %v1257_v19 = vmul.f32 %v3734_v18, %v3563_v24 }
 0x1f9   : > { %481 = vperm.xlu0 %3164, %v478_v63   ;;  %v1278_v63 = vmul.f32 %v3739_v21, %v3568_v28 }
 0x1fa   : > { %v3801_v34 = vpop.permute.xlu1 %1496  ;;  %2296 = vbcast.lane.b32.xlu1 %v3061_v30, 256 }
 0x1fd   : > { %503 = vperm.xlu0 %3164, %v500_v52   ;;  %v3861_v52 = vpop.permute.xlu0 %327 }
 0x1fe   : > { %v3808_v40 = vpop.permute.xlu1 %1528  ;;  %2654 = vbcast.lane.b32.xlu1 %v3093_v38, 256 }
 0x201   : > { %660 = vperm.xlu0 %3164, %v657_v54   ;;  %v390_v54 = vmul.f32 %v3458_v43, %v3578_v33 }
 0x202   : > { %v3815_v58 = vpop.permute.xlu1 %1549  ;;  %2675 = vbcast.lane.b32.xlu1 %v3095_v51, 256 }
 0x205   : > { %681 = vperm.xlu0 %3164, %v678_v55   ;;  %v412_v55 = vmul.f32 %v3463_v46, %v3855_v48 }
 0x206   : > { %v3819_v60 = vpop.permute.xlu1 %1570 }
 0x209   : > { %702 = vperm.xlu0 %3164, %v699_v61   ;;  %v3869_v61 = vpop.permute.xlu0 %371 }
 0x20a   : > { %v3823_v35 = vpop.permute.xlu1 %1591 }
 0x20d   : > { %860 = vperm.xlu0 %3164, %v857_v50  }
 0x20e   : > { %v3827_v3 = vpop.permute.xlu1 %1612 }
 0x211   : > { %881 = vperm.xlu0 %3164, %v878_v22   ;;  %v434_v22 = vmul.f32 %v3468_v49, %v3583_v36 }
 0x212   : > { %v3831_v53 = vpop.permute.xlu1 %1633 }
 0x215   : > { %902 = vperm.xlu0 %3164, %v899_v6   ;;  %v3874_v6 = vpop.permute.xlu0 %534 }
 0x216   : > { %v3835_v57 = vpop.permute.xlu1 %1654 }
 0x219   : > { %1060 = vperm.xlu0 %3164, %v1057_v62   ;;  %v594_v62 = vmul.f32 %v3592_v41, %v3578_v33  ;;  %v636_v41 = vmul.f32 %v3602_v47, %v3583_v36  ;;  %v815_v47 = vmul.f32 %v3640_v7, %v3855_v48  ;;  %v994_v7 = vmul.f32 %v3678_v32, %v3578_v33 }
 0x21a   : > { %v3839_v11 = vpop.permute.xlu1 %1675  ;;  %v1036_v32 = vmul.f32 %v3688_v39, %v3583_v36  ;;  %v1215_v39 = vmul.f32 %v3724_v12, %v3855_v48  ;;  %v1352_v12 = vmul.f32 %v3753_v45, %v3443_v29  ;;  %v1394_v45 = vmul.f32 %v3767_v2, %v3578_v33 }
 0x21b   : > { %v1436_v2 = vmul.f32 %v3781_v10, %v3583_v36 }
 0x21d   : > { %1081 = vperm.xlu0 %3164, %v1078_v14   ;;  %v3879_v14 = vpop.permute.xlu0 %576 }
 0x21e   : > { %v3843_v13 = vpop.permute.xlu1 %1696 }
 0x221   : > { %1102 = vperm.xlu0 %3164, %v1099_v20  }
 0x222   : > { %v3847_v15 = vpop.permute.xlu1 %1728 }
 0x225   : > { %1260 = vperm.xlu0 %3164, %v1257_v19   ;;  %v615_v19 = vmul.f32 %v3597_v44, %v3855_v48  ;;  %v794_v44 = vmul.f32 %v3635_v5, %v3578_v33  ;;  %v836_v5 = vmul.f32 %v3645_v9, %v3583_v36  ;;  %v1015_v9 = vmul.f32 %v3683_v37, %v3855_v48 }
 0x226   : > { %v3851_v42 = vpop.permute.xlu1 %1749  ;;  %v1194_v37 = vmul.f32 %v3719_v8, %v3578_v33  ;;  %v1236_v8 = vmul.f32 %v3729_v16, %v3583_v36  ;;  %v1373_v16 = vmul.f32 %v3760_v59, %v3439_v26  ;;  %v1415_v59 = vmul.f32 %v3774_v4, %v3855_v48 }
 0x227   : > { %v1457_v4 = vmul.f32 %v3787_v17, %v3563_v24  ;;  %v1531_v17 = vmul.f32 %v3808_v40, %v3441_v27  ;;  %v1615_v40 = vmul.f32 %v3827_v3, %v3855_v48  ;;  %v1699_v3 = vmul.f32 %v3843_v13, %v3573_v31  ;;  %v3029_v13 = vld [vmem:[%s4486_s1 + $0x18] ss:$0 sm:$0xff] }
 0x229   : > { %1281 = vperm.xlu0 %3164, %v1278_v63   ;;  %v3884_v63 = vpop.permute.xlu0 %734 }
 0x22a   : > { %v3857_v30 = vpop.permute.xlu1 %1770 }
 0x22d   : > { %1302 = vperm.xlu0 %3164, %v1299_v56  }
 0x22e   : > { %v1929_v38 = vpop.permute.xlu1 %1928 }
 0x22f   : > { %v1931_v18 = vmul.f32 %v1929_v38, %v3441_v27 }
 0x231   : > { %393 = vperm.xlu0 %3164, %v390_v54   ;;  %1934 = vperm.xlu1 %3165, %v1931_v18   ;;  %v3889_v18 = vpop.permute.xlu0 %776 }
 0x232   : > { %v2129_v21 = vpop.permute.xlu1 %2128 }
 0x233   : > { %v2131_v51 = vmul.f32 %v2129_v21, %v3441_v27 }
 0x235   : > { %2134 = vperm.xlu1 %3165, %v2131_v51   ;;  %415 = vperm.xlu0 %3164, %v412_v55   ;;  %v3894_v51 = vpop.permute.xlu0 %934 }
 0x236   : > { %v1971_v25 = vpop.permute.xlu1 %1970 }
 0x237   : > { %v1973_v50 = vmul.f32 %v1971_v25, %v3439_v26 }
 0x239   : > { %1976 = vperm.xlu1 %3165, %v1973_v50   ;;  %437 = vperm.xlu0 %3164, %v434_v22   ;;  %v3899_v50 = vpop.permute.xlu0 %976 }
 0x23a   : > { %v2329_v43 = vpop.permute.xlu1 %2328 }
 0x23b   : > { %v2331_v46 = vmul.f32 %v2329_v43, %v3441_v27 }
 0x23d   : > { %2334 = vperm.xlu1 %3165, %v2331_v46   ;;  %597 = vperm.xlu0 %3164, %v594_v62   ;;  %v3904_v62 = vpop.permute.xlu0 %1134 }
 0x23e   : > { %v1992_v20 = vpop.permute.xlu1 %1991 }
 0x23f   : > { %v1994_v49 = vmul.f32 %v1992_v20, %v3578_v33 }
 0x241   : > { %1997 = vperm.xlu1 %3165, %v1994_v49   ;;  %618 = vperm.xlu0 %3164, %v615_v19   ;;  %v3909_v19 = vpop.permute.xlu0 %1176 }
 0x242   : > { %v2350_v56 = vpop.permute.xlu1 %2349 }
 0x243   : > { %v2352_v38 = vmul.f32 %v2350_v56, %v3443_v29 }
 0x245   : > { %2355 = vperm.xlu1 %3165, %v2352_v38   ;;  %639 = vperm.xlu0 %3164, %v636_v41  }
 0x246   : > { %v1834_v54 = vpop.permute.xlu1 %1833 }
 0x247   : > { %v1836_v21 = vmul.f32 %v1834_v54, %v3583_v36 }
 0x249   : > { %1839 = vperm.xlu1 %3165, %v1836_v21   ;;  %797 = vperm.xlu0 %3164, %v794_v44  }
 0x24a   : > { %v2192_v55 = vpop.permute.xlu1 %2191 }
 0x24b   : > { %v2194_v25 = vmul.f32 %v2192_v55, %v3578_v33 }
 0x24d   : > { %2197 = vperm.xlu1 %3165, %v2194_v25   ;;  %818 = vperm.xlu0 %3164, %v815_v47  }
 0x24e   : > { %v2550_v22 = vpop.permute.xlu1 %2549 }
 0x24f   : > { %v2552_v43 = vmul.f32 %v2550_v22, %v3443_v29 }
 0x251   : > { %2555 = vperm.xlu1 %3165, %v2552_v43   ;;  %839 = vperm.xlu0 %3164, %v836_v5  }
 0x252   : > { %v2034_v46 = vpop.permute.xlu1 %2033 }
 0x253   : > { %v2036_v20 = vmul.f32 %v2034_v46, %v3583_v36 }
 0x255   : > { %2039 = vperm.xlu1 %3165, %v2036_v20   ;;  %997 = vperm.xlu0 %3164, %v994_v7  }
 0x256   : > { %v2392_v49 = vpop.permute.xlu1 %2391 }
 0x257   : > { %v2394_v56 = vmul.f32 %v2392_v49, %v3578_v33 }
 0x258   : > { %v3914_v41 = vpop.permute.xlu0 %1334 }
 0x259   : > { %2397 = vperm.xlu1 %3165, %v2394_v56   ;;  %1018 = vperm.xlu0 %3164, %v1015_v9  }
 0x25a   : > { %v1876_v38 = vpop.permute.xlu1 %1875 }
 0x25b   : > { %v1878_v54 = vmul.f32 %v1876_v38, %v3568_v28 }
 0x25c   : > { %v3919_v44 = vpop.permute.xlu0 %349 }
 0x25d   : > { %1881 = vperm.xlu1 %3165, %v1878_v54   ;;  %1039 = vperm.xlu0 %3164, %v1036_v32  }
 0x25e   : > { %v2234_v21 = vpop.permute.xlu1 %2233 }
 0x25f   : > { %v2236_v55 = vmul.f32 %v2234_v21, %v3583_v36 }
 0x260   : > { %v3924_v47 = vpop.permute.xlu0 %555 }
 0x261   : > { %2239 = vperm.xlu1 %3165, %v2236_v55   ;;  %1197 = vperm.xlu0 %3164, %v1194_v37  }
 0x262   : > { %v2592_v25 = vpop.permute.xlu1 %2591 }
 0x263   : > { %v2594_v22 = vmul.f32 %v2592_v25, %v3578_v33 }
 0x264   : > { %v3929_v5 = vpop.permute.xlu0 %755 }
 0x265   : > { %2597 = vperm.xlu1 %3165, %v2594_v22   ;;  %1218 = vperm.xlu0 %3164, %v1215_v39  }
 0x266   : > { %v2076_v43 = vpop.permute.xlu1 %2075 }
 0x267   : > { %v2078_v46 = vmul.f32 %v2076_v43, %v3568_v28 }
 0x268   : > { %v3934_v7 = vpop.permute.xlu0 %955 }
 0x269   : > { %2081 = vperm.xlu1 %3165, %v2078_v46   ;;  %1239 = vperm.xlu0 %3164, %v1236_v8  }
 0x26a   : > { %v2434_v20 = vpop.permute.xlu1 %2433 }
 0x26b   : > { %v2436_v49 = vmul.f32 %v2434_v20, %v3583_v36 }
 0x26c   : > { %v3939_v9 = vpop.permute.xlu0 %1155 }
 0x26d   : > { %2439 = vperm.xlu1 %3165, %v2436_v49   ;;  %1355 = vperm.xlu0 %3164, %v1352_v12   ;;  %v1478_v49 = vmul.f32 %v3794_v23, %v3568_v28  ;;  %v1573_v23 = vmul.f32 %v3819_v60, %v3439_v26  ;;  %v1657_v60 = vmul.f32 %v3835_v57, %v3563_v24 }
 0x26e   : > { %v2097_v56 = vpop.permute.xlu1 %2096  ;;  %v1752_v57 = vmul.f32 %v3851_v42, %v3443_v29  ;;  %v3015_v42 = vld [vmem:[%s4486_s1 + $0x37] ss:$0 sm:$0xff] }
 0x26f   : > { %v2099_v38 = vmul.f32 %v2097_v56, %v3573_v31  ;;  %v1499_v56 = vmul.f32 %v3801_v34, %v3573_v31  ;;  %v1594_v34 = vmul.f32 %v3823_v35, %v3578_v33  ;;  %v1678_v35 = vmul.f32 %v3839_v11, %v3568_v28 }
 0x270   : > { %v3944_v32 = vpop.permute.xlu0 %459  ;;  %v1773_v11 = vmul.f32 %v3857_v30, %v3439_v26  ;;  %v3047_v30 = vld [vmem:[%s4486_s1 + $0x19] ss:$0 sm:$0xff] }
 0x271   : > { %2102 = vperm.xlu1 %3165, %v2099_v38   ;;  %1376 = vperm.xlu0 %3164, %v1373_v16  }
 0x272   : > { %v2455_v54 = vpop.permute.xlu1 %2454 }
 0x273   : > { %v2457_v21 = vmul.f32 %v2455_v54, %v3563_v24  ;;  %v1552_v54 = vmul.f32 %v3815_v58, %v3443_v29  ;;  %v1636_v58 = vmul.f32 %v3831_v53, %v3583_v36  ;;  %v1731_v53 = vmul.f32 %v3847_v15, %v3441_v27 }
 0x274   : > { %v3949_v37 = vpop.permute.xlu0 %481 }
 0x275   : > { %2460 = vperm.xlu1 %3165, %v2457_v21   ;;  %1397 = vperm.xlu0 %3164, %v1394_v45  }
 0x276   : > { %v2297_v55 = vpop.permute.xlu1 %2296 }
 0x277   : > { %v2299_v25 = vmul.f32 %v2297_v55, %v3573_v31 }
 0x278   : > { %v3954_v39 = vpop.permute.xlu0 %503 }
 0x279   : > { %4495 = vst [vmem:[#allocation5_spill] sm:$0xff] %v3954_v39  ;;  %2302 = vperm.xlu1 %3165, %v2299_v25   ;;  %1418 = vperm.xlu0 %3164, %v1415_v59  }
 0x27a   : > { %v2655_v22 = vpop.permute.xlu1 %2654 }
 0x27b   : > { %v2657_v43 = vmul.f32 %v2655_v22, %v3563_v24 }
 0x27c   : > { %v3959_v8 = vpop.permute.xlu0 %660 }
 0x27d   : > { %2660 = vperm.xlu1 %3165, %v2657_v43   ;;  %1439 = vperm.xlu0 %3164, %v1436_v2  }
 0x27e   : > { %v2676_v46 = vpop.permute.xlu1 %2675 }
 0x27f   : > { %v2678_v20 = vmul.f32 %v2676_v46, %v3568_v28 }
 0x280   : > { %v3964_v12 = vpop.permute.xlu0 %681 }
 0x281   : > { %4496 = vst [vmem:[#allocation6_spill] sm:$0xff] %v3964_v12  ;;  %2681 = vperm.xlu1 %3165, %v2678_v20   ;;  %1460 = vperm.xlu0 %3164, %v1457_v4  }
 0x284   : > { %v3968_v10 = vpop.permute.xlu0 %702 }
 0x285   : > { %4497 = vst [vmem:[#allocation7_spill] sm:$0xff] %v3968_v10  ;;  %1481 = vperm.xlu0 %3164, %v1478_v49  }
 0x288   : > { %v3972_v16 = vpop.permute.xlu0 %860 }
 0x289   : > { %4498 = vst [vmem:[#allocation8_spill] sm:$0xff] %v3972_v16  ;;  %1502 = vperm.xlu0 %3164, %v1499_v56  }
 0x28c   : > { %v3976_v38 = vpop.permute.xlu0 %881 }
 0x28d   : > { %4499 = vst [vmem:[#allocation9_spill] sm:$0xff] %v3976_v38  ;;  %1534 = vperm.xlu0 %3164, %v1531_v17   ;;  %v3017_v17 = vld [vmem:[%s4486_s1 + $0x47] ss:$0 sm:$0xff] }
 0x290   : > { %v3980_v45 = vpop.permute.xlu0 %902 }
 0x291   : > { %4500 = vst [vmem:[#allocation10_spill] sm:$0xff] %v3980_v45  ;;  %1555 = vperm.xlu0 %3164, %v1552_v54  }
 0x294   : > { %v3984_v21 = vpop.permute.xlu0 %1060 }
 0x295   : > { %4501 = vst [vmem:[#allocation11_spill] sm:$0xff] %v3984_v21  ;;  %1576 = vperm.xlu0 %3164, %v1573_v23   ;;  %v3049_v23 = vld [vmem:[%s4486_s1 + $0x29] ss:$0 sm:$0xff] }
 0x298   : > { %v3988_v55 = vpop.permute.xlu0 %1081 }
 0x299   : > { %4502 = vst [vmem:[#allocation12_spill] sm:$0xff] %v3988_v55  ;;  %1597 = vperm.xlu0 %3164, %v1594_v34  }
 0x29c   : > { %v3992_v59 = vpop.permute.xlu0 %1102 }
 0x29d   : > { %4503 = vst [vmem:[#allocation13_spill] sm:$0xff] %v3992_v59  ;;  %1618 = vperm.xlu0 %3164, %v1615_v40   ;;  %v3081_v40 = vld [vmem:[%s4486_s1 + $0xb] ss:$0 sm:$0xff] }
 0x2a0   : > { %v3996_v25 = vpop.permute.xlu0 %1260 }
 0x2a1   : > { %4504 = vst [vmem:[#allocation14_spill] sm:$0xff] %v3996_v25  ;;  %1639 = vperm.xlu0 %3164, %v1636_v58  }
 0x2a4   : > { %v4000_v22 = vpop.permute.xlu0 %1281 }
 0x2a5   : > { %4505 = vst [vmem:[#allocation15_spill] sm:$0xff] %v4000_v22  ;;  %1660 = vperm.xlu0 %3164, %v1657_v60   ;;  %v3035_v60 = vld [vmem:[%s4486_s1 + $0x48] ss:$0 sm:$0xff] }
 0x2a8   : > { %v4004_v2 = vpop.permute.xlu0 %1302 }
 0x2a9   : > { %4506 = vst [vmem:[#allocation16_spill] sm:$0xff] %v4004_v2  ;;  %1681 = vperm.xlu0 %3164, %v1678_v35  }
 0x2ac   : > { %v4008_v43 = vpop.permute.xlu0 %393 }
 0x2ad   : > { %1702 = vperm.xlu0 %3164, %v1699_v3   ;;  %v3067_v3 = vld [vmem:[%s4486_s1 + $0x2a] ss:$0 sm:$0xff] }
 0x2b0   : > { %v4012_v46 = vpop.permute.xlu0 %415 }
 0x2b1   : > { %1734 = vperm.xlu0 %3164, %v1731_v53  }
 0x2b4   : > { %v4016_v4 = vpop.permute.xlu0 %437 }
 0x2b5   : > { %1755 = vperm.xlu0 %3164, %v1752_v57   ;;  %v3021_v57 = vld [vmem:[%s4486_s1 + $0x67] ss:$0 sm:$0xff] }
 0x2b8   : > { %v4020_v20 = vpop.permute.xlu0 %597 }
 0x2b9   : > { %1776 = vperm.xlu0 %3164, %v1773_v11  }
 0x2bc   : > { %v4025_v15 = vpop.permute.xlu0 %618 }
 0x2bd   : > { %1949 = vbcast.lane.b32.xlu0 %v3029_v13, 256  ;;  %v3053_v13 = vld [vmem:[%s4486_s1 + $0x49] ss:$0 sm:$0xff] }
 0x2c0   : > { %v4030_v49 = vpop.permute.xlu0 %639 }
 0x2c1   : > { %1791 = vbcast.lane.b32.xlu0 %v3015_v42, 256 }
 0x2c4   : > { %v4035_v56 = vpop.permute.xlu0 %797 }
 0x2c5   : > { %2149 = vbcast.lane.b32.xlu0 %v3047_v30, 256  ;;  %v3085_v30 = vld [vmem:[%s4486_s1 + $0x2b] ss:$0 sm:$0xff] }
 0x2c8   : > { %v4040_v54 = vpop.permute.xlu0 %818 }
 0x2c9   : > { %1812 = vbcast.lane.b32.xlu0 %v3017_v17, 256 }
 0x2cc   : > { %v4045_v34 = vpop.permute.xlu0 %839 }
 0x2cd   : > { %2170 = vbcast.lane.b32.xlu0 %v3049_v23, 256  ;;  %v3039_v23 = vld [vmem:[%s4486_s1 + $0x68] ss:$0 sm:$0xff] }
 0x2d0   : > { %v4050_v58 = vpop.permute.xlu0 %997 }
 0x2d1   : > { %2528 = vbcast.lane.b32.xlu0 %v3081_v40, 256 }
 0x2d4   : > { %v4055_v35 = vpop.permute.xlu0 %1018 }
 0x2d5   : > { %2012 = vbcast.lane.b32.xlu0 %v3035_v60, 256  ;;  %v3071_v60 = vld [vmem:[%s4486_s1 + $0x4a] ss:$0 sm:$0xff] }
 0x2d8   : > { %v4060_v53 = vpop.permute.xlu0 %1039 }
 0x2d9   : > { %2370 = vbcast.lane.b32.xlu0 %v3067_v3, 256 }
 0x2dc   : > { %v4065_v11 = vpop.permute.xlu0 %1197 }
 0x2dd   : > { %1854 = vbcast.lane.b32.xlu0 %v3021_v57, 256  ;;  %v3025_v57 = vld [vmem:[%s4486_s1 + $0x87] ss:$0 sm:$0xff] }
 0x2e0   : > { %v4070_v42 = vpop.permute.xlu0 %1218 }
 0x2e1   : > { %2212 = vbcast.lane.b32.xlu0 %v3053_v13, 256 }
 0x2e4   : > { %v4075_v17 = vpop.permute.xlu0 %1239 }
 0x2e5   : > { %2570 = vbcast.lane.b32.xlu0 %v3085_v30, 256  ;;  %v3057_v30 = vld [vmem:[%s4486_s1 + $0x69] ss:$0 sm:$0xff] }
 0x2e8   : > { %v4080_v40 = vpop.permute.xlu0 %1355 }
 0x2e9   : > { %4507 = vst [vmem:[#allocation17_spill] sm:$0xff] %v4080_v40  ;;  %2054 = vbcast.lane.b32.xlu0 %v3039_v23, 256  ;;  %v3089_v23 = vld [vmem:[%s4486_s1 + $0x4b] ss:$0 sm:$0xff] }
 0x2ec   : > { %v4085_v3 = vpop.permute.xlu0 %1376 }
 0x2ed   : > { %4508 = vst [vmem:[#allocation18_spill] sm:$0xff] %v4085_v3  ;;  %2412 = vbcast.lane.b32.xlu0 %v3071_v60, 256  ;;  %v3059_v60 = vld [vmem:[%s4486_s1 + $0x79] ss:$0 sm:$0xff] }
 0x2f0   : > { %v4090_v13 = vpop.permute.xlu0 %1397 }
 0x2f1   : > { %4509 = vst [vmem:[#allocation19_spill] sm:$0xff] %v4090_v13  ;;  %1896 = vbcast.lane.b32.xlu0 %v3025_v57, 256  ;;  %v3091_v57 = vld [vmem:[%s4486_s1 + $0x5b] ss:$0 sm:$0xff] }
 0x2f4   : > { %v4095_v0 = vpop.permute.xlu0 %1418 }
 0x2f5   : > { %4510 = vst [vmem:[#allocation20_spill] sm:$0xff] %v4095_v0  ;;  %2254 = vbcast.lane.b32.xlu0 %v3057_v30, 256  ;;  %v3077_v30 = vld [vmem:[%s4486_s1 + $0x7a] ss:$0 sm:$0xff] }
 0x2f8   : > { %v4100_v2 = vpop.permute.xlu0 %1439 }
 0x2f9   : > { %4511 = vst [vmem:[#allocation21_spill] sm:$0xff] %v4100_v2  ;;  %2612 = vbcast.lane.b32.xlu0 %v3089_v23, 256  ;;  %v3079_v23 = vld [vmem:[%s4486_s1 + $0x8a] ss:$0 sm:$0xff] }
 0x2fc   : > { %v4105_v59 = vpop.permute.xlu0 %1460 }
 0x2fd   : > { %4512 = vst [vmem:[#allocation22_spill] sm:$0xff] %v4105_v59  ;;  %2275 = vbcast.lane.b32.xlu0 %v3059_v60, 256  ;;  %v3097_v60 = vld [vmem:[%s4486_s1 + $0x8b] ss:$0 sm:$0xff] }
 0x300   : > { %v4110_v22 = vpop.permute.xlu0 %1481 }
 0x301   : > { %4513 = vst [vmem:[#allocation23_spill] sm:$0xff] %v4110_v22  ;;  %2633 = vbcast.lane.b32.xlu0 %v3091_v57, 256  ;;  %v4515_v22 = vlaneseq }
 0x303   : > { %v4124_v57 = vshrl.u32 %v4515_v22, 7 }
 0x304   : > { %v4115_v45 = vpop.permute.xlu0 %1502 }
 0x305   : > { %4514 = vst [vmem:[#allocation24_spill] sm:$0xff] %v4115_v45  ;;  %2475 = vbcast.lane.b32.xlu0 %v3077_v30, 256  ;;  %4516 = vst [vmem:[#allocation25_spill] sm:$0xff] %v4124_v57  ;;  %v4128_v45 = vsub.s32 %v3376_v1, %v4124_v57 }
 0x308   : > { %v1535_v59 = vpop.permute.xlu0 %1534 }
 0x309   : > { %2496 = vbcast.lane.b32.xlu0 %v3079_v23, 256  ;;  %v1539_v30 = vrot.slane %v1535_v59, %v4128_v45  ;;  %v1520_v23 = vld [vmem:[%s4487_s2 + $0x6] sm:$0x1] }
 0x30b   : > { %v1541_v25 = vadd.f32 %v1539_v30, %v1520_v23 }
 0x30c   : > { %v1556_v2 = vpop.permute.xlu0 %1555 }
 0x30d   : > { %2696 = vbcast.lane.b32.xlu0 %v3097_v60, 256  ;;  %v1560_v0 = vrot.slane %v1556_v2, %v4128_v45 }
 0x30f   : > { %v1562_v13 = vadd.f32 %v1560_v0, %v1541_v25 }
 0x310   : > { %v1577_v55 = vpop.permute.xlu0 %1576 }
 0x311   : > { %v1581_v38 = vrot.slane %v1577_v55, %v4128_v45 }
 0x313   : > { %v1583_v21 = vadd.f32 %v1581_v38, %v1562_v13 }
 0x314   : > { %v1598_v10 = vpop.permute.xlu0 %1597 }
 0x315   : > { %v1602_v60 = vrot.slane %v1598_v10, %v4128_v45 }
 0x317   : > { %v1604_v12 = vadd.f32 %v1602_v60, %v1583_v21 }
 0x318   : > { %v1619_v22 = vpop.permute.xlu0 %1618 }
 0x319   : > { %v1623_v1 = vrot.slane %v1619_v22, %v4128_v45 }
 0x31b   : > { %v1625_v39 = vadd.f32 %v1623_v1, %v1604_v12  ;;  %v1720_v12 = vld [vmem:[%s4487_s2 + $0x7] sm:$0x1] }
 0x31c   : > { %v1640_v57 = vpop.permute.xlu0 %1639 }
 0x31d   : > { %v1644_v59 = vrot.slane %v1640_v57, %v4128_v45 }
 0x31f   : > { %v1646_v16 = vadd.f32 %v1644_v59, %v1625_v39 }
 0x320   : > { %v1661_v3 = vpop.permute.xlu0 %1660 }
 0x321   : > { %v1665_v40 = vrot.slane %v1661_v3, %v4128_v45 }
 0x323   : > { %v1667_v2 = vadd.f32 %v1665_v40, %v1646_v16 }
 0x324   : > { %v1682_v30 = vpop.permute.xlu0 %1681 }
 0x325   : > { %v1686_v55 = vrot.slane %v1682_v30, %v4128_v45 }
 0x327   : > { %v1688_v23 = vadd.f32 %v1686_v55, %v1667_v2 }
 0x328   : > { %v1703_v0 = vpop.permute.xlu0 %1702 }
 0x329   : > { %v1707_v10 = vrot.slane %v1703_v0, %v4128_v45 }
 0x32b   : > { %v4142_v38 = vadd.f32 %v1707_v10, %v1688_v23 }
 0x32c   : > { %v1735_v25 = vpop.permute.xlu0 %1734 }
 0x32d   : > { %v1739_v21 = vrot.slane %v1735_v25, %v4128_v45  ;;  %vm1710_vm13 = vcmp.ge.f32.partialorder %v4142_v38, 0.0 }
 0x32f   : > { %v1741_v13 = vadd.f32 %v1739_v21, %v1720_v12 }
 0x330   : > { %v1756_v39 = vpop.permute.xlu0 %1755 }
 0x331   : > { %v1760_v16 = vrot.slane %v1756_v39, %v4128_v45 }
 0x333   : > { %v1762_v40 = vadd.f32 %v1760_v16, %v1741_v13 }
 0x334   : > { %v1777_v3 = vpop.permute.xlu0 %1776 }
 0x335   : > { %v1781_v57 = vrot.slane %v1777_v3, %v4128_v45 }
 0x337   : > { %v4150_v22 = vadd.f32 %v1781_v57, %v1762_v40 }
 0x338   : > { %v1950_v60 = vpop.permute.xlu0 %1949 }
 0x339   : > { %v1952_v1 = vmul.f32 %v1950_v60, %v3443_v29 }
 0x33b   : > { %1955 = vperm.xlu0 %3164, %v1952_v1  }
 0x33c   : > { %v1792_v59 = vpop.permute.xlu0 %1791 }
 0x33d   : > { %v1794_v2 = vmul.f32 %v1792_v59, %v3578_v33 }
 0x33f   : > { %1797 = vperm.xlu0 %3164, %v1794_v2  }
 0x340   : > { %v2150_v30 = vpop.permute.xlu0 %2149 }
 0x341   : > { %v2152_v55 = vmul.f32 %v2150_v30, %v3443_v29 }
 0x343   : > { %2155 = vperm.xlu0 %3164, %v2152_v55  }
 0x344   : > { %v1813_v23 = vpop.permute.xlu0 %1812 }
 0x345   : > { %v1815_v0 = vmul.f32 %v1813_v23, %v3855_v48 }
 0x347   : > { %1818 = vperm.xlu0 %3164, %v1815_v0  }
 0x348   : > { %v2171_v10 = vpop.permute.xlu0 %2170 }
 0x349   : > { %v2173_v25 = vmul.f32 %v2171_v10, %v3439_v26 }
 0x34b   : > { %2176 = vperm.xlu0 %3164, %v2173_v25  }
 0x34c   : > { %v2529_v21 = vpop.permute.xlu0 %2528 }
 0x34d   : > { %v2531_v12 = vmul.f32 %v2529_v21, %v3441_v27 }
 0x34f   : > { %2534 = vperm.xlu0 %3164, %v2531_v12  }
 0x350   : > { %v2013_v39 = vpop.permute.xlu0 %2012 }
 0x351   : > { %v2015_v33 = vmul.f32 %v2013_v39, %v3855_v48 }
 0x353   : > { %2018 = vperm.xlu0 %3164, %v2015_v33  }
 0x354   : > { %v2371_v13 = vpop.permute.xlu0 %2370 }
 0x355   : > { %v2373_v29 = vmul.f32 %v2371_v13, %v3439_v26 }
 0x357   : > { %2376 = vperm.xlu0 %3164, %v2373_v29  }
 0x358   : > { %v1855_v16 = vpop.permute.xlu0 %1854 }
 0x359   : > { %v1857_v40 = vmul.f32 %v1855_v16, %v3563_v24 }
 0x35b   : > { %1860 = vperm.xlu0 %3164, %v1857_v40  }
 0x35c   : > { %v2213_v3 = vpop.permute.xlu0 %2212 }
 0x35d   : > { %v2215_v57 = vmul.f32 %v2213_v3, %v3855_v48  ;;  %v4173_v3 = vpop.permute.xlu1 %1934 }
 0x35f   : > { %2218 = vperm.xlu0 %3164, %v2215_v57  }
 0x360   : > { %v2571_v60 = vpop.permute.xlu0 %2570 }
 0x361   : > { %v2573_v27 = vmul.f32 %v2571_v60, %v3439_v26  ;;  %v4175_v57 = vpop.permute.xlu1 %2134 }
 0x363   : > { %2576 = vperm.xlu0 %3164, %v2573_v27  }
 0x364   : > { %v2055_v1 = vpop.permute.xlu0 %2054 }
 0x365   : > { %v2057_v59 = vmul.f32 %v2055_v1, %v3563_v24  ;;  %v4177_v60 = vpop.permute.xlu1 %1976 }
 0x367   : > { %2060 = vperm.xlu0 %3164, %v2057_v59   ;;  %v332_v59 = vrot.slane %v3861_v52, %v4128_v45  ;;  %v739_v52 = vrot.slane %v3884_v63, %v4128_v45 }
 0x368   : > { %v2413_v2 = vpop.permute.xlu0 %2412 }
 0x369   : > { %v2415_v30 = vmul.f32 %v2413_v2, %v3855_v48  ;;  %v354_v2 = vrot.slane %v3919_v44, %v4128_v45  ;;  %v720_v44 = vld [vmem:[%s4487_s2 + $0x2] sm:$0x1] }
 0x36b   : > { %2418 = vperm.xlu0 %3164, %v2415_v30  }
 0x36c   : > { %v1897_v55 = vpop.permute.xlu0 %1896 }
 0x36d   : > { %v1899_v23 = vmul.f32 %v1897_v55, %v3573_v31 }
 0x36f   : > { %1902 = vperm.xlu0 %3164, %v1899_v23  }
 0x370   : > { %v2255_v0 = vpop.permute.xlu0 %2254 }
 0x371   : > { %v2257_v10 = vmul.f32 %v2255_v0, %v3563_v24  ;;  %v539_v0 = vrot.slane %v3874_v6, %v4128_v45  ;;  %v760_v6 = vrot.slane %v3929_v5, %v4128_v45 }
 0x373   : > { %2260 = vperm.xlu0 %3164, %v2257_v10   ;;  %v520_v10 = vld [vmem:[%s4487_s2 + $0x1] sm:$0x1] }
 0x374   : > { %v2613_v25 = vpop.permute.xlu0 %2612 }
 0x375   : > { %v2615_v26 = vmul.f32 %v2613_v25, %v3855_v48 }
 0x377   : > { %2618 = vperm.xlu0 %3164, %v2615_v26   ;;  %v560_v26 = vrot.slane %v3924_v47, %v4128_v45  ;;  %v920_v47 = vld [vmem:[%s4487_s2 + $0x3] sm:$0x1] }
 0x378   : > { %v2276_v21 = vpop.permute.xlu0 %2275 }
 0x379   : > { %v2278_v12 = vmul.f32 %v2276_v21, %v3568_v28  ;;  %v376_v21 = vrot.slane %v3869_v61, %v4128_v45  ;;  %v1139_v61 = vrot.slane %v3904_v62, %v4128_v45  ;;  %v442_v62 = vrot.slane %v4016_v4, %v4128_v45 }
 0x37b   : > { %2281 = vperm.xlu0 %3164, %v2278_v12   ;;  %v398_v12 = vrot.slane %v4008_v43, %v4128_v45  ;;  %v420_v43 = vrot.slane %v4012_v46, %v4128_v45  ;;  %v581_v46 = vrot.slane %v3879_v14, %v4128_v45 }
 0x37c   : > { %v2634_v39 = vpop.permute.xlu0 %2633 }
 0x37d   : > { %v2636_v33 = vmul.f32 %v2634_v39, %v3583_v36  ;;  %v4179_v36 = vpop.permute.xlu1 %2334 }
 0x37f   : > { %2639 = vperm.xlu0 %3164, %v2636_v33   ;;  %v541_v33 = vadd.f32 %v539_v0, %v520_v10 }
 0x380   : > { %v2476_v13 = vpop.permute.xlu0 %2475 }
 0x381   : > { %v2478_v29 = vmul.f32 %v2476_v13, %v3568_v28  ;;  %v4181_v27 = vpop.permute.xlu1 %1997  ;;  %v939_v13 = vrot.slane %v3894_v51, %v4128_v45  ;;  %v960_v51 = vrot.slane %v3934_v7, %v4128_v45  ;;  %v781_v7 = vrot.slane %v3889_v18, %v4128_v45 }
 0x382   : > { %v981_v18 = vrot.slane %v3899_v50, %v4128_v45  ;;  %v1023_v50 = vrot.slane %v4055_v35, %v4128_v45  ;;  %v1044_v35 = vrot.slane %v4060_v53, %v4128_v45  ;;  %v4518_v53 = vld [vmem:[#allocation8_spill] sm:$0xff] }
 0x383   : > { %2481 = vperm.xlu0 %3164, %v2478_v29   ;;  %v741_v29 = vadd.f32 %v739_v52, %v720_v44  ;;  %v623_v44 = vrot.slane %v4025_v15, %v4128_v45  ;;  %v1181_v15 = vrot.slane %v3909_v19, %v4128_v45 }
 0x384   : > { %v2497_v16 = vpop.permute.xlu0 %2496 }
 0x385   : > { %v2499_v24 = vmul.f32 %v2497_v16, %v3573_v31  ;;  %v4183_v28 = vpop.permute.xlu1 %2355  ;;  %v1120_v16 = vld [vmem:[%s4487_s2 + $0x4] sm:$0x1] }
 0x386   : > { %v1141_v0 = vadd.f32 %v1139_v61, %v1120_v16 }
 0x387   : > { %2502 = vperm.xlu0 %3164, %v2499_v24   ;;  %v562_v24 = vadd.f32 %v560_v26, %v541_v33  ;;  %v1002_v33 = vrot.slane %v4050_v58, %v4128_v45  ;;  %v1339_v58 = vrot.slane %v3914_v41, %v4128_v45  ;;  %v486_v41 = vrot.slane %v3949_v37, %v4128_v45 }
 0x388   : > { %v2697_v40 = vpop.permute.xlu0 %2696 }
 0x389   : > { %v2699_v48 = vmul.f32 %v2697_v40, %v3573_v31  ;;  %v4185_v1 = vpop.permute.xlu1 %1839  ;;  %v313_v31 = vld [vmem:[%s4487_s2] sm:$0x1]  ;;  %v762_v40 = vadd.f32 %v760_v6, %v741_v29 }
 0x38a   : > { %v334_v55 = vadd.f32 %v332_v59, %v313_v31 }
 0x38b   : > { %2702 = vperm.xlu0 %3164, %v2699_v48   ;;  %v1160_v48 = vrot.slane %v3939_v9, %v4128_v45  ;;  %v802_v9 = vrot.slane %v4035_v56, %v4128_v45  ;;  %v644_v56 = vrot.slane %v4030_v49, %v4128_v45  ;;  %v1202_v49 = vrot.slane %v4065_v11, %v4128_v45 }
 0x38c   : > { %v356_v25 = vadd.f32 %v354_v2, %v334_v55  ;;  %v941_v2 = vadd.f32 %v939_v13, %v920_v47  ;;  %v602_v55 = vrot.slane %v4020_v20, %v4128_v45  ;;  %v823_v20 = vrot.slane %v4040_v54, %v4128_v45 }
 0x38d   : > { %v4194_v30 = vpop.permute.xlu1 %2197  ;;  %v1162_v14 = vadd.f32 %v1160_v48, %v1141_v0  ;;  %v464_v13 = vrot.slane %v3944_v32, %v4128_v45  ;;  %v844_v54 = vrot.slane %v4045_v34, %v4128_v45  ;;  %v1320_v34 = vld [vmem:[%s4487_s2 + $0x5] sm:$0x1]  ;;  %v1223_v11 = vrot.slane %v4070_v42, %v4128_v45 }
 0x38e   : > { %v378_v5 = vadd.f32 %v376_v21, %v356_v25  ;;  %v962_v4 = vadd.f32 %v960_v51, %v941_v2  ;;  %v583_v25 = vadd.f32 %v581_v46, %v562_v24  ;;  %v783_v21 = vadd.f32 %v781_v7, %v762_v40  ;;  %v4517_v2 = vld [vmem:[#allocation17_spill] sm:$0xff] }
 0x38f   : > { %v1183_v32 = vadd.f32 %v1181_v15, %v1162_v14  ;;  %v665_v40 = vrot.slane %v3959_v8, %v4128_v45  ;;  %v1244_v46 = vrot.slane %v4075_v17, %v4128_v45  ;;  %v1341_v7 = vadd.f32 %v1339_v58, %v1320_v34  ;;  %v4519_v8 = vld [vmem:[#allocation18_spill] sm:$0xff]  ;;  %v4523_v15 = vld [vmem:[#allocation19_spill] sm:$0xff] }
 0x390   : > { %v400_v59 = vadd.f32 %v398_v12, %v378_v5  ;;  %v604_v12 = vadd.f32 %v602_v55, %v583_v25  ;;  %v804_v29 = vadd.f32 %v802_v9, %v783_v21  ;;  %v983_v61 = vadd.f32 %v981_v18, %v962_v4  ;;  %v4521_v17 = vld [vmem:[#allocation6_spill] sm:$0xff]  ;;  %v4522_v21 = vld [vmem:[#allocation11_spill] sm:$0xff] }
 0x391   : > { %v4216_v39 = vpop.permute.xlu1 %2555  ;;  %v1360_v55 = vrot.slane %v4517_v2, %v4128_v45  ;;  %v865_v0 = vrot.slane %v4518_v53, %v4128_v45  ;;  %v1381_v25 = vrot.slane %v4519_v8, %v4128_v45  ;;  %v4532_v8 = vld [vmem:[#allocation22_spill] sm:$0xff] }
 0x392   : > { %v422_v10 = vadd.f32 %v420_v43, %v400_v59  ;;  %v625_v47 = vadd.f32 %v623_v44, %v604_v12  ;;  %v825_v19 = vadd.f32 %v823_v20, %v804_v29  ;;  %v1004_v51 = vadd.f32 %v1002_v33, %v983_v61  ;;  %v4520_v44 = vld [vmem:[#allocation5_spill] sm:$0xff] }
 0x393   : > { %v508_v14 = vrot.slane %v4520_v44, %v4128_v45  ;;  %v1065_v20 = vrot.slane %v4522_v21, %v4128_v45  ;;  %v1362_v33 = vadd.f32 %v1360_v55, %v1341_v7  ;;  %v4524_v29 = vld [vmem:[#allocation9_spill] sm:$0xff]  ;;  %v4531_v55 = vld [vmem:[#allocation15_spill] sm:$0xff] }
 0x394   : > { %v444_v26 = vadd.f32 %v442_v62, %v422_v10  ;;  %v646_v24 = vadd.f32 %v644_v56, %v625_v47  ;;  %v846_v48 = vadd.f32 %v844_v54, %v825_v19  ;;  %v1025_v59 = vadd.f32 %v1023_v50, %v1004_v51  ;;  %v4525_v47 = vld [vmem:[#allocation14_spill] sm:$0xff]  ;;  %v4533_v44 = vld [vmem:[#allocation13_spill] sm:$0xff] }
 0x395   : > { %v4248_v52 = vpop.permute.xlu1 %2039  ;;  %v1204_v62 = vadd.f32 %v1202_v49, %v1183_v32  ;;  %v886_v54 = vrot.slane %v4524_v29, %v4128_v45  ;;  %v1265_v61 = vrot.slane %v4525_v47, %v4128_v45  ;;  %v1383_v19 = vadd.f32 %v1381_v25, %v1362_v33  ;;  %v4526_v32 = vld [vmem:[#allocation20_spill] sm:$0xff] }
 0x396   : > { %v466_v5 = vadd.f32 %v464_v13, %v444_v26  ;;  %v667_v37 = vadd.f32 %v665_v40, %v646_v24  ;;  %v1046_v9 = vadd.f32 %v1044_v35, %v1025_v59  ;;  %v686_v26 = vrot.slane %v4521_v17, %v4128_v45  ;;  %v4527_v24 = vld [vmem:[#allocation7_spill] sm:$0xff]  ;;  %v4528_v35 = vld [vmem:[#allocation12_spill] sm:$0xff]  ;;  %v4529_v59 = vld [vmem:[#allocation21_spill] sm:$0xff] }
 0x397   : > { %v1225_v4 = vadd.f32 %v1223_v11, %v1204_v62  ;;  %v867_v12 = vadd.f32 %v865_v0, %v846_v48  ;;  %v1402_v13 = vrot.slane %v4523_v15, %v4128_v45  ;;  %v1423_v34 = vrot.slane %v4526_v32, %v4128_v45  ;;  %v1920_v32 = vld [vmem:[%s4487_s2 + $0x8] sm:$0x1] }
 0x398   : > { %v488_v42 = vadd.f32 %v486_v41, %v466_v5  ;;  %v688_v58 = vadd.f32 %v686_v26, %v667_v37  ;;  %v1067_v5 = vadd.f32 %v1065_v20, %v1046_v9  ;;  %v707_v51 = vrot.slane %v4527_v24, %v4128_v45  ;;  %v4534_v20 = vld [vmem:[#allocation23_spill] sm:$0xff] }
 0x399   : > { %v4274_v43 = vpop.permute.xlu1 %2397  ;;  %v1246_v56 = vadd.f32 %v1244_v46, %v1225_v4  ;;  %v1086_v11 = vrot.slane %v4528_v35, %v4128_v45  ;;  %v888_v41 = vadd.f32 %v886_v54, %v867_v12  ;;  %v1404_v48 = vadd.f32 %v1402_v13, %v1383_v19  ;;  %v4530_v46 = vld [vmem:[#allocation10_spill] sm:$0xff] }
 0x39a   : > { %v510_v50 = vadd.f32 %v508_v14, %v488_v42  ;;  %v1444_v62 = vrot.slane %v4529_v59, %v4128_v45  ;;  %v907_v2 = vrot.slane %v4530_v46, %v4128_v45  ;;  %v1286_v7 = vrot.slane %v4531_v55, %v4128_v45 }
 0x39b   : > { %v1267_v40 = vadd.f32 %v1265_v61, %v1246_v56  ;;  %v709_v37 = vadd.f32 %v707_v51, %v688_v58  ;;  %v1088_v9 = vadd.f32 %v1086_v11, %v1067_v5  ;;  %v1425_v4 = vadd.f32 %v1423_v34, %v1404_v48  ;;  %v4535_v56 = vld [vmem:[#allocation16_spill] sm:$0xff] }
 0x39c   : > { %vm511_vm7 = vcmp.ge.f32.partialorder %v510_v50, 0.0  ;;  %v512_v53 = vmul.f32 0.01, %v510_v50  ;;  %v1465_v25 = vrot.slane %v4532_v8, %v4128_v45  ;;  %v1107_v14 = vrot.slane %v4533_v44, %v4128_v45  ;;  %v4536_v61 = vld [vmem:[#allocation24_spill] sm:$0xff] }
 0x39d   : > { %v4305_v18 = vpop.permute.xlu1 %1881  ;;  %v909_v17 = vadd.f32 %v907_v2, %v888_v41  ;;  %v1288_v26 = vadd.f32 %v1286_v7, %v1267_v40  ;;  %v1446_v21 = vadd.f32 %v1444_v62, %v1425_v4  ;;  %v1486_v12 = vrot.slane %v4534_v20, %v4128_v45 }
 0x39e   : > { %v1307_v33 = vrot.slane %v4535_v56, %v4128_v45  ;;  %v513_v15 = vsel %vm511_vm7, %v510_v50, %v512_v53  ;;  %v711_v29 = vmul.f32 0.01, %v709_v37  ;;  %v1109_v54 = vadd.f32 %v1107_v14, %v1088_v9 }
 0x39f   : > { %v1467_v47 = vadd.f32 %v1465_v25, %v1446_v21  ;;  %v1507_v58 = vrot.slane %v4536_v61, %v4128_v45  ;;  %v1939_v5 = vrot.slane %v4173_v3, %v4128_v45  ;;  %vm710_vm8 = vcmp.ge.f32.partialorder %v709_v37, 0.0 }
 0x3a0   : > { %v911_v34 = vmul.f32 0.01, %v909_v17  ;;  %v1309_v50 = vadd.f32 %v1307_v33, %v1288_v26  ;;  %v2900_v51 = vmul.f32 -1.442695, %v513_v15  ;;  %vm910_vm9 = vcmp.ge.f32.partialorder %v909_v17, 0.0 }
 0x3a1   : > { %v4327_v0 = vpop.permute.xlu1 %2239  ;;  %v1488_v24 = vadd.f32 %v1486_v12, %v1467_v47  ;;  %v712_v41 = vsel %vm710_vm8, %v709_v37, %v711_v29  ;;  %v1111_v40 = vmul.f32 0.01, %v1109_v54  ;;  %v1941_v59 = vadd.f32 %v1939_v5, %v1920_v32  ;;  %v2120_v12 = vld [vmem:[%s4487_s2 + $0x9] sm:$0x1] }
 0x3a2   : > { %vm1110_vm10 = vcmp.ge.f32.partialorder %v1109_v54, 0.0  ;;  %v912_v62 = vsel %vm910_vm9, %v909_v17, %v911_v34  ;;  %v1311_v46 = vmul.f32 0.01, %v1309_v50  ;;  %3168 = vpow2.f32 %v2900_v51 }
 0x3a3   : > { %v1509_v3 = vadd.f32 %v1507_v58, %v1488_v24  ;;  %v2918_v55 = vmul.f32 -1.442695, %v712_v41  ;;  %vm1310_vm11 = vcmp.ge.f32.partialorder %v1309_v50, 0.0  ;;  %v1112_v37 = vsel %vm1110_vm10, %v1109_v54, %v1111_v40  ;;  %v2320_v41 = vld [vmem:[%s4487_s2 + $0xa] sm:$0x1] }
 0x3a4   : > { %v2936_v8 = vmul.f32 -1.442695, %v912_v62  ;;  %v1312_v25 = vsel %vm1310_vm11, %v1309_v50, %v1311_v46  ;;  %v2954_v14 = vmul.f32 -1.442695, %v1112_v37  ;;  %v2139_v21 = vrot.slane %v4175_v57, %v4128_v45 }
 0x3a5   : > { %v4345_v19 = vpop.permute.xlu1 %2597  ;;  %v1511_v9 = vmul.f32 0.01, %v1509_v3  ;;  %vm1510_vm12 = vcmp.ge.f32.partialorder %v1509_v3, 0.0  ;;  %3170 = vpow2.f32 %v2918_v55  ;;  %v2002_v56 = vrot.slane %v4181_v27, %v4128_v45 }
 0x3a6   : > { %3172 = vpow2.f32 %v2936_v8  ;;  %v2972_v33 = vmul.f32 -1.442695, %v1312_v25  ;;  %v2141_v58 = vadd.f32 %v2139_v21, %v2120_v12  ;;  %v2044_v50 = vrot.slane %v4248_v52, %v4128_v45 }
 0x3a7   : > { %v1512_v20 = vsel %vm1510_vm12, %v1509_v3, %v1511_v9  ;;  %3174 = vpow2.f32 %v2954_v14  ;;  %v2202_v52 = vrot.slane %v4194_v30, %v4128_v45 }
 0x3a8   : > { %v2990_v54 = vmul.f32 -1.442695, %v1512_v20  ;;  %3176 = vpow2.f32 %v2972_v33 }
 0x3a9   : > { %v4358_v7 = vpop.permute.xlu1 %2081 }
 0x3aa   : > { %3178 = vpow2.f32 %v2990_v54 }
 0x3ad   : > { %v4378_v15 = vpop.permute.xlu1 %2439 }
 0x3b1   : > { %v2103_v24 = vpop.permute.xlu1 %2102 }
 0x3b5   : > { %v4415_v8 = vpop.permute.xlu1 %2460 }
 0x3b6   : > { %v4196_v23 = vpop.permute.xlu0 %1955 }
 0x3b7   : > { %v1960_v35 = vrot.slane %v4196_v23, %v4128_v45 }
 0x3b9   : > { %v1962_v23 = vadd.f32 %v1960_v35, %v1941_v59 }
 0x3ba   : > { %v4218_v63 = vpop.permute.xlu0 %1797 }
 0x3bb   : > { %v1802_v48 = vrot.slane %v4218_v63, %v4128_v45  ;;  %v1981_v63 = vrot.slane %v4177_v60, %v4128_v45 }
 0x3bd   : > { %v1804_v4 = vadd.f32 %v1802_v48, %v4150_v22  ;;  %v1983_v17 = vadd.f32 %v1981_v63, %v1962_v23  ;;  %v1844_v22 = vrot.slane %v4185_v1, %v4128_v45  ;;  %v2520_v23 = vld [vmem:[%s4487_s2 + $0xb] sm:$0x1] }
 0x3be   : > { %v4238_v31 = vpop.permute.xlu0 %2155 }
 0x3bf   : > { %v2160_v29 = vrot.slane %v4238_v31, %v4128_v45  ;;  %v2004_v47 = vadd.f32 %v2002_v56, %v1983_v17  ;;  %v2339_v31 = vrot.slane %v4179_v36, %v4128_v45  ;;  %v2360_v36 = vrot.slane %v4183_v28, %v4128_v45 }
 0x3c1   : > { %v2341_v55 = vadd.f32 %v2339_v31, %v2320_v41 }
 0x3c2   : > { %v4254_v6 = vpop.permute.xlu0 %1818 }
 0x3c3   : > { %v1823_v2 = vrot.slane %v4254_v6, %v4128_v45  ;;  %v1711_v6 = vmul.f32 0.01, %v4142_v38 }
 0x3c5   : > { %v1825_v44 = vadd.f32 %v1823_v2, %v1804_v4  ;;  %v1712_v1 = vsel %vm1710_vm13, %v4142_v38, %v1711_v6  ;;  %v1886_v38 = vrot.slane %v4305_v18, %v4128_v45  ;;  %v2560_v6 = vrot.slane %v4216_v39, %v4128_v45 }
 0x3c6   : > { %v4276_v16 = vpop.permute.xlu0 %2176  ;;  %v3008_v32 = vmul.f32 -1.442695, %v1712_v1  ;;  %v2107_v39 = vrot.slane %v2103_v24, %v4128_v45  ;;  %v2402_v1 = vrot.slane %v4274_v43, %v4128_v45  ;;  %v2602_v43 = vrot.slane %v4345_v19, %v4128_v45 }
 0x3c7   : > { %v2181_v27 = vrot.slane %v4276_v16, %v4128_v45  ;;  %v3169_v16 = vpop.eup %3168 }
 0x3c8   : > { %3180 = vpow2.f32 %v3008_v32  ;;  %v517_v2 = vadd.f32 1.0, %v3169_v16  ;;  %v3171_v9 = vpop.eup %3170 }
 0x3c9   : > { %v3173_v25 = vpop.eup %3172 }
 0x3ca   : > { %v4295_v10 = vpop.permute.xlu0 %2534  ;;  %3182 = vrcp.f32 %v517_v2  ;;  %v3175_v20 = vpop.eup %3174  ;;  %v916_v33 = vadd.f32 1.0, %v3173_v25 }
 0x3cb   : > { %v2539_v59 = vrot.slane %v4295_v10, %v4128_v45  ;;  %v2362_v10 = vadd.f32 %v2360_v36, %v2341_v55 }
 0x3ce   : > { %v4313_v49 = vpop.permute.xlu0 %2018 }
 0x3cf   : > { %v2023_v57 = vrot.slane %v4313_v49, %v4128_v45  ;;  %v2162_v49 = vadd.f32 %v2160_v29, %v2141_v58 }
 0x3d1   : > { %v2025_v34 = vadd.f32 %v2023_v57, %v2004_v47  ;;  %v2183_v40 = vadd.f32 %v2181_v27, %v2162_v49  ;;  %v3177_v57 = vpop.eup %3176  ;;  %v2303_v47 = vpop.permute.xlu1 %2302 }
 0x3d2   : > { %v4329_v42 = vpop.permute.xlu0 %2376  ;;  %v3179_v27 = vpop.eup %3178  ;;  %v1316_v49 = vadd.f32 1.0, %v3177_v57 }
 0x3d3   : > { %v2046_v48 = vadd.f32 %v2044_v50, %v2025_v34  ;;  %v2381_v4 = vrot.slane %v4329_v42, %v4128_v45  ;;  %v2204_v30 = vadd.f32 %v2202_v52, %v2183_v40  ;;  %v1516_v16 = vadd.f32 1.0, %v3179_v27 }
 0x3d5   : > { %v2383_v12 = vadd.f32 %v2381_v4, %v2362_v10  ;;  %v3181_v31 = vpop.eup %3180  ;;  %v2661_v36 = vpop.permute.xlu1 %2660 }
 0x3d6   : > { %v4339_v13 = vpop.permute.xlu0 %1860  ;;  %v2665_v4 = vrot.slane %v2661_v36, %v4128_v45 }
 0x3d7   : > { %v1865_v60 = vrot.slane %v4339_v13, %v4128_v45  ;;  %v1846_v13 = vadd.f32 %v1844_v22, %v1825_v44  ;;  %v2541_v44 = vadd.f32 %v2539_v59, %v2520_v23  ;;  %v2404_v32 = vadd.f32 %v2402_v1, %v2383_v12  ;;  %v3183_v55 = vpop.eup %3182 }
 0x3d9   : > { %v1867_v5 = vadd.f32 %v1865_v60, %v1846_v13  ;;  %v2244_v60 = vrot.slane %v4327_v0, %v4128_v45  ;;  %v2562_v29 = vadd.f32 %v2560_v6, %v2541_v44  ;;  %v1116_v0 = vadd.f32 1.0, %v3175_v20  ;;  %v2682_v10 = vpop.permute.xlu1 %2681 }
 0x3da   : > { %v4352_v11 = vpop.permute.xlu0 %2218 }
 0x3db   : > { %v1888_v3 = vadd.f32 %v1886_v38, %v1867_v5  ;;  %v2223_v62 = vrot.slane %v4352_v11, %v4128_v45  ;;  %v2086_v11 = vrot.slane %v4358_v7, %v4128_v45 }
 0x3dd   : > { %v2225_v14 = vadd.f32 %v2223_v62, %v2204_v30 }
 0x3de   : > { %v4360_v53 = vpop.permute.xlu0 %2576 }
 0x3df   : > { %v2581_v7 = vrot.slane %v4360_v53, %v4128_v45  ;;  %v2246_v54 = vadd.f32 %v2244_v60, %v2225_v14 }
 0x3e1   : > { %v2583_v5 = vadd.f32 %v2581_v7, %v2562_v29 }
 0x3e2   : > { %v2061_v26 = vpop.permute.xlu0 %2060 }
 0x3e3   : > { %v2065_v51 = vrot.slane %v2061_v26, %v4128_v45  ;;  %v716_v26 = vadd.f32 1.0, %v3171_v9 }
 0x3e5   : > { %v2067_v37 = vadd.f32 %v2065_v51, %v2046_v48  ;;  %v1716_v48 = vadd.f32 1.0, %v3181_v31 }
 0x3e6   : > { %v4385_v61 = vpop.permute.xlu0 %2418 }
 0x3e7   : > { %v2088_v21 = vadd.f32 %v2086_v11, %v2067_v37  ;;  %v2423_v13 = vrot.slane %v4385_v61, %v4128_v45  ;;  %v2307_v61 = vrot.slane %v2303_v47, %v4128_v45 }
 0x3e9   : > { %v2109_v58 = vadd.f32 %v2107_v39, %v2088_v21  ;;  %v2425_v50 = vadd.f32 %v2423_v13, %v2404_v32  ;;  %v2686_v21 = vrot.slane %v2682_v10, %v4128_v45 }
 0x3ea   : > { %v1903_v35 = vpop.permute.xlu0 %1902 }
 0x3eb   : > { %v1907_v18 = vrot.slane %v1903_v35, %v4128_v45  ;;  %v2444_v35 = vrot.slane %v4378_v15, %v4128_v45  ;;  %v2111_v41 = vmul.f32 0.01, %v2109_v58  ;;  %vm2110_vm15 = vcmp.ge.f32.partialorder %v2109_v58, 0.0 }
 0x3ec   : > { %v2465_v15 = vrot.slane %v4415_v8, %v4128_v45 }
 0x3ed   : > { %v1909_v46 = vadd.f32 %v1907_v18, %v1888_v3  ;;  %v2604_v3 = vadd.f32 %v2602_v43, %v2583_v5  ;;  %v2446_v52 = vadd.f32 %v2444_v35, %v2425_v50 }
 0x3ee   : > { %v2261_v28 = vpop.permute.xlu0 %2260 }
 0x3ef   : > { %vm1910_vm14 = vcmp.ge.f32.partialorder %v1909_v46, 0.0  ;;  %v1911_v63 = vmul.f32 0.01, %v1909_v46  ;;  %v2265_v56 = vrot.slane %v2261_v28, %v4128_v45 }
 0x3f1   : > { %v1912_v17 = vsel %vm1910_vm14, %v1909_v46, %v1911_v63  ;;  %v2267_v34 = vadd.f32 %v2265_v56, %v2246_v54  ;;  %v2112_v46 = vsel %vm2110_vm15, %v2109_v58, %v2111_v41  ;;  %v2467_v63 = vadd.f32 %v2465_v15, %v2446_v52 }
 0x3f2   : > { %v3026_v42 = vmul.f32 -1.442695, %v1912_v17  ;;  %v2619_v22 = vpop.permute.xlu0 %2618  ;;  %v3044_v30 = vmul.f32 -1.442695, %v2112_v46 }
 0x3f3   : > { %v2623_v24 = vrot.slane %v2619_v22, %v4128_v45 }
 0x3f4   : > { %3184 = vpow2.f32 %v3026_v42 }
 0x3f5   : > { %3186 = vrcp.f32 %v716_v26  ;;  %v2625_v59 = vadd.f32 %v2623_v24, %v2604_v3 }
 0x3f6   : > { %v2282_v53 = vpop.permute.xlu0 %2281  ;;  %3188 = vrcp.f32 %v916_v33 }
 0x3f7   : > { %v2286_v38 = vrot.slane %v2282_v53, %v4128_v45  ;;  %3190 = vrcp.f32 %v1116_v0 }
 0x3f8   : > { %3192 = vrcp.f32 %v1316_v49 }
 0x3f9   : > { %v2288_v51 = vadd.f32 %v2286_v38, %v2267_v34  ;;  %3194 = vrcp.f32 %v1516_v16 }
 0x3fa   : > { %v2640_v40 = vpop.permute.xlu0 %2639  ;;  %3196 = vrcp.f32 %v1716_v48  ;;  %v4537_v48 = vld [vmem:[#allocation25_spill] sm:$0xff] }
 0x3fb   : > { %v2309_v18 = vadd.f32 %v2307_v61, %v2288_v51  ;;  %v2644_v19 = vrot.slane %v2640_v40, %v4128_v45  ;;  %v2725_v52 = vsub.s32 0, %v4537_v48 }
 0x3fd   : > { %vm2310_vm0 = vcmp.ge.f32.partialorder %v2309_v18, 0.0  ;;  %v2311_v62 = vmul.f32 0.01, %v2309_v18  ;;  %v2646_v37 = vadd.f32 %v2644_v19, %v2625_v59 }
 0x3fe   : > { %v2482_v2 = vpop.permute.xlu0 %2481 }
 0x3ff   : > { %v2312_v23 = vsel %vm2310_vm0, %v2309_v18, %v2311_v62  ;;  %v2486_v28 = vrot.slane %v2482_v2, %v4128_v45  ;;  %v2667_v14 = vadd.f32 %v2665_v4, %v2646_v37  ;;  %v2730_v2 = vld [vmem:[%s3384_s30] sm:$0xff]  ;;  %s2762_s30 = scalar_lea.hbm %s4488_s3, %s3105_s8 }
 0x400   : > { %v3062_v25 = vmul.f32 -1.442695, %v2312_v23 }
 0x401   : > { %v3185_v9 = vpop.eup %3184  ;;  %v2488_v17 = vadd.f32 %v2486_v28, %v2467_v63  ;;  %v2688_v7 = vadd.f32 %v2686_v21, %v2667_v14 }
 0x402   : > { %v1916_v11 = vadd.f32 1.0, %v3185_v9  ;;  %v2503_v6 = vpop.permute.xlu0 %2502  ;;  %v3187_v44 = vpop.eup %3186 }
 0x403   : > { %v2507_v26 = vrot.slane %v2503_v6, %v4128_v45  ;;  %v3189_v8 = vpop.eup %3188  ;;  %v719_v20 = vadd.f32 %v3187_v44, %v3183_v55  ;;  %v2732_v55 = vcombine.high %v2730_v2, %v2730_v2 }
 0x404   : > { %3198 = vrcp.f32 %v1916_v11  ;;  %v3191_v60 = vpop.eup %3190 }
 0x405   : > { %3200 = vpow2.f32 %v3044_v30  ;;  %v2509_v42 = vadd.f32 %v2507_v26, %v2488_v17  ;;  %v919_v33 = vadd.f32 %v3189_v8, %v719_v20  ;;  %v3193_v39 = vpop.eup %3192 }
 0x406   : > { %3202 = vpow2.f32 %v3062_v25  ;;  %v2703_v22 = vpop.permute.xlu0 %2702  ;;  %v3195_v54 = vpop.eup %3194 }
 0x407   : > { %vm2510_vm1 = vcmp.ge.f32.partialorder %v2509_v42, 0.0  ;;  %v2511_v12 = vmul.f32 0.01, %v2509_v42  ;;  %v2707_v56 = vrot.slane %v2703_v22, %v4128_v45  ;;  %v1119_v13 = vadd.f32 %v3191_v60, %v919_v33  ;;  %v3197_v58 = vpop.eup %3196 }
 0x409   : > { %v2512_v57 = vsel %vm2510_vm1, %v2509_v42, %v2511_v12  ;;  %v2709_v1 = vadd.f32 %v2707_v56, %v2688_v7  ;;  %v1319_v47 = vadd.f32 %v3193_v39, %v1119_v13 }
 0x40a   : > { %v3080_v29 = vmul.f32 -1.442695, %v2512_v57 }
 0x40b   : > { %vm2710_vm2 = vcmp.ge.f32.partialorder %v2709_v1, 0.0  ;;  %v2711_v0 = vmul.f32 0.01, %v2709_v1  ;;  %v1519_v5 = vadd.f32 %v3195_v54, %v1319_v47 }
 0x40c   : > { %3204 = vpow2.f32 %v3080_v29 }
 0x40d   : > { %v2712_v53 = vsel %vm2710_vm2, %v2709_v1, %v2711_v0  ;;  %v1719_v32 = vadd.f32 %v3197_v58, %v1519_v5 }
 0x40e   : > { %v3098_v27 = vmul.f32 -1.442695, %v2712_v53 }
 0x410   : > { %3206 = vpow2.f32 %v3098_v27 }
 0x411   : > { %v3199_v34 = vpop.eup %3198 }
 0x412   : > { %v3201_v38 = vpop.eup %3200  ;;  %v1919_v45 = vadd.f32 %v3199_v34, %v1719_v32 }
 0x413   : > { %v3203_v43 = vpop.eup %3202  ;;  %v2116_v49 = vadd.f32 1.0, %v3201_v38 }
 0x414   : > { %v2316_v31 = vadd.f32 1.0, %v3203_v43 }
 0x415   : > { %3208 = vrcp.f32 %v2116_v49 }
 0x416   : > { %3210 = vrcp.f32 %v2316_v31 }
 0x419   : > { %v3205_v61 = vpop.eup %3204 }
 0x41a   : > { %v2516_v50 = vadd.f32 1.0, %v3205_v61 }
 0x41c   : > { %3212 = vrcp.f32 %v2516_v50 }
 0x41d   : > { %v3207_v24 = vpop.eup %3206 }
 0x41e   : > { %v2716_v51 = vadd.f32 1.0, %v3207_v24 }
 0x420   : > { %3214 = vrcp.f32 %v2716_v51 }
 0x422   : > { %v3209_v35 = vpop.eup %3208 }
 0x423   : > { %v3211_v16 = vpop.eup %3210  ;;  %v2119_v41 = vadd.f32 %v3209_v35, %v1919_v45 }
 0x425   : > { %v2319_v3 = vadd.f32 %v3211_v16, %v2119_v41 }
 0x429   : > { %v3213_v40 = vpop.eup %3212 }
 0x42a   : > { %v2519_v18 = vadd.f32 %v3213_v40, %v2319_v3 }
 0x42d   : > { %v3215_v19 = vpop.eup %3214 }
 0x42e   : > { %v2719_v36 = vadd.f32 %v3215_v19, %v2519_v18 }
 0x430   : > { %vm2720_vm3 = vcmp.ge.f32.partialorder %v2719_v36, 0.0  ;;  %v2721_v59 = vmul.f32 0.01, %v2719_v36 }
 0x432   : > { %v2722_v62 = vsel %vm2720_vm3, %v2719_v36, %v2721_v59 }
 0x433   : > { %v2726_v46 = vrot.slane %v2722_v62, %v2725_v52 }
 0x435   : > { %2728 = vbcast.lane.b32.xlu1 %v2726_v46, 256 }
 0x4a7   : > { %v2729_v15 = vpop.permute.xlu1 %2728 }
 0x4a8   : > { %v2734_v23 = vmul.f32 %v2730_v2, %v2729_v15  ;;  %v2735_v37 = vmul.f32 %v2732_v55, %v2729_v15 }
 0x4aa   : > { %vm2736_vm4 = vcmp.ge.f32.partialorder %v2734_v23, 0.0  ;;  %vm2737_vm5 = vcmp.ge.f32.partialorder %v2735_v37, 0.0  ;;  %v2738_v28 = vmul.f32 0.01, %v2734_v23  ;;  %v2739_v9 = vmul.f32 0.01, %v2735_v37 }
 0x4ac   : > { %v2740_v4 = vsel %vm2736_vm4, %v2734_v23, %v2738_v28  ;;  %v2741_v30 = vsel %vm2737_vm5, %v2735_v37, %v2739_v9 }
 0x4ad   : > { %v2744_v63 = vcombine.low %v2740_v4, %v2741_v30 }
 0x4af   : > { %2746 = vst [vmem:[%s213_s9] sm:$0xff] %v2744_v63 }
 0x4b0   : > { %3229 = shalt.err (!%p3226_p5)
}
 0x4b1   : > { %s3230_s27 = scalar_lea.hbm %s2762_s30, 128  ;;  %s3234_s4 = scalar_lea.hbm %s4488_s3, 256 }
 0x4b2   : > { %p3231_p6 = scmp.ne.s32.totalorder %s2762_s30, %s3230_s27  ;;  %p3235_p10 = scmp.lt.s32.totalorder %s2762_s30, %s4488_s3 }
 0x4b3   : > { %p3236_p11 = scmp.lt.s32.totalorder %s3234_s4, %s3230_s27 }
 0x4b4   : > { %p3232_p7 = pnand %p3231_p6, %p3358_p4 }
 0x4b5   : > { %p3237_p12 = por %p3236_p11, %p3235_p10 }
 0x4b6   : > { %p3233_p9 = pneg %p3232_p7 }
 0x4b8   : > { %p3238_p13 = pnand %p3237_p12, %p3233_p9 }
 0x4ba   : > { %3241 = shalt.err (!%p3238_p13)
}
 0x4bb   : > { %3106 = dma.vmem_to_hbm [thread:$0]  (%p3358_p4), %s2765_s10, 128, %s2762_s30, %s2748_s19  }
 0x4bc PF: > { %p3112_p0 = scmp.ge.s32.totalorder %s3292_s17, 2  ;;  %s2776_s7 = sand.u32 1, %s3272_s12  }
 0x4bd   : > { %s2777_s8 = scalar_lea.sflag [#allocation3], %s2776_s7 }
 0x4be   : > { %p3109_p1 = pnand %p3112_p0, %p3365_p8 }
 0x4c0   : > { %p3110_p2 = pneg %p3109_p1 }
 0x4c2   : > { %3267 = dma.done.wait (%p3110_p2), %s2777_s8, 128  }
 0x4c3   : > { %3269 = vsyncadd (%p3110_p2), %s2777_s8, 4294967168  ;;  %s16_s17 = sadd.s32 1, %s3292_s17   ;;  %s4538_s12 = smov %s3276_s13 }
 0x4c4   : > { %p13_p3 = scmp.ge.s32.totalorder %s16_s17, 4   ;;  %s4539_s13 = smov %s3280_s14 }
 0x4c5   : > { %s4540_s14 = smov %s3371_s25  ;;  %s4541_s15 = smov %s3288_s16 }
 0x4c6   : > { %s4542_s16 = smov %s4544_s20  ;;  %15 = sbr.rel (!%p13_p3) target bundleno = 4 (0x4), region = 81 }
 0x4cb   :  { %2782 = vsyncpa [#allocation3], 1 }
 0x4cc   :  { %2784 = vsyncpa [#allocation3 + $0x1], 1 }

</bundles_post_ra>
